<compile_context>
chip_gen: v7x
topology: tpu7x:2x2x1
jax: 0.10.0
libtpu: 0.0.40
codegen_flags: <defaults>
</compile_context>

<pallas_src>
import functools

import numpy as np
import jax
import jax.numpy as jnp
from jax.experimental import pallas as pl
from jax.experimental.pallas import tpu as pltpu

# ------------------------------ configuration ------------------------------
BINS = (1, 2, 3, 6)
ENC_DIM = 32                       # encoder_dim (small synthetic size)
RED_DIM = ENC_DIM // len(BINS)     # int(fea_dim / len(bins)) = 8
CLS_MID = 512                      # hard-coded in the module
CLASSES = 17                       # default classes
CLS_PAD = 128                      # classes padded to a full lane group
TOT = sum(b * b for b in BINS)     # 50 pooled positions across all bins
TOT_PAD = 64                       # padded to a sublane-friendly size
BN_EPS = 1e-5
CHUNK = 256                        # head Cout chunk (256-wide MXU on v6e/v7x)
# TODO(synk): on v5e (4x128 MXU) CHUNK=128 is the better choice.


# ------------------------------ Pallas kernel ------------------------------

def _pspnet_kernel(x_ref, pool2_ref, encw_ref, pall_ref, wcat_ref, pshift_ref,
                   pmask_ref, ustk_ref, w3_ref, cshift_ref, w1_ref, b1_ref,
                   ufin_ref, feat_ref, out_ref, xpad_ref, *,
                   H, W, Cin2, Cmid, Cpad, chunk):
    """Fully-fused PSPNet forward for one image (one grid step)."""
    HW = H * W

    # ---- encoder stand-in: 1x1 conv reassociated before the 2x2 avg-pool ----
    # pool and 1x1 conv are both linear => pool2 @ (x @ W) == (pool2 @ x) @ W;
    # this makes the K=Hin*Win contraction produce ENC_DIM output lanes.
    y = jnp.dot(x_ref[0], encw_ref[...],
                preferred_element_type=jnp.float32)                 # (HinWin, ENC)
    feat = jnp.maximum(
        jnp.dot(pool2_ref[...], y, preferred_element_type=jnp.float32), 0.0)
    feat_ref[0] = feat                                              # (HW, ENC) f32

    # ---- PPM: all 4 bins stacked into block matrices (rows padded to TOT_PAD) ----
    pooled = jnp.dot(pall_ref[...], feat,
                     preferred_element_type=jnp.float32)            # (TOT_PAD, ENC)
    z = jnp.dot(pooled.astype(jnp.bfloat16), wcat_ref[...],
                preferred_element_type=jnp.float32)                 # (TOT_PAD, 4*RED)
    # BN scale is pre-folded into wcat; shift + ReLU + block-diagonal mask.
    z = jnp.maximum(z + pshift_ref[...], 0.0) * pmask_ref[...]
    ppm = jnp.dot(ustk_ref[...], z,
                  preferred_element_type=jnp.float32)               # (HW, 4*RED)

    # ---- concat stays in VMEM; zero-pad (pad=1) into the f32 scratch ----
    cat = jnp.concatenate([feat, ppm], axis=-1)                     # (HW, 2*ENC) f32
    xpad_ref[...] = jnp.zeros_like(xpad_ref)
    xpad_ref[pl.ds(1, H), pl.ds(1, W), :] = cat.reshape(H, W, Cin2)

    # ---- classifier head: 3x3 conv as 9 accumulated matmuls from ref slices,
    #      Cout chunked so the 512-wide intermediate never leaves VMEM,
    #      1x1 classifier conv fused into the same chunk loop. ----
    logits = jnp.zeros((HW, Cpad), jnp.float32)
    for c0 in range(0, Cmid, chunk):
        mid = jnp.zeros((HW, chunk), jnp.float32)
        for k in range(9):
            kh, kw = divmod(k, 3)
            xs = xpad_ref[pl.ds(kh, H), pl.ds(kw, W), :].reshape(HW, Cin2)
            mid += jnp.dot(xs.astype(jnp.bfloat16), w3_ref[k, :, c0:c0 + chunk],
                           preferred_element_type=jnp.float32)
        # BN scale folded into w3; shift + ReLU epilogue only.
        mid = jnp.maximum(mid + cshift_ref[:, c0:c0 + chunk], 0.0)
        # TODO(synk): Dropout2d(p=0.1) is a training-only op; identity at inference.
        logits += jnp.dot(mid.astype(jnp.bfloat16), w1_ref[c0:c0 + chunk, :],
                          preferred_element_type=jnp.float32)
    logits += b1_ref[...]

    # ---- final bilinear upsample in f32 (class-score fidelity), lane-dense store ----
    up = jnp.dot(ufin_ref[...], logits, preferred_element_type=jnp.float32)
    out_ref[0] = up.astype(out_ref.dtype)                           # (HoutWout, Cpad)


def pspnet_fused(x_flat, p, *, H, W):
    N, HinWin, Cin = x_flat.shape
    HW = H * W
    Cin2 = 2 * ENC_DIM
    C4 = len(BINS) * RED_DIM
    HWout = p["U_final"].shape[0]
    kern = functools.partial(_pspnet_kernel, H=H, W=W, Cin2=Cin2, Cmid=CLS_MID,
                             Cpad=CLS_PAD, chunk=CHUNK)
    return pl.pallas_call(
        kern,
        out_shape=(jax.ShapeDtypeStruct((N, HW, ENC_DIM), jnp.float32),
                   jax.ShapeDtypeStruct((N, HWout, CLS_PAD), jnp.float32)),
        grid_spec=pltpu.PrefetchScalarGridSpec(
            num_scalar_prefetch=0,
            grid=(N,),
            in_specs=[
                pl.BlockSpec((1, HinWin, Cin), lambda n: (n, 0, 0)),
                pl.BlockSpec((HW, HinWin), lambda n: (0, 0)),
                pl.BlockSpec((Cin, ENC_DIM), lambda n: (0, 0)),
                pl.BlockSpec((TOT_PAD, HW), lambda n: (0, 0)),
                pl.BlockSpec((ENC_DIM, C4), lambda n: (0, 0)),
                pl.BlockSpec((1, C4), lambda n: (0, 0)),
                pl.BlockSpec((TOT_PAD, C4), lambda n: (0, 0)),
                pl.BlockSpec((HW, TOT_PAD), lambda n: (0, 0)),
                pl.BlockSpec((9, Cin2, CLS_MID), lambda n: (0, 0, 0)),
                pl.BlockSpec((1, CLS_MID), lambda n: (0, 0)),
                pl.BlockSpec((CLS_MID, CLS_PAD), lambda n: (0, 0)),
                pl.BlockSpec((1, CLS_PAD), lambda n: (0, 0)),
                pl.BlockSpec((HWout, HW), lambda n: (0, 0)),
            ],
            out_specs=[
                # feat is the module's multiscale_feat output (small side write).
                pl.BlockSpec((1, HW, ENC_DIM), lambda n: (n, 0, 0)),
                pl.BlockSpec((1, HWout, CLS_PAD), lambda n: (n, 0, 0)),
            ],
            scratch_shapes=[pltpu.VMEM((H + 2, W + 2, Cin2), jnp.float32)]),
        compiler_params=pltpu.CompilerParams(
            dimension_semantics=("parallel",)),
    )(x_flat, p["pool2"], p["enc_w"], p["P_all"], p["W_cat"], p["ppm_shift"],
      p["ppm_mask"], p["U_stack"], p["cls_w3"], p["cls_shift"], p["cls_w1"],
      p["cls_b1"], p["U_final"])


# --------------------------- matrices / parameters ---------------------------

def adaptive_pool_matrix_1d(size_in, size_out):
    """Rows of PyTorch AdaptiveAvgPool averaging weights."""
    M = np.zeros((size_out, size_in), np.float32)
    for i in range(size_out):
        start = (i * size_in) // size_out
        end = -((-(i + 1) * size_in) // size_out)   # ceil((i+1)*size_in/size_out)
        M[i, start:end] = 1.0 / (end - start)
    return M


def bilinear_matrix_1d(size_in, size_out):
    """Bilinear interpolation weights, align_corners=True (standard PSPNet)."""
    M = np.zeros((size_out, size_in), np.float32)
    if size_in == 1:
        M[:, 0] = 1.0
        return M
    for i in range(size_out):
        src = i * (size_in - 1) / (size_out - 1) if size_out > 1 else 0.0
        i0 = min(int(np.floor(src)), size_in - 1)
        i1 = min(i0 + 1, size_in - 1)
        f = src - i0
        M[i, i0] += 1.0 - f
        M[i, i1] += f
    return M


def fold_bn(gamma, beta, mean, var, eps=BN_EPS):
    scale = gamma / jnp.sqrt(var + eps)
    shift = beta - mean * scale
    return scale, shift


def init_params(key, in_ch, feat_h, feat_w, img_h, img_w):
    ks = jax.random.split(key, 20)
    p = {}

    # synthetic encoder stand-in: 2x2 avg-pool (pooling matrix, f32) + 1x1 conv
    p["pool2"] = jnp.asarray(
        np.kron(adaptive_pool_matrix_1d(img_h, feat_h),
                adaptive_pool_matrix_1d(img_w, feat_w)), jnp.float32)           # (HW, imgHW)
    p["enc_w"] = (jax.random.normal(ks[0], (in_ch, ENC_DIM), jnp.float32)
                  * 0.5).astype(jnp.bfloat16)

    # fused PPM block matrices (rows padded TOT -> TOT_PAD for aligned tiles)
    P_list, U_list, W_list, s_list, c_list = [], [], [], [], []
    for i, b in enumerate(BINS):
        P_list.append(np.kron(adaptive_pool_matrix_1d(feat_h, b),
                              adaptive_pool_matrix_1d(feat_w, b)))              # (b*b, HW)
        U_list.append(np.kron(bilinear_matrix_1d(b, feat_h),
                              bilinear_matrix_1d(b, feat_w)))                   # (HW, b*b)
        W_list.append(jax.random.normal(ks[1 + i], (ENC_DIM, RED_DIM), jnp.float32)
                      / np.sqrt(ENC_DIM))
        gamma = jax.random.uniform(ks[5 + i], (RED_DIM,), jnp.float32, 0.8, 1.2)
        beta = jax.random.normal(ks[9 + i], (RED_DIM,), jnp.float32) * 0.05
        s, c = fold_bn(gamma, beta, jnp.zeros((RED_DIM,)), jnp.ones((RED_DIM,)))
        s_list.append(s)
        c_list.append(c)
    C4 = len(BINS) * RED_DIM
    P_all = np.zeros((TOT_PAD, feat_h * feat_w), np.float32)
    P_all[:TOT] = np.concatenate(P_list, axis=0)
    U_stack = np.zeros((feat_h * feat_w, TOT_PAD), np.float32)
    U_stack[:, :TOT] = np.concatenate(U_list, axis=1)
    p["P_all"] = jnp.asarray(P_all)                                             # (TOT_PAD, HW) f32
    p["U_stack"] = jnp.asarray(U_stack)                                         # (HW, TOT_PAD) f32
    scale = jnp.concatenate(s_list)                                             # (C4,)
    # BN scale folded into the 1x1 conv weights -> only shift+ReLU in-kernel.
    p["W_cat"] = (jnp.concatenate(W_list, axis=1) * scale[None, :]).astype(jnp.bfloat16)
    p["ppm_shift"] = jnp.concatenate(c_list).reshape(1, C4)                     # f32
    mask = np.zeros((TOT_PAD, C4), np.float32)
    r = 0
    for i, b in enumerate(BINS):
        mask[r:r + b * b, i * RED_DIM:(i + 1) * RED_DIM] = 1.0
        r += b * b
    p["ppm_mask"] = jnp.asarray(mask)                                           # block-diag (padded rows = 0)

    # classifier head: BN scale folded into the 3x3 conv weights
    fea_dim = 2 * ENC_DIM
    w3 = jax.random.normal(ks[13], (3, 3, fea_dim, CLS_MID), jnp.float32) / np.sqrt(9 * fea_dim)
    gamma = jax.random.uniform(ks[14], (CLS_MID,), jnp.float32, 0.8, 1.2)
    beta = jax.random.normal(ks[15], (CLS_MID,), jnp.float32) * 0.05
    s, c = fold_bn(gamma, beta, jnp.zeros((CLS_MID,)), jnp.ones((CLS_MID,)))
    p["cls_w3"] = (w3.reshape(9, fea_dim, CLS_MID) * s[None, None, :]).astype(jnp.bfloat16)
    p["cls_shift"] = c.reshape(1, CLS_MID)
    w1 = jax.random.normal(ks[16], (CLS_MID, CLASSES), jnp.float32) / np.sqrt(CLS_MID)
    b1 = jax.random.normal(ks[17], (CLASSES,), jnp.float32) * 0.01
    # pad output channels 17 -> 128 for lane-dense stores; extra lanes are zero
    p["cls_w1"] = jnp.zeros((CLS_MID, CLS_PAD), jnp.float32).at[:, :CLASSES].set(w1) \
                      .astype(jnp.bfloat16)
    p["cls_b1"] = jnp.zeros((1, CLS_PAD), jnp.float32).at[:, :CLASSES].set(b1)

    # final bilinear upsample (feature size -> input size), f32 for fidelity
    p["U_final"] = jnp.asarray(np.kron(bilinear_matrix_1d(feat_h, img_h),
                                       bilinear_matrix_1d(feat_w, img_w)),
                               jnp.float32)                                     # (imgHW, HW)
    # TODO(synk): at real PSPNet sizes (encoder_dim=2048, large H/W) tile cls_w3 over
    # K/Cout grid axes and replace the dense Kronecker pool/upsample matrices with
    # separable row/col matmuls so the resident weights fit v7x's 64 MiB VMEM.
    return p


# --------------------------------- forward ---------------------------------

def pspnet_forward(x_nchw, params):
    N, Cin_img, Hin, Win = x_nchw.shape
    H, W = Hin // 2, Win // 2

    # NCHW -> flattened NHWC (layout glue only; all math is in the kernel)
    x_flat = jnp.transpose(x_nchw, (0, 2, 3, 1)).reshape(N, Hin * Win, Cin_img)
    x_flat = x_flat.astype(jnp.bfloat16)

    # encoder stand-in + PPM + concat + classifier head + upsample, fully fused
    feat, up = pspnet_fused(x_flat, params, H=H, W=W)   # (N,HW,32) f32, (N,HinWin,128) f32
    multiscale_feat = (jnp.transpose(feat.reshape(N, H, W, ENC_DIM), (0, 3, 1, 2)),)

    logits = up[..., :CLASSES]                          # drop lane padding
    final_sem = jnp.transpose(logits.reshape(N, Hin, Win, CLASSES), (0, 3, 1, 2))
    return multiscale_feat, final_sem


# ----------------------------------- main -----------------------------------

if __name__ == "__main__":
    key = jax.random.PRNGKey(0)
    kx, kp = jax.random.split(key)

    x = jax.random.normal(kx, (2, 4, 16, 16), jnp.float32)   # NCHW input image
    params = init_params(kp, in_ch=4, feat_h=8, feat_w=8, img_h=16, img_w=16)

    feats, final_sem = jax.jit(pspnet_forward)(x, params)
    final_sem = jax.block_until_ready(final_sem)
    jax.block_until_ready(feats)

    assert feats[0].shape == (2, ENC_DIM, 8, 8)
    assert final_sem.shape == (2, CLASSES, 16, 16)
    assert bool(jnp.all(jnp.isfinite(final_sem)))
    print("KERNEL_OK")
</pallas_src>

<mosaic_0001>
module attributes {stable_mosaic.version = 11 : i64} {
  func.func @_pspnet_kernel(%arg0: i32, %arg1: memref<1x256x4xbf16, #tpu.memory_space<vmem>>, %arg2: memref<64x256xf32, #tpu.memory_space<vmem>>, %arg3: memref<4x32xbf16, #tpu.memory_space<vmem>>, %arg4: memref<64x64xf32, #tpu.memory_space<vmem>>, %arg5: memref<32x32xbf16, #tpu.memory_space<vmem>>, %arg6: memref<1x32xf32, #tpu.memory_space<vmem>>, %arg7: memref<64x32xf32, #tpu.memory_space<vmem>>, %arg8: memref<64x64xf32, #tpu.memory_space<vmem>>, %arg9: memref<9x64x512xbf16, #tpu.memory_space<vmem>>, %arg10: memref<1x512xf32, #tpu.memory_space<vmem>>, %arg11: memref<512x128xbf16, #tpu.memory_space<vmem>>, %arg12: memref<1x128xf32, #tpu.memory_space<vmem>>, %arg13: memref<256x64xf32, #tpu.memory_space<vmem>>, %arg14: memref<1x64x32xf32, #tpu.memory_space<vmem>>, %arg15: memref<1x256x128xf32, #tpu.memory_space<vmem>>, %arg16: memref<10x10x64xf32, #tpu.memory_space<vmem>>) attributes {dimension_semantics = [#tpu.dimension_semantics<parallel>], iteration_bounds = array<i64: 2>, scalar_prefetch = 0 : i64, scratch_operands = 1 : i64, tpu.core_type = #tpu.core_type<tc>, window_params = [{transform_indices = @transform_0, window_bounds = array<i64: 1, 256, 4>}, {pipeline_mode = #tpu.pipeline_mode<synchronous>, transform_indices = @transform_1, window_bounds = array<i64: 64, 256>}, {pipeline_mode = #tpu.pipeline_mode<synchronous>, transform_indices = @transform_2, window_bounds = array<i64: 4, 32>}, {pipeline_mode = #tpu.pipeline_mode<synchronous>, transform_indices = @transform_3, window_bounds = array<i64: 64, 64>}, {pipeline_mode = #tpu.pipeline_mode<synchronous>, transform_indices = @transform_4, window_bounds = array<i64: 32, 32>}, {pipeline_mode = #tpu.pipeline_mode<synchronous>, transform_indices = @transform_5, window_bounds = array<i64: 1, 32>}, {pipeline_mode = #tpu.pipeline_mode<synchronous>, transform_indices = @transform_6, window_bounds = array<i64: 64, 32>}, {pipeline_mode = #tpu.pipeline_mode<synchronous>, transform_indices = @transform_7, window_bounds = array<i64: 64, 64>}, {pipeline_mode = #tpu.pipeline_mode<synchronous>, transform_indices = @transform_8, window_bounds = array<i64: 9, 64, 512>}, {pipeline_mode = #tpu.pipeline_mode<synchronous>, transform_indices = @transform_9, window_bounds = array<i64: 1, 512>}, {pipeline_mode = #tpu.pipeline_mode<synchronous>, transform_indices = @transform_10, window_bounds = array<i64: 512, 128>}, {pipeline_mode = #tpu.pipeline_mode<synchronous>, transform_indices = @transform_11, window_bounds = array<i64: 1, 128>}, {pipeline_mode = #tpu.pipeline_mode<synchronous>, transform_indices = @transform_12, window_bounds = array<i64: 256, 64>}, {transform_indices = @transform_13, window_bounds = array<i64: 1, 64, 32>}, {transform_indices = @transform_14, window_bounds = array<i64: 1, 256, 128>}]} {
    %c0 = arith.constant 0 : index
    %c0_0 = arith.constant 0 : index
    %c0_1 = arith.constant 0 : index
    %0 = vector.load %arg1[%c0, %c0_0, %c0_1] : memref<1x256x4xbf16, #tpu.memory_space<vmem>>, vector<1x256x4xbf16>
    %1 = vector.shape_cast %0 : vector<1x256x4xbf16> to vector<256x4xbf16>
    %c0_2 = arith.constant 0 : index
    %c0_3 = arith.constant 0 : index
    %2 = vector.load %arg3[%c0_2, %c0_3] : memref<4x32xbf16, #tpu.memory_space<vmem>>, vector<4x32xbf16>
    %cst = arith.constant dense<0.000000e+00> : vector<256x32xf32>
    %3 = tpu.matmul %1, %2, %cst {dimension_numbers = #tpu.dot_dimension_numbers<[1], [0], [0], [1], [0, 0, 1, 1], [], []>} : vector<256x4xbf16>, vector<4x32xbf16>, vector<256x32xf32> -> vector<256x32xf32>
    %c0_4 = arith.constant 0 : index
    %c0_5 = arith.constant 0 : index
    %4 = vector.load %arg2[%c0_4, %c0_5] : memref<64x256xf32, #tpu.memory_space<vmem>>, vector<64x256xf32>
    %cst_6 = arith.constant dense<0.000000e+00> : vector<64x32xf32>
    %5 = tpu.matmul %4, %3, %cst_6 {dimension_numbers = #tpu.dot_dimension_numbers<[1], [0], [0], [1], [0, 0, 1, 1], [], []>} : vector<64x256xf32>, vector<256x32xf32>, vector<64x32xf32> -> vector<64x32xf32>
    %cst_7 = arith.constant 0.000000e+00 : f32
    %6 = vector.broadcast %cst_7 : f32 to vector<64x32xf32>
    %7 = arith.maximumf %5, %6 : vector<64x32xf32>
    %c0_8 = arith.constant 0 : index
    %c0_9 = arith.constant 0 : index
    %c0_10 = arith.constant 0 : index
    %8 = vector.load %arg14[%c0_8, %c0_9, %c0_10] : memref<1x64x32xf32, #tpu.memory_space<vmem>>, vector<1x64x32xf32>
    %9 = vector.shape_cast %8 : vector<1x64x32xf32> to vector<64x32xf32>
    %10 = vector.shape_cast %7 : vector<64x32xf32> to vector<1x64x32xf32>
    tpu.vector_store %arg14[%c0_8, %c0_9, %c0_10], %10 {strides = array<i32>} : memref<1x64x32xf32, #tpu.memory_space<vmem>>, vector<1x64x32xf32>,
    %c0_11 = arith.constant 0 : index
    %c0_12 = arith.constant 0 : index
    %11 = vector.load %arg4[%c0_11, %c0_12] : memref<64x64xf32, #tpu.memory_space<vmem>>, vector<64x64xf32>
    %cst_13 = arith.constant dense<0.000000e+00> : vector<64x32xf32>
    %12 = tpu.matmul %11, %7, %cst_13 {dimension_numbers = #tpu.dot_dimension_numbers<[1], [0], [0], [1], [0, 0, 1, 1], [], []>} : vector<64x64xf32>, vector<64x32xf32>, vector<64x32xf32> -> vector<64x32xf32>
    %13 = arith.truncf %12 : vector<64x32xf32> to vector<64x32xbf16>
    %c0_14 = arith.constant 0 : index
    %c0_15 = arith.constant 0 : index
    %14 = vector.load %arg5[%c0_14, %c0_15] : memref<32x32xbf16, #tpu.memory_space<vmem>>, vector<32x32xbf16>
    %cst_16 = arith.constant dense<0.000000e+00> : vector<64x32xf32>
    %15 = tpu.matmul %13, %14, %cst_16 {dimension_numbers = #tpu.dot_dimension_numbers<[1], [0], [0], [1], [0, 0, 1, 1], [], []>} : vector<64x32xbf16>, vector<32x32xbf16>, vector<64x32xf32> -> vector<64x32xf32>
    %c0_17 = arith.constant 0 : index
    %c0_18 = arith.constant 0 : index
    %16 = vector.load %arg6[%c0_17, %c0_18] : memref<1x32xf32, #tpu.memory_space<vmem>>, vector<1x32xf32>
    %17 = vector.broadcast %16 : vector<1x32xf32> to vector<64x32xf32>
    %18 = arith.addf %15, %17 : vector<64x32xf32>
    %cst_19 = arith.constant 0.000000e+00 : f32
    %19 = vector.broadcast %cst_19 : f32 to vector<64x32xf32>
    %20 = arith.maximumf %18, %19 : vector<64x32xf32>
    %c0_20 = arith.constant 0 : index
    %c0_21 = arith.constant 0 : index
    %21 = vector.load %arg7[%c0_20, %c0_21] : memref<64x32xf32, #tpu.memory_space<vmem>>, vector<64x32xf32>
    %22 = arith.mulf %20, %21 : vector<64x32xf32>
    %c0_22 = arith.constant 0 : index
    %c0_23 = arith.constant 0 : index
    %23 = vector.load %arg8[%c0_22, %c0_23] : memref<64x64xf32, #tpu.memory_space<vmem>>, vector<64x64xf32>
    %cst_24 = arith.constant dense<0.000000e+00> : vector<64x32xf32>
    %24 = tpu.matmul %23, %22, %cst_24 {dimension_numbers = #tpu.dot_dimension_numbers<[1], [0], [0], [1], [0, 0, 1, 1], [], []>} : vector<64x64xf32>, vector<64x32xf32>, vector<64x32xf32> -> vector<64x32xf32>
    %25 = tpu.concatenate %7, %24 in 1 : vector<64x32xf32>, vector<64x32xf32> -> vector<64x64xf32>
    %cst_25 = arith.constant 0.000000e+00 : f32
    %26 = vector.broadcast %cst_25 : f32 to vector<10x10x64xf32>
    %c0_26 = arith.constant 0 : index
    %c0_27 = arith.constant 0 : index
    %c0_28 = arith.constant 0 : index
    %27 = vector.load %arg16[%c0_26, %c0_27, %c0_28] : memref<10x10x64xf32, #tpu.memory_space<vmem>>, vector<10x10x64xf32>
    tpu.vector_store %arg16[%c0_26, %c0_27, %c0_28], %26 {strides = array<i32>} : memref<10x10x64xf32, #tpu.memory_space<vmem>>, vector<10x10x64xf32>,
    %28 = vector.shape_cast %25 : vector<64x64xf32> to vector<8x8x64xf32>
    %c1 = arith.constant 1 : index
    %c1_29 = arith.constant 1 : index
    %c0_30 = arith.constant 0 : index
    %29 = vector.load %arg16[%c1, %c1_29, %c0_30] : memref<10x10x64xf32, #tpu.memory_space<vmem>>, vector<8x8x64xf32>
    tpu.vector_store %arg16[%c1, %c1_29, %c0_30], %28 {strides = array<i32>} : memref<10x10x64xf32, #tpu.memory_space<vmem>>, vector<8x8x64xf32>,
    %cst_31 = arith.constant 0.000000e+00 : f32
    %30 = vector.broadcast %cst_31 : f32 to vector<64x128xf32>
    %cst_32 = arith.constant 0.000000e+00 : f32
    %31 = vector.broadcast %cst_32 : f32 to vector<64x256xf32>
    %c0_33 = arith.constant 0 : index
    %c0_34 = arith.constant 0 : index
    %c0_35 = arith.constant 0 : index
    %32 = vector.load %arg16[%c0_33, %c0_34, %c0_35] : memref<10x10x64xf32, #tpu.memory_space<vmem>>, vector<8x8x64xf32>
    %33 = vector.shape_cast %32 : vector<8x8x64xf32> to vector<64x64xf32>
    %34 = arith.truncf %33 : vector<64x64xf32> to vector<64x64xbf16>
    %c0_36 = arith.constant 0 : index
    %c0_37 = arith.constant 0 : index
    %c0_38 = arith.constant 0 : index
    %35 = vector.load %arg9[%c0_36, %c0_37, %c0_38] : memref<9x64x512xbf16, #tpu.memory_space<vmem>>, vector<1x64x256xbf16>
    %36 = vector.shape_cast %35 : vector<1x64x256xbf16> to vector<64x256xbf16>
    %cst_39 = arith.constant dense<0.000000e+00> : vector<64x256xf32>
    %37 = tpu.matmul %34, %36, %cst_39 {dimension_numbers = #tpu.dot_dimension_numbers<[1], [0], [0], [1], [0, 0, 1, 1], [], []>} : vector<64x64xbf16>, vector<64x256xbf16>, vector<64x256xf32> -> vector<64x256xf32>
    %38 = arith.addf %31, %37 : vector<64x256xf32>
    %c0_40 = arith.constant 0 : index
    %c1_41 = arith.constant 1 : index
    %c0_42 = arith.constant 0 : index
    %39 = vector.load %arg16[%c0_40, %c1_41, %c0_42] : memref<10x10x64xf32, #tpu.memory_space<vmem>>, vector<8x8x64xf32>
    %40 = vector.shape_cast %39 : vector<8x8x64xf32> to vector<64x64xf32>
    %41 = arith.truncf %40 : vector<64x64xf32> to vector<64x64xbf16>
    %c1_43 = arith.constant 1 : index
    %c0_44 = arith.constant 0 : index
    %c0_45 = arith.constant 0 : index
    %42 = vector.load %arg9[%c1_43, %c0_44, %c0_45] : memref<9x64x512xbf16, #tpu.memory_space<vmem>>, vector<1x64x256xbf16>
    %43 = vector.shape_cast %42 : vector<1x64x256xbf16> to vector<64x256xbf16>
    %cst_46 = arith.constant dense<0.000000e+00> : vector<64x256xf32>
    %44 = tpu.matmul %41, %43, %cst_46 {dimension_numbers = #tpu.dot_dimension_numbers<[1], [0], [0], [1], [0, 0, 1, 1], [], []>} : vector<64x64xbf16>, vector<64x256xbf16>, vector<64x256xf32> -> vector<64x256xf32>
    %45 = arith.addf %38, %44 : vector<64x256xf32>
    %c0_47 = arith.constant 0 : index
    %c2 = arith.constant 2 : index
    %c0_48 = arith.constant 0 : index
    %46 = vector.load %arg16[%c0_47, %c2, %c0_48] : memref<10x10x64xf32, #tpu.memory_space<vmem>>, vector<8x8x64xf32>
    %47 = vector.shape_cast %46 : vector<8x8x64xf32> to vector<64x64xf32>
    %48 = arith.truncf %47 : vector<64x64xf32> to vector<64x64xbf16>
    %c2_49 = arith.constant 2 : index
    %c0_50 = arith.constant 0 : index
    %c0_51 = arith.constant 0 : index
    %49 = vector.load %arg9[%c2_49, %c0_50, %c0_51] : memref<9x64x512xbf16, #tpu.memory_space<vmem>>, vector<1x64x256xbf16>
    %50 = vector.shape_cast %49 : vector<1x64x256xbf16> to vector<64x256xbf16>
    %cst_52 = arith.constant dense<0.000000e+00> : vector<64x256xf32>
    %51 = tpu.matmul %48, %50, %cst_52 {dimension_numbers = #tpu.dot_dimension_numbers<[1], [0], [0], [1], [0, 0, 1, 1], [], []>} : vector<64x64xbf16>, vector<64x256xbf16>, vector<64x256xf32> -> vector<64x256xf32>
    %52 = arith.addf %45, %51 : vector<64x256xf32>
    %c1_53 = arith.constant 1 : index
    %c0_54 = arith.constant 0 : index
    %c0_55 = arith.constant 0 : index
    %53 = vector.load %arg16[%c1_53, %c0_54, %c0_55] : memref<10x10x64xf32, #tpu.memory_space<vmem>>, vector<8x8x64xf32>
    %54 = vector.shape_cast %53 : vector<8x8x64xf32> to vector<64x64xf32>
    %55 = arith.truncf %54 : vector<64x64xf32> to vector<64x64xbf16>
    %c3 = arith.constant 3 : index
    %c0_56 = arith.constant 0 : index
    %c0_57 = arith.constant 0 : index
    %56 = vector.load %arg9[%c3, %c0_56, %c0_57] : memref<9x64x512xbf16, #tpu.memory_space<vmem>>, vector<1x64x256xbf16>
    %57 = vector.shape_cast %56 : vector<1x64x256xbf16> to vector<64x256xbf16>
    %cst_58 = arith.constant dense<0.000000e+00> : vector<64x256xf32>
    %58 = tpu.matmul %55, %57, %cst_58 {dimension_numbers = #tpu.dot_dimension_numbers<[1], [0], [0], [1], [0, 0, 1, 1], [], []>} : vector<64x64xbf16>, vector<64x256xbf16>, vector<64x256xf32> -> vector<64x256xf32>
    %59 = arith.addf %52, %58 : vector<64x256xf32>
    %c1_59 = arith.constant 1 : index
    %c1_60 = arith.constant 1 : index
    %c0_61 = arith.constant 0 : index
    %60 = vector.load %arg16[%c1_59, %c1_60, %c0_61] : memref<10x10x64xf32, #tpu.memory_space<vmem>>, vector<8x8x64xf32>
    %61 = vector.shape_cast %60 : vector<8x8x64xf32> to vector<64x64xf32>
    %62 = arith.truncf %61 : vector<64x64xf32> to vector<64x64xbf16>
    %c4 = arith.constant 4 : index
    %c0_62 = arith.constant 0 : index
    %c0_63 = arith.constant 0 : index
    %63 = vector.load %arg9[%c4, %c0_62, %c0_63] : memref<9x64x512xbf16, #tpu.memory_space<vmem>>, vector<1x64x256xbf16>
    %64 = vector.shape_cast %63 : vector<1x64x256xbf16> to vector<64x256xbf16>
    %cst_64 = arith.constant dense<0.000000e+00> : vector<64x256xf32>
    %65 = tpu.matmul %62, %64, %cst_64 {dimension_numbers = #tpu.dot_dimension_numbers<[1], [0], [0], [1], [0, 0, 1, 1], [], []>} : vector<64x64xbf16>, vector<64x256xbf16>, vector<64x256xf32> -> vector<64x256xf32>
    %66 = arith.addf %59, %65 : vector<64x256xf32>
    %c1_65 = arith.constant 1 : index
    %c2_66 = arith.constant 2 : index
    %c0_67 = arith.constant 0 : index
    %67 = vector.load %arg16[%c1_65, %c2_66, %c0_67] : memref<10x10x64xf32, #tpu.memory_space<vmem>>, vector<8x8x64xf32>
    %68 = vector.shape_cast %67 : vector<8x8x64xf32> to vector<64x64xf32>
    %69 = arith.truncf %68 : vector<64x64xf32> to vector<64x64xbf16>
    %c5 = arith.constant 5 : index
    %c0_68 = arith.constant 0 : index
    %c0_69 = arith.constant 0 : index
    %70 = vector.load %arg9[%c5, %c0_68, %c0_69] : memref<9x64x512xbf16, #tpu.memory_space<vmem>>, vector<1x64x256xbf16>
    %71 = vector.shape_cast %70 : vector<1x64x256xbf16> to vector<64x256xbf16>
    %cst_70 = arith.constant dense<0.000000e+00> : vector<64x256xf32>
    %72 = tpu.matmul %69, %71, %cst_70 {dimension_numbers = #tpu.dot_dimension_numbers<[1], [0], [0], [1], [0, 0, 1, 1], [], []>} : vector<64x64xbf16>, vector<64x256xbf16>, vector<64x256xf32> -> vector<64x256xf32>
    %73 = arith.addf %66, %72 : vector<64x256xf32>
    %c2_71 = arith.constant 2 : index
    %c0_72 = arith.constant 0 : index
    %c0_73 = arith.constant 0 : index
    %74 = vector.load %arg16[%c2_71, %c0_72, %c0_73] : memref<10x10x64xf32, #tpu.memory_space<vmem>>, vector<8x8x64xf32>
    %75 = vector.shape_cast %74 : vector<8x8x64xf32> to vector<64x64xf32>
    %76 = arith.truncf %75 : vector<64x64xf32> to vector<64x64xbf16>
    %c6 = arith.constant 6 : index
    %c0_74 = arith.constant 0 : index
    %c0_75 = arith.constant 0 : index
    %77 = vector.load %arg9[%c6, %c0_74, %c0_75] : memref<9x64x512xbf16, #tpu.memory_space<vmem>>, vector<1x64x256xbf16>
    %78 = vector.shape_cast %77 : vector<1x64x256xbf16> to vector<64x256xbf16>
    %cst_76 = arith.constant dense<0.000000e+00> : vector<64x256xf32>
    %79 = tpu.matmul %76, %78, %cst_76 {dimension_numbers = #tpu.dot_dimension_numbers<[1], [0], [0], [1], [0, 0, 1, 1], [], []>} : vector<64x64xbf16>, vector<64x256xbf16>, vector<64x256xf32> -> vector<64x256xf32>
    %80 = arith.addf %73, %79 : vector<64x256xf32>
    %c2_77 = arith.constant 2 : index
    %c1_78 = arith.constant 1 : index
    %c0_79 = arith.constant 0 : index
    %81 = vector.load %arg16[%c2_77, %c1_78, %c0_79] : memref<10x10x64xf32, #tpu.memory_space<vmem>>, vector<8x8x64xf32>
    %82 = vector.shape_cast %81 : vector<8x8x64xf32> to vector<64x64xf32>
    %83 = arith.truncf %82 : vector<64x64xf32> to vector<64x64xbf16>
    %c7 = arith.constant 7 : index
    %c0_80 = arith.constant 0 : index
    %c0_81 = arith.constant 0 : index
    %84 = vector.load %arg9[%c7, %c0_80, %c0_81] : memref<9x64x512xbf16, #tpu.memory_space<vmem>>, vector<1x64x256xbf16>
    %85 = vector.shape_cast %84 : vector<1x64x256xbf16> to vector<64x256xbf16>
    %cst_82 = arith.constant dense<0.000000e+00> : vector<64x256xf32>
    %86 = tpu.matmul %83, %85, %cst_82 {dimension_numbers = #tpu.dot_dimension_numbers<[1], [0], [0], [1], [0, 0, 1, 1], [], []>} : vector<64x64xbf16>, vector<64x256xbf16>, vector<64x256xf32> -> vector<64x256xf32>
    %87 = arith.addf %80, %86 : vector<64x256xf32>
    %c2_83 = arith.constant 2 : index
    %c2_84 = arith.constant 2 : index
    %c0_85 = arith.constant 0 : index
    %88 = vector.load %arg16[%c2_83, %c2_84, %c0_85] : memref<10x10x64xf32, #tpu.memory_space<vmem>>, vector<8x8x64xf32>
    %89 = vector.shape_cast %88 : vector<8x8x64xf32> to vector<64x64xf32>
    %90 = arith.truncf %89 : vector<64x64xf32> to vector<64x64xbf16>
    %c8 = arith.constant 8 : index
    %c0_86 = arith.constant 0 : index
    %c0_87 = arith.constant 0 : index
    %91 = vector.load %arg9[%c8, %c0_86, %c0_87] : memref<9x64x512xbf16, #tpu.memory_space<vmem>>, vector<1x64x256xbf16>
    %92 = vector.shape_cast %91 : vector<1x64x256xbf16> to vector<64x256xbf16>
    %cst_88 = arith.constant dense<0.000000e+00> : vector<64x256xf32>
    %93 = tpu.matmul %90, %92, %cst_88 {dimension_numbers = #tpu.dot_dimension_numbers<[1], [0], [0], [1], [0, 0, 1, 1], [], []>} : vector<64x64xbf16>, vector<64x256xbf16>, vector<64x256xf32> -> vector<64x256xf32>
    %94 = arith.addf %87, %93 : vector<64x256xf32>
    %c0_89 = arith.constant 0 : index
    %c0_90 = arith.constant 0 : index
    %95 = vector.load %arg10[%c0_89, %c0_90] : memref<1x512xf32, #tpu.memory_space<vmem>>, vector<1x256xf32>
    %96 = vector.broadcast %95 : vector<1x256xf32> to vector<64x256xf32>
    %97 = arith.addf %94, %96 : vector<64x256xf32>
    %cst_91 = arith.constant 0.000000e+00 : f32
    %98 = vector.broadcast %cst_91 : f32 to vector<64x256xf32>
    %99 = arith.maximumf %97, %98 : vector<64x256xf32>
    %100 = arith.truncf %99 : vector<64x256xf32> to vector<64x256xbf16>
    %c0_92 = arith.constant 0 : index
    %c0_93 = arith.constant 0 : index
    %101 = vector.load %arg11[%c0_92, %c0_93] : memref<512x128xbf16, #tpu.memory_space<vmem>>, vector<256x128xbf16>
    %cst_94 = arith.constant dense<0.000000e+00> : vector<64x128xf32>
    %102 = tpu.matmul %100, %101, %cst_94 {dimension_numbers = #tpu.dot_dimension_numbers<[1], [0], [0], [1], [0, 0, 1, 1], [], []>} : vector<64x256xbf16>, vector<256x128xbf16>, vector<64x128xf32> -> vector<64x128xf32>
    %103 = arith.addf %30, %102 : vector<64x128xf32>
    %cst_95 = arith.constant 0.000000e+00 : f32
    %104 = vector.broadcast %cst_95 : f32 to vector<64x256xf32>
    %c0_96 = arith.constant 0 : index
    %c0_97 = arith.constant 0 : index
    %c0_98 = arith.constant 0 : index
    %105 = vector.load %arg16[%c0_96, %c0_97, %c0_98] : memref<10x10x64xf32, #tpu.memory_space<vmem>>, vector<8x8x64xf32>
    %106 = vector.shape_cast %105 : vector<8x8x64xf32> to vector<64x64xf32>
    %107 = arith.truncf %106 : vector<64x64xf32> to vector<64x64xbf16>
    %c0_99 = arith.constant 0 : index
    %c0_100 = arith.constant 0 : index
    %c256 = arith.constant 256 : index
    %108 = vector.load %arg9[%c0_99, %c0_100, %c256] : memref<9x64x512xbf16, #tpu.memory_space<vmem>>, vector<1x64x256xbf16>
    %109 = vector.shape_cast %108 : vector<1x64x256xbf16> to vector<64x256xbf16>
    %cst_101 = arith.constant dense<0.000000e+00> : vector<64x256xf32>
    %110 = tpu.matmul %107, %109, %cst_101 {dimension_numbers = #tpu.dot_dimension_numbers<[1], [0], [0], [1], [0, 0, 1, 1], [], []>} : vector<64x64xbf16>, vector<64x256xbf16>, vector<64x256xf32> -> vector<64x256xf32>
    %111 = arith.addf %104, %110 : vector<64x256xf32>
    %c0_102 = arith.constant 0 : index
    %c1_103 = arith.constant 1 : index
    %c0_104 = arith.constant 0 : index
    %112 = vector.load %arg16[%c0_102, %c1_103, %c0_104] : memref<10x10x64xf32, #tpu.memory_space<vmem>>, vector<8x8x64xf32>
    %113 = vector.shape_cast %112 : vector<8x8x64xf32> to vector<64x64xf32>
    %114 = arith.truncf %113 : vector<64x64xf32> to vector<64x64xbf16>
    %c1_105 = arith.constant 1 : index
    %c0_106 = arith.constant 0 : index
    %c256_107 = arith.constant 256 : index
    %115 = vector.load %arg9[%c1_105, %c0_106, %c256_107] : memref<9x64x512xbf16, #tpu.memory_space<vmem>>, vector<1x64x256xbf16>
    %116 = vector.shape_cast %115 : vector<1x64x256xbf16> to vector<64x256xbf16>
    %cst_108 = arith.constant dense<0.000000e+00> : vector<64x256xf32>
    %117 = tpu.matmul %114, %116, %cst_108 {dimension_numbers = #tpu.dot_dimension_numbers<[1], [0], [0], [1], [0, 0, 1, 1], [], []>} : vector<64x64xbf16>, vector<64x256xbf16>, vector<64x256xf32> -> vector<64x256xf32>
    %118 = arith.addf %111, %117 : vector<64x256xf32>
    %c0_109 = arith.constant 0 : index
    %c2_110 = arith.constant 2 : index
    %c0_111 = arith.constant 0 : index
    %119 = vector.load %arg16[%c0_109, %c2_110, %c0_111] : memref<10x10x64xf32, #tpu.memory_space<vmem>>, vector<8x8x64xf32>
    %120 = vector.shape_cast %119 : vector<8x8x64xf32> to vector<64x64xf32>
    %121 = arith.truncf %120 : vector<64x64xf32> to vector<64x64xbf16>
    %c2_112 = arith.constant 2 : index
    %c0_113 = arith.constant 0 : index
    %c256_114 = arith.constant 256 : index
    %122 = vector.load %arg9[%c2_112, %c0_113, %c256_114] : memref<9x64x512xbf16, #tpu.memory_space<vmem>>, vector<1x64x256xbf16>
    %123 = vector.shape_cast %122 : vector<1x64x256xbf16> to vector<64x256xbf16>
    %cst_115 = arith.constant dense<0.000000e+00> : vector<64x256xf32>
    %124 = tpu.matmul %121, %123, %cst_115 {dimension_numbers = #tpu.dot_dimension_numbers<[1], [0], [0], [1], [0, 0, 1, 1], [], []>} : vector<64x64xbf16>, vector<64x256xbf16>, vector<64x256xf32> -> vector<64x256xf32>
    %125 = arith.addf %118, %124 : vector<64x256xf32>
    %c1_116 = arith.constant 1 : index
    %c0_117 = arith.constant 0 : index
    %c0_118 = arith.constant 0 : index
    %126 = vector.load %arg16[%c1_116, %c0_117, %c0_118] : memref<10x10x64xf32, #tpu.memory_space<vmem>>, vector<8x8x64xf32>
    %127 = vector.shape_cast %126 : vector<8x8x64xf32> to vector<64x64xf32>
    %128 = arith.truncf %127 : vector<64x64xf32> to vector<64x64xbf16>
    %c3_119 = arith.constant 3 : index
    %c0_120 = arith.constant 0 : index
    %c256_121 = arith.constant 256 : index
    %129 = vector.load %arg9[%c3_119, %c0_120, %c256_121] : memref<9x64x512xbf16, #tpu.memory_space<vmem>>, vector<1x64x256xbf16>
    %130 = vector.shape_cast %129 : vector<1x64x256xbf16> to vector<64x256xbf16>
    %cst_122 = arith.constant dense<0.000000e+00> : vector<64x256xf32>
    %131 = tpu.matmul %128, %130, %cst_122 {dimension_numbers = #tpu.dot_dimension_numbers<[1], [0], [0], [1], [0, 0, 1, 1], [], []>} : vector<64x64xbf16>, vector<64x256xbf16>, vector<64x256xf32> -> vector<64x256xf32>
    %132 = arith.addf %125, %131 : vector<64x256xf32>
    %c1_123 = arith.constant 1 : index
    %c1_124 = arith.constant 1 : index
    %c0_125 = arith.constant 0 : index
    %133 = vector.load %arg16[%c1_123, %c1_124, %c0_125] : memref<10x10x64xf32, #tpu.memory_space<vmem>>, vector<8x8x64xf32>
    %134 = vector.shape_cast %133 : vector<8x8x64xf32> to vector<64x64xf32>
    %135 = arith.truncf %134 : vector<64x64xf32> to vector<64x64xbf16>
    %c4_126 = arith.constant 4 : index
    %c0_127 = arith.constant 0 : index
    %c256_128 = arith.constant 256 : index
    %136 = vector.load %arg9[%c4_126, %c0_127, %c256_128] : memref<9x64x512xbf16, #tpu.memory_space<vmem>>, vector<1x64x256xbf16>
    %137 = vector.shape_cast %136 : vector<1x64x256xbf16> to vector<64x256xbf16>
    %cst_129 = arith.constant dense<0.000000e+00> : vector<64x256xf32>
    %138 = tpu.matmul %135, %137, %cst_129 {dimension_numbers = #tpu.dot_dimension_numbers<[1], [0], [0], [1], [0, 0, 1, 1], [], []>} : vector<64x64xbf16>, vector<64x256xbf16>, vector<64x256xf32> -> vector<64x256xf32>
    %139 = arith.addf %132, %138 : vector<64x256xf32>
    %c1_130 = arith.constant 1 : index
    %c2_131 = arith.constant 2 : index
    %c0_132 = arith.constant 0 : index
    %140 = vector.load %arg16[%c1_130, %c2_131, %c0_132] : memref<10x10x64xf32, #tpu.memory_space<vmem>>, vector<8x8x64xf32>
    %141 = vector.shape_cast %140 : vector<8x8x64xf32> to vector<64x64xf32>
    %142 = arith.truncf %141 : vector<64x64xf32> to vector<64x64xbf16>
    %c5_133 = arith.constant 5 : index
    %c0_134 = arith.constant 0 : index
    %c256_135 = arith.constant 256 : index
    %143 = vector.load %arg9[%c5_133, %c0_134, %c256_135] : memref<9x64x512xbf16, #tpu.memory_space<vmem>>, vector<1x64x256xbf16>
    %144 = vector.shape_cast %143 : vector<1x64x256xbf16> to vector<64x256xbf16>
    %cst_136 = arith.constant dense<0.000000e+00> : vector<64x256xf32>
    %145 = tpu.matmul %142, %144, %cst_136 {dimension_numbers = #tpu.dot_dimension_numbers<[1], [0], [0], [1], [0, 0, 1, 1], [], []>} : vector<64x64xbf16>, vector<64x256xbf16>, vector<64x256xf32> -> vector<64x256xf32>
    %146 = arith.addf %139, %145 : vector<64x256xf32>
    %c2_137 = arith.constant 2 : index
    %c0_138 = arith.constant 0 : index
    %c0_139 = arith.constant 0 : index
    %147 = vector.load %arg16[%c2_137, %c0_138, %c0_139] : memref<10x10x64xf32, #tpu.memory_space<vmem>>, vector<8x8x64xf32>
    %148 = vector.shape_cast %147 : vector<8x8x64xf32> to vector<64x64xf32>
    %149 = arith.truncf %148 : vector<64x64xf32> to vector<64x64xbf16>
    %c6_140 = arith.constant 6 : index
    %c0_141 = arith.constant 0 : index
    %c256_142 = arith.constant 256 : index
    %150 = vector.load %arg9[%c6_140, %c0_141, %c256_142] : memref<9x64x512xbf16, #tpu.memory_space<vmem>>, vector<1x64x256xbf16>
    %151 = vector.shape_cast %150 : vector<1x64x256xbf16> to vector<64x256xbf16>
    %cst_143 = arith.constant dense<0.000000e+00> : vector<64x256xf32>
    %152 = tpu.matmul %149, %151, %cst_143 {dimension_numbers = #tpu.dot_dimension_numbers<[1], [0], [0], [1], [0, 0, 1, 1], [], []>} : vector<64x64xbf16>, vector<64x256xbf16>, vector<64x256xf32> -> vector<64x256xf32>
    %153 = arith.addf %146, %152 : vector<64x256xf32>
    %c2_144 = arith.constant 2 : index
    %c1_145 = arith.constant 1 : index
    %c0_146 = arith.constant 0 : index
    %154 = vector.load %arg16[%c2_144, %c1_145, %c0_146] : memref<10x10x64xf32, #tpu.memory_space<vmem>>, vector<8x8x64xf32>
    %155 = vector.shape_cast %154 : vector<8x8x64xf32> to vector<64x64xf32>
    %156 = arith.truncf %155 : vector<64x64xf32> to vector<64x64xbf16>
    %c7_147 = arith.constant 7 : index
    %c0_148 = arith.constant 0 : index
    %c256_149 = arith.constant 256 : index
    %157 = vector.load %arg9[%c7_147, %c0_148, %c256_149] : memref<9x64x512xbf16, #tpu.memory_space<vmem>>, vector<1x64x256xbf16>
    %158 = vector.shape_cast %157 : vector<1x64x256xbf16> to vector<64x256xbf16>
    %cst_150 = arith.constant dense<0.000000e+00> : vector<64x256xf32>
    %159 = tpu.matmul %156, %158, %cst_150 {dimension_numbers = #tpu.dot_dimension_numbers<[1], [0], [0], [1], [0, 0, 1, 1], [], []>} : vector<64x64xbf16>, vector<64x256xbf16>, vector<64x256xf32> -> vector<64x256xf32>
    %160 = arith.addf %153, %159 : vector<64x256xf32>
    %c2_151 = arith.constant 2 : index
    %c2_152 = arith.constant 2 : index
    %c0_153 = arith.constant 0 : index
    %161 = vector.load %arg16[%c2_151, %c2_152, %c0_153] : memref<10x10x64xf32, #tpu.memory_space<vmem>>, vector<8x8x64xf32>
    %162 = vector.shape_cast %161 : vector<8x8x64xf32> to vector<64x64xf32>
    %163 = arith.truncf %162 : vector<64x64xf32> to vector<64x64xbf16>
    %c8_154 = arith.constant 8 : index
    %c0_155 = arith.constant 0 : index
    %c256_156 = arith.constant 256 : index
    %164 = vector.load %arg9[%c8_154, %c0_155, %c256_156] : memref<9x64x512xbf16, #tpu.memory_space<vmem>>, vector<1x64x256xbf16>
    %165 = vector.shape_cast %164 : vector<1x64x256xbf16> to vector<64x256xbf16>
    %cst_157 = arith.constant dense<0.000000e+00> : vector<64x256xf32>
    %166 = tpu.matmul %163, %165, %cst_157 {dimension_numbers = #tpu.dot_dimension_numbers<[1], [0], [0], [1], [0, 0, 1, 1], [], []>} : vector<64x64xbf16>, vector<64x256xbf16>, vector<64x256xf32> -> vector<64x256xf32>
    %167 = arith.addf %160, %166 : vector<64x256xf32>
    %c0_158 = arith.constant 0 : index
    %c256_159 = arith.constant 256 : index
    %168 = vector.load %arg10[%c0_158, %c256_159] : memref<1x512xf32, #tpu.memory_space<vmem>>, vector<1x256xf32>
    %169 = vector.broadcast %168 : vector<1x256xf32> to vector<64x256xf32>
    %170 = arith.addf %167, %169 : vector<64x256xf32>
    %cst_160 = arith.constant 0.000000e+00 : f32
    %171 = vector.broadcast %cst_160 : f32 to vector<64x256xf32>
    %172 = arith.maximumf %170, %171 : vector<64x256xf32>
    %173 = arith.truncf %172 : vector<64x256xf32> to vector<64x256xbf16>
    %c256_161 = arith.constant 256 : index
    %c0_162 = arith.constant 0 : index
    %174 = vector.load %arg11[%c256_161, %c0_162] : memref<512x128xbf16, #tpu.memory_space<vmem>>, vector<256x128xbf16>
    %cst_163 = arith.constant dense<0.000000e+00> : vector<64x128xf32>
    %175 = tpu.matmul %173, %174, %cst_163 {dimension_numbers = #tpu.dot_dimension_numbers<[1], [0], [0], [1], [0, 0, 1, 1], [], []>} : vector<64x256xbf16>, vector<256x128xbf16>, vector<64x128xf32> -> vector<64x128xf32>
    %176 = arith.addf %103, %175 : vector<64x128xf32>
    %c0_164 = arith.constant 0 : index
    %c0_165 = arith.constant 0 : index
    %177 = vector.load %arg12[%c0_164, %c0_165] : memref<1x128xf32, #tpu.memory_space<vmem>>, vector<1x128xf32>
    %178 = vector.broadcast %177 : vector<1x128xf32> to vector<64x128xf32>
    %179 = arith.addf %176, %178 : vector<64x128xf32>
    %c0_166 = arith.constant 0 : index
    %c0_167 = arith.constant 0 : index
    %180 = vector.load %arg13[%c0_166, %c0_167] : memref<256x64xf32, #tpu.memory_space<vmem>>, vector<256x64xf32>
    %cst_168 = arith.constant dense<0.000000e+00> : vector<256x128xf32>
    %181 = tpu.matmul %180, %179, %cst_168 {dimension_numbers = #tpu.dot_dimension_numbers<[1], [0], [0], [1], [0, 0, 1, 1], [], []>} : vector<256x64xf32>, vector<64x128xf32>, vector<256x128xf32> -> vector<256x128xf32>
    %c0_169 = arith.constant 0 : index
    %c0_170 = arith.constant 0 : index
    %c0_171 = arith.constant 0 : index
    %182 = vector.load %arg15[%c0_169, %c0_170, %c0_171] : memref<1x256x128xf32, #tpu.memory_space<vmem>>, vector<1x256x128xf32>
    %183 = vector.shape_cast %182 : vector<1x256x128xf32> to vector<256x128xf32>
    %184 = vector.shape_cast %181 : vector<256x128xf32> to vector<1x256x128xf32>
    tpu.vector_store %arg15[%c0_169, %c0_170, %c0_171], %184 {strides = array<i32>} : memref<1x256x128xf32, #tpu.memory_space<vmem>>, vector<1x256x128xf32>,
    return
  }
  func.func @transform_0(%arg0: i32) -> (i32, i32, i32) {
    %c0_i32 = arith.constant 0 : i32
    %c0_i32_0 = arith.constant 0 : i32
    %c0_i32_1 = arith.constant 0 : i32
    return %arg0, %c0_i32, %c0_i32_0 : i32, i32, i32
  }
  func.func @transform_1(%arg0: i32) -> (i32, i32) {
    %c0_i32 = arith.constant 0 : i32
    %c0_i32_0 = arith.constant 0 : i32
    %c0_i32_1 = arith.constant 0 : i32
    return %c0_i32, %c0_i32_0 : i32, i32
  }
  func.func @transform_2(%arg0: i32) -> (i32, i32) {
    %c0_i32 = arith.constant 0 : i32
    %c0_i32_0 = arith.constant 0 : i32
    %c0_i32_1 = arith.constant 0 : i32
    return %c0_i32, %c0_i32_0 : i32, i32
  }
  func.func @transform_3(%arg0: i32) -> (i32, i32) {
    %c0_i32 = arith.constant 0 : i32
    %c0_i32_0 = arith.constant 0 : i32
    %c0_i32_1 = arith.constant 0 : i32
    return %c0_i32, %c0_i32_0 : i32, i32
  }
  func.func @transform_4(%arg0: i32) -> (i32, i32) {
    %c0_i32 = arith.constant 0 : i32
    %c0_i32_0 = arith.constant 0 : i32
    %c0_i32_1 = arith.constant 0 : i32
    return %c0_i32, %c0_i32_0 : i32, i32
  }
  func.func @transform_5(%arg0: i32) -> (i32, i32) {
    %c0_i32 = arith.constant 0 : i32
    %c0_i32_0 = arith.constant 0 : i32
    %c0_i32_1 = arith.constant 0 : i32
    return %c0_i32, %c0_i32_0 : i32, i32
  }
  func.func @transform_6(%arg0: i32) -> (i32, i32) {
    %c0_i32 = arith.constant 0 : i32
    %c0_i32_0 = arith.constant 0 : i32
    %c0_i32_1 = arith.constant 0 : i32
    return %c0_i32, %c0_i32_0 : i32, i32
  }
  func.func @transform_7(%arg0: i32) -> (i32, i32) {
    %c0_i32 = arith.constant 0 : i32
    %c0_i32_0 = arith.constant 0 : i32
    %c0_i32_1 = arith.constant 0 : i32
    return %c0_i32, %c0_i32_0 : i32, i32
  }
  func.func @transform_8(%arg0: i32) -> (i32, i32, i32) {
    %c0_i32 = arith.constant 0 : i32
    %c0_i32_0 = arith.constant 0 : i32
    %c0_i32_1 = arith.constant 0 : i32
    %c0_i32_2 = arith.constant 0 : i32
    return %c0_i32, %c0_i32_0, %c0_i32_1 : i32, i32, i32
  }
  func.func @transform_9(%arg0: i32) -> (i32, i32) {
    %c0_i32 = arith.constant 0 : i32
    %c0_i32_0 = arith.constant 0 : i32
    %c0_i32_1 = arith.constant 0 : i32
    return %c0_i32, %c0_i32_0 : i32, i32
  }
  func.func @transform_10(%arg0: i32) -> (i32, i32) {
    %c0_i32 = arith.constant 0 : i32
    %c0_i32_0 = arith.constant 0 : i32
    %c0_i32_1 = arith.constant 0 : i32
    return %c0_i32, %c0_i32_0 : i32, i32
  }
  func.func @transform_11(%arg0: i32) -> (i32, i32) {
    %c0_i32 = arith.constant 0 : i32
    %c0_i32_0 = arith.constant 0 : i32
    %c0_i32_1 = arith.constant 0 : i32
    return %c0_i32, %c0_i32_0 : i32, i32
  }
  func.func @transform_12(%arg0: i32) -> (i32, i32) {
    %c0_i32 = arith.constant 0 : i32
    %c0_i32_0 = arith.constant 0 : i32
    %c0_i32_1 = arith.constant 0 : i32
    return %c0_i32, %c0_i32_0 : i32, i32
  }
  func.func @transform_13(%arg0: i32) -> (i32, i32, i32) {
    %c0_i32 = arith.constant 0 : i32
    %c0_i32_0 = arith.constant 0 : i32
    %c0_i32_1 = arith.constant 0 : i32
    return %arg0, %c0_i32, %c0_i32_0 : i32, i32, i32
  }
  func.func @transform_14(%arg0: i32) -> (i32, i32, i32) {
    %c0_i32 = arith.constant 0 : i32
    %c0_i32_0 = arith.constant 0 : i32
    %c0_i32_1 = arith.constant 0 : i32
    return %arg0, %c0_i32, %c0_i32_0 : i32, i32, i32
  }
}

</mosaic_0001>

<bundles_post_ra>
// kernel: pspnet_forward.1
= control target key start
LH: loop header
LB: loop body
LE: loop exit
PB: predicated region body
PF: predicated region fallthrough
CT: control target
= control target key end

     0   :  { %s7772_s0 = inlined_call_operand.vmem [shape: bf16[2,256,4], index: 0, kind: input, shape index: {}]   ;;  %s7773_s1 = inlined_call_operand.vmem [shape: f32[64,256], index: 1, kind: input, shape index: {}]   ;;  %s7774_s2 = inlined_call_operand.vmem [shape: bf16[4,32], index: 2, kind: input, shape index: {}]   ;;  %s7775_s3 = inlined_call_operand.vmem [shape: f32[64,64], index: 3, kind: input, shape index: {}]   ;;  %s7776_s4 = inlined_call_operand.vmem [shape: bf16[32,32], index: 4, kind: input, shape index: {}]   ;;  %s7777_s5 = inlined_call_operand.vmem [shape: f32[1,32], index: 5, kind: input, shape index: {}]   ;;  %s7778_s6 = inlined_call_operand.vmem [shape: f32[64,32], index: 6, kind: input, shape index: {}]   ;;  %s7779_s7 = inlined_call_operand.vmem [shape: f32[64,64], index: 7, kind: input, shape index: {}]   ;;  %s7780_s8 = inlined_call_operand.hbm [shape: bf16[9,64,512], index: 8, kind: input, shape index: {}]   ;;  %s7781_s9 = inlined_call_operand.vmem [shape: f32[1,512], index: 9, kind: input, shape index: {}]   ;;  %s7782_s10 = inlined_call_operand.vmem [shape: bf16[512,128], index: 10, kind: input, shape index: {}]   ;;  %s7783_s11 = inlined_call_operand.vmem [shape: f32[1,128], index: 11, kind: input, shape index: {}]   ;;  %s7784_s12 = inlined_call_operand.vmem [shape: f32[256,64], index: 12, kind: input, shape index: {}]   ;;  %s7785_s13 = inlined_call_operand.hbm [shape: f32[2,64,32], index: 13, kind: output, shape index: {0}]   ;;  %s7786_s14 = inlined_call_operand.hbm [shape: f32[2,256,128], index: 14, kind: output, shape index: {1}]  }
   0x1   :  { %7794 = sst [smem:[#allocation16_spill]] %s7772_s0 }
   0x2   :  { %20 = vsyncpa [#allocation4], 0 }
   0x3   :  { %21 = vsyncpa [#allocation5], 0 }
   0x4   :  { %23 = vsyncpa [#allocation5 + $0x1], 0 }
   0x5   :  { %24 = vsyncpa [#allocation8], 0 }
   0x6   :  { %26 = vsyncpa [#allocation8 + $0x1], 0  ;;  %s6724_s29 = smov 0   ;;  %s6726_s30 = smov 0  }
   0x7   :  { %s6728_s15 = smov 0   ;;  %s6730_s16 = smov 0  }
   0x8 LB: > { %7795 = sst [smem:[#allocation12_spill]] %s6633_s15  ;;  %s6745_s17 = sadd.s32 4294967295, %s6637_s16   ;;  %s6637_s16 = sphi %s6730_s16, %s7811_s16   ;;  %s6633_s15 = sphi %s6728_s15, %s7813_s15   ;;  %s6629_s30 = sphi %s6726_s30, %s7815_s30   ;;  %s6625_s29 = sphi %s6724_s29, %s7814_s29  }
   0x9   : > { %s5089_s18 = sadd.s32 4294967294, %s6637_s16   ;;  %s6749_s19 = sadd.s32 1, %s6637_s16  }
   0xa   : > { %7796 = sst [smem:[#allocation13_spill]] %s6749_s19  ;;  %s317_s20 = sadd.s32 1, %s6633_s15 }
   0xb   : > { %s314_s21 = ssub.s32 %s6637_s16, %s6749_s19  ;;  %p327_p0 = scmp.ne.s32.totalorder %s6633_s15, %s6629_s30 }
   0xc   : > { %p315_p1 = scmp.eq.s32.totalorder %s314_s21, 0  ;;  %p328_p2 = scmp.eq.s32.totalorder %s6745_s17, 1 }
   0xd   : > { %p333_p3 = scmp.ne.s32.totalorder %s6629_s30, %s6625_s29  ;;  %p334_p4 = scmp.eq.s32.totalorder %s5089_s18, 1 }
   0xe   : > { %s6760_s22 = scalar_select %p315_p1, %s6633_s15, %s317_s20  }
   0xf   : > { %p6762_p5 = por %p328_p2, %p327_p0  ;;  %p6766_p6 = por %p334_p4, %p333_p3 }
  0x10   : > { %7797 = sst [smem:[#allocation14_spill]] %s6760_s22  ;;  %p5090_p7 = scmp.ge.s32.totalorder %s6637_s16, 1 }
  0x11   : > { %s7798_s23 = scalar_select %p6762_p5, 1, 0 }
  0x12   : > { %s7799_s24 = scalar_select %p6766_p6, 1, 0 }
  0x13   : > { %p367_p8 = scmp.lt.s32.totalorder %s6637_s16, 3  ;;  %p7791_p9 = scmp.eq.s32.totalorder %s6745_s17, 0 }
  0x14   : > { %7800 = sst [smem:[#allocation15_spill]] %s7799_s24  ;;  %s6639_s26 = smov [#allocation3]  }
  0x15   : > { %p6773_p10 = pnand %p5090_p7, %p367_p8  ;;  %s400_s27 = sshll.u32 %s6639_s26, 4  ;;  %s401_s27 = int_to_ptr.vmem [resolvable:$true] %s400_s27 }
  0x16   : > { %s6511_s21 = scalar_lea.hbm %s7780_s8, 18432 }
  0x17   : > { %s7801_s25 = scalar_select %p6773_p10, 1, 0 }
  0x18   : > { %p6191_p11 = pneg %p6773_p10  ;;  %p6512_p13 = scmp.ne.s32.totalorder %s7780_s8, %s6511_s21 }
  0x19   : > { %p6518_p3 = scmp.lt.u32.totalorder %s6511_s21, %s7780_s8 }
  0x1a   : > { %p6781_p12 = pnand %p7791_p9, %p6191_p11 }
  0x1c   : > { %p6513_p0 = pneg %p6781_p12 }
  0x1e   : > { %p6514_p1 = pnand %p6513_p0, %p6512_p13 }
  0x20   : > { %p6515_p2 = pneg %p6514_p1 }
  0x22   : > { %p6520_p4 = pnand %p6518_p3, %p6515_p2 }
  0x24   : > { %6523 = shalt.err (!%p6520_p4)
}
  0x25   : > { %s6524_s24 = scalar_lea.vmem %s401_s27, 18432  ;;  %p6532_p9 = scmp.lt.s32.totalorder %s401_s27, %s401_s27 }
  0x26   : > { %p6525_p7 = scmp.ne.s32.totalorder %s401_s27, %s6524_s24  ;;  %p6533_p6 = scmp.lt.s32.totalorder %s6524_s24, %s6524_s24 }
  0x28   : > { %p6527_p8 = pnand %p6525_p7, %p6513_p0  ;;  %p6534_p5 = por %p6533_p6, %p6532_p9 }
  0x2a   : > { %p6528_p11 = pneg %p6527_p8 }
  0x2c   : > { %p6535_p10 = pnand %p6534_p5, %p6528_p11 }
  0x2e   : > { %6538 = shalt.err (!%p6535_p10)
}
  0x2f   : > { %s6640_s15 = smov 256   ;;  %s6641_s22 = smov 16  }
  0x30   : > { %6194 = dma.hbm_to_vmem [thread:$0]  (!%p6781_p12), %s7780_s8, 18432, %s401_s27, [#allocation4], %s6640_s15, %s6640_s15, %s6641_s22  }
  0x31   : > { %p7803_p13 = scmp.ne.s32.totalorder %s7801_s25, 0 }
  0x32   : > { %p7804_p1 = scmp.eq.s32.totalorder (!%p7803_p13), %s6745_s17, 0 }
  0x33   : > { %436 = sbr.rel (%p7803_p13) target bundleno = 2390 (0x956), region = 72 }
  0x3a   : > { %6612 = dma.done.wait (%p7804_p1), [#allocation4], 18432   ;;  %p7805_p0 = pmov %p7804_p1 }
  0x3b   : > { %p487_p5 = scmp.lt.s32.totalorder %s6745_s17, 1  ;;  %vm655_vm0 = vcmask 1041408   ;;  %s7806_s0 = sld [smem:[#allocation16_spill]]  ;;  %vm606_vm1 = vcmask 31744   ;;  %v525_v0 = vld [vmem:[%s7774_s2] sm:$0x3] }
  0x3c   : > { %6614 = vsyncadd (%p7805_p0), [#allocation4], 4294948864  ;;  %6182 = vmatprep.subr.msk.bf16.mxu1 %vm655_vm0, %v525_v0  ;;  %v657_v1 = vsel %vm655_vm0, %v525_v0, 0  ;;  %6181 = vmatprep.subr.msk.bf16.mxu0 %vm655_vm0, %v525_v0  ;;  %v821_v18 = vld [vmem:[%s7773_s1 + $0x8] sm:$0xff]  ;;  %vm966_vm2 = vcmask 523264   ;;  %s6908_s20 = sand.u32 1, %s6629_s30  }
  0x3d   : > { %s488_s19 = scalar_select %p487_p5, %s6745_s17, 1  ;;  %5924 = vmatpush3.bf16.msra.mxu1 %v657_v1  ;;  %5678 = vmatpush3.bf16.msra.mxu0 %v657_v1  ;;  %vm949_vm3 = vcmask 261120   ;;  %vm1402_vm4 = vcmask 517120  }
  0x3e   : > { %s6644_s15 = smov 32   ;;  %s4949_s22 = scalar_lea.sflag [#allocation5], %s6908_s20 }
  0x3f   : > { %s5443_s24 = sshll.u32 %s488_s19, 7  ;;  %s5095_s19 = sshll.u32 %s6908_s20, 6 }
  0x40   : > { %p7807_p9 = scmp.ne.s32.totalorder %s7798_s23, 0 }
  0x41   : > { %s6812_s26 = scalar_lea.vmem %s7806_s0, %s5443_s24  ;;  %s6913_s24 = scalar_lea.vmem [#allocation6], %s5095_s19 }
  0x42   : > { %v6245_v2 = vld [vmem:[%s6812_s26 + $0x30] sm:$0xff]   ;;  %v6246_v3 = vld [vmem:[%s6812_s26 + $0x38] sm:$0xff]   ;;  %v6247_v4 = vld [vmem:[%s6812_s26] sm:$0xff]   ;;  %s4967_s25 = sshll.u32 %s6913_s24, 4  ;;  %s6645_s19 = smov [#allocation6]   ;;  %s7655_s25 = int_to_ptr.vmem [resolvable:$true] %s4967_s25 }
  0x43   : > { %5691 = vmatprep.mubr.msk.bf16.mxu1 %vm606_vm1, %v6245_v2  ;;  %v6248_v5 = vld [vmem:[%s6812_s26 + $0x8] sm:$0xff]   ;;  %5679 = vmatprep.mubr.msk.bf16.mxu0 %vm606_vm1, %v6247_v4  ;;  %v6249_v6 = vld [vmem:[%s6812_s26 + $0x40] sm:$0xff]   ;;  %v6251_v7 = vld [vmem:[%s6812_s26 + $0x10] sm:$0xff]   ;;  %s6539_s18 = scalar_lea.vmem %s7655_s25, 1024  ;;  %s6543_s28 = sshll.u32 %s6645_s19, 4  ;;  %s6544_s28 = int_to_ptr.vmem [resolvable:$false] %s6543_s28 }
  0x44   : > { %5692 = vmatmul.mubr.msk.bf16.vlgmr.msra.gmra.mrb[0].mxu1 %vm606_vm1, %v6246_v3  ;;  %5680 = vmatmul.mubr.msk.bf16.vlgmr.msra.gmra.mrb[0].mxu0 %vm606_vm1, %v6248_v5  ;;  %v6250_v8 = vld [vmem:[%s6812_s26 + $0x48] sm:$0xff]   ;;  %v6252_v9 = vld [vmem:[%s6812_s26 + $0x50] sm:$0xff]   ;;  %v6253_v10 = vld [vmem:[%s6812_s26 + $0x18] sm:$0xff]   ;;  %p6540_p6 = scmp.ne.s32.totalorder %s7655_s25, %s6539_s18  ;;  %p6546_p2 = scmp.lt.s32.totalorder %s7655_s25, %s6544_s28 }
  0x45   : > { %5695 = vmatprep.mubr.msk.bf16.mxu1 %vm606_vm1, %v6249_v6  ;;  %5683 = vmatprep.mubr.msk.bf16.mxu0 %vm606_vm1, %v6251_v7  ;;  %v6256_v11 = vld [vmem:[%s6812_s26 + $0x20] sm:$0xff]   ;;  %v6254_v12 = vld [vmem:[%s6812_s26 + $0x58] sm:$0xff]   ;;  %v6258_v14 = vld [vmem:[%s6812_s26 + $0x28] sm:$0xff]  }
  0x46   : > { %v6255_v13 = vld [vmem:[%s6812_s26 + $0x60] sm:$0xff]   ;;  %v6257_v15 = vld [vmem:[%s6812_s26 + $0x68] sm:$0xff]   ;;  %v6259_v16 = vld [vmem:[%s6812_s26 + $0x70] sm:$0xff]   ;;  %p6541_p10 = pnand %p6540_p6, %p7807_p9 }
  0x47   : > { %v6260_v17 = vld [vmem:[%s6812_s26 + $0x78] sm:$0xff]   ;;  %v820_v3 = vld [vmem:[%s7773_s1] sm:$0xff]  ;;  %v822_v5 = vld [vmem:[%s7773_s1 + $0x10] sm:$0xff]  ;;  %s5444_s26 = sshll.u32 %s6745_s17, 10 }
  0x48   : > { %v823_v4 = vld [vmem:[%s7773_s1 + $0x18] sm:$0xff]  ;;  %v825_v6 = vld [vmem:[%s7773_s1 + $0x28] sm:$0xff]  ;;  %v824_v7 = vld [vmem:[%s7773_s1 + $0x20] sm:$0xff]  ;;  %s7653_s0 = scalar_lea.hbm %s7785_s13, %s5444_s26  ;;  %p6542_p12 = pneg %p6541_p10 }
  0x4c   : > { %5696 = vmatmul.mubr.msk.bf16.gmra.mrb[4].mxu1 %vm606_vm1, %v6250_v8  ;;  %5684 = vmatmul.mubr.msk.bf16.gmra.mrb[4].mxu0 %vm606_vm1, %v6253_v10  ;;  %v827_v8 = vld [vmem:[%s7773_s1 + $0x38] sm:$0xff]  ;;  %v829_v10 = vld [vmem:[%s7773_s1 + $0x48] sm:$0xff] }
  0x4d   : > { %5699 = vmatprep.mubr.msk.bf16.mxu1 %vm606_vm1, %v6252_v9  ;;  %5687 = vmatprep.mubr.msk.bf16.mxu0 %vm606_vm1, %v6256_v11  ;;  %v826_v9 = vld [vmem:[%s7773_s1 + $0x30] sm:$0xff]  ;;  %v828_v11 = vld [vmem:[%s7773_s1 + $0x40] sm:$0xff] }
  0x54   : > { %5700 = vmatmul.mubr.msk.bf16.gmra.mrb[8].mxu1 %vm606_vm1, %v6254_v12  ;;  %5688 = vmatmul.mubr.msk.bf16.gmra.mrb[8].mxu0 %vm606_vm1, %v6258_v14  ;;  %v831_v12 = vld [vmem:[%s7773_s1 + $0x58] sm:$0xff]  ;;  %v833_v14 = vld [vmem:[%s7773_s1 + $0x68] sm:$0xff] }
  0x55   : > { %5703 = vmatprep.mubr.msk.bf16.mxu1 %vm606_vm1, %v6255_v13  ;;  %v830_v13 = vld [vmem:[%s7773_s1 + $0x50] sm:$0xff] }
  0x5c   : > { %5704 = vmatmul.mubr.msk.bf16.gmra.mrb[12].mxu1 %vm606_vm1, %v6257_v15  ;;  %v832_v15 = vld [vmem:[%s7773_s1 + $0x60] sm:$0xff] }
  0x5d   : > { %5707 = vmatprep.mubr.msk.bf16.mxu1 %vm606_vm1, %v6259_v16  ;;  %v835_v16 = vld [vmem:[%s7773_s1 + $0x78] sm:$0xff] }
  0x64   : > { %5708 = vmatmul.mubr.msk.bf16.gmra.mrb[16].mxu1 %vm606_vm1, %v6260_v17  ;;  %v834_v17 = vld [vmem:[%s7773_s1 + $0x70] sm:$0xff] }
  0x65   : > { %900 = vmatprep.mubr.f32.mxu1 %v821_v18  ;;  %v958_v18 = vld [vmem:[%s7775_s3] sm:$0xff] }
 0x117   : > { %v6852_v19 = vpop.f32.mrb[0].mxu1  ;;  %v5681_v21 = vpop.f32.mrb[0].mxu0 }
 0x118   : > { %v741_v20 = vpop.f32.mrb[1].mxu1  ;;  %v693_v23 = vpop.f32.mrb[1].mxu0 }
 0x119   : > { %v5694_v22 = vpop.f32.mrb[2].mxu1  ;;  %v5682_v26 = vpop.f32.mrb[2].mxu0 }
 0x11a   : > { %v5873_v24 = vpack.c.bf16 %v5694_v22, %v6852_v19  ;;  %v744_v25 = vpop.f32.mrb[3].mxu1  ;;  %v5849_v28 = vpack.c.bf16 %v5682_v26, %v5681_v21  ;;  %v696_v29 = vpop.f32.mrb[3].mxu0  ;;  %v6261_v19 = vld [vmem:[%s7776_s4] sm:$0xff]  }
 0x11b   : > { %v5869_v27 = vpack.c.bf16 %v744_v25, %v741_v20  ;;  %v5845_v30 = vpack.c.bf16 %v696_v29, %v693_v23  ;;  %5739 = vmatprep.subr.bf16.mxu0 %v6261_v19 }
 0x11c   : > { %5740 = vmatpush3.bf16.msra.mxu0 %v6261_v19 }
 0x11f   : > { %v5697_v31 = vpop.f32.mrb[4].mxu1  ;;  %v5685_v33 = vpop.f32.mrb[4].mxu0 }
 0x120   : > { %v757_v32 = vpop.f32.mrb[5].mxu1  ;;  %v709_v35 = vpop.f32.mrb[5].mxu0 }
 0x121   : > { %v5698_v34 = vpop.f32.mrb[6].mxu1  ;;  %v5686_v38 = vpop.f32.mrb[6].mxu0 }
 0x122   : > { %v5847_v36 = vpack.c.bf16 %v5698_v34, %v5697_v31  ;;  %v760_v37 = vpop.f32.mrb[7].mxu1  ;;  %v5857_v40 = vpack.c.bf16 %v5686_v38, %v5685_v33  ;;  %v712_v41 = vpop.f32.mrb[7].mxu0 }
 0x123   : > { %v5843_v39 = vpack.c.bf16 %v760_v37, %v757_v32  ;;  %v5853_v42 = vpack.c.bf16 %v712_v41, %v709_v35 }
 0x125   : > { %5844 = vmatprep.subr.bf16.mxu1 %v5843_v39 }
 0x126   : > { %5846 = vmatpush3.bf16.msra.mxu1 %v5845_v30 }
 0x127   : > { %v5701_v43 = vpop.f32.mrb[8].mxu1  ;;  %5848 = vmatprep.subr.bf16.mxu1 %v5847_v36  ;;  %v5689_v45 = vpop.f32.mrb[8].mxu0 }
 0x128   : > { %v773_v44 = vpop.f32.mrb[9].mxu1  ;;  %v725_v47 = vpop.f32.mrb[9].mxu0 }
 0x129   : > { %v5702_v46 = vpop.f32.mrb[10].mxu1  ;;  %v5690_v50 = vpop.f32.mrb[10].mxu0 }
 0x12a   : > { %v5855_v48 = vpack.c.bf16 %v5702_v46, %v5701_v43  ;;  %v776_v49 = vpop.f32.mrb[11].mxu1  ;;  %5850 = vmatpush3.bf16.msra.mxu1 %v5849_v28  ;;  %v5865_v52 = vpack.c.bf16 %v5690_v50, %v5689_v45  ;;  %v728_v53 = vpop.f32.mrb[11].mxu0 }
 0x12b   : > { %v5851_v51 = vpack.c.bf16 %v776_v49, %v773_v44  ;;  %v5861_v54 = vpack.c.bf16 %v728_v53, %v725_v47 }
 0x12d   : > { %5852 = vmatprep.subr.bf16.mxu1 %v5851_v51 }
 0x12e   : > { %5854 = vmatpush3.bf16.msra.mxu1 %v5853_v42 }
 0x12f   : > { %v5705_v55 = vpop.f32.mrb[12].mxu1  ;;  %5856 = vmatprep.subr.bf16.mxu1 %v5855_v48 }
 0x130   : > { %v789_v56 = vpop.f32.mrb[13].mxu1 }
 0x131   : > { %v5706_v57 = vpop.f32.mrb[14].mxu1 }
 0x132   : > { %v5863_v58 = vpack.c.bf16 %v5706_v57, %v5705_v55  ;;  %v792_v59 = vpop.f32.mrb[15].mxu1  ;;  %5858 = vmatpush3.bf16.msra.mxu1 %v5857_v40  ;;  %v960_v57 = vld [vmem:[%s7775_s3 + $0x10] sm:$0xff] }
 0x133   : > { %v5859_v60 = vpack.c.bf16 %v792_v59, %v789_v56  ;;  %v959_v56 = vld [vmem:[%s7775_s3 + $0x8] sm:$0xff]  ;;  %v962_v59 = vld [vmem:[%s7775_s3 + $0x20] sm:$0xff] }
 0x135   : > { %5860 = vmatprep.subr.bf16.mxu1 %v5859_v60  ;;  %v963_v60 = vld [vmem:[%s7775_s3 + $0x28] sm:$0xff] }
 0x136   : > { %5862 = vmatpush3.bf16.msra.mxu1 %v5861_v54 }
 0x137   : > { %v5709_v61 = vpop.f32.mrb[16].mxu1  ;;  %5864 = vmatprep.subr.bf16.mxu1 %v5863_v58  ;;  %v961_v58 = vld [vmem:[%s7775_s3 + $0x18] sm:$0xff] }
 0x138   : > { %v805_v62 = vpop.f32.mrb[17].mxu1 }
 0x139   : > { %v5710_v63 = vpop.f32.mrb[18].mxu1 }
 0x13a   : > { %v5871_v0 = vpack.c.bf16 %v5710_v63, %v5709_v61  ;;  %v808_v1 = vpop.f32.mrb[19].mxu1  ;;  %5866 = vmatpush3.bf16.msra.mxu1 %v5865_v52  ;;  %v964_v61 = vld [vmem:[%s7775_s3 + $0x30] sm:$0xff]  ;;  %v6262_v63 = vld [vmem:[%s7776_s4 + $0x8] sm:$0xff]  }
 0x13b   : > { %v5867_v2 = vpack.c.bf16 %v808_v1, %v805_v62  ;;  %v965_v62 = vld [vmem:[%s7775_s3 + $0x38] sm:$0xff]  ;;  %5741 = vmatprep.subr.bf16.mxu0 %v6262_v63 }
 0x13c   : > { %5742 = vmatpush3.bf16.msra.mxu0 %v6262_v63 }
 0x13d   : > { %5868 = vmatprep.subr.bf16.mxu1 %v5867_v2 }
 0x13e   : > { %5870 = vmatpush3.bf16.msra.mxu1 %v5869_v27 }
 0x13f   : > { %5872 = vmatprep.subr.bf16.mxu1 %v5871_v0 }
 0x142   : > { %5874 = vmatpush3.bf16.msra.mxu1 %v5873_v24 }
 0x145   : > { %901 = vmatmul.mubr.f32.vlgmr.msra.gmra.mrb[20].mxu1 %v820_v3 }
 0x146   : > { %905 = vmatprep.mubr.f32.mxu1 %v823_v4 }
 0x149   : > { %906 = vmatmul.mubr.f32.gmra.mrb[22].mxu1 %v822_v5 }
 0x14a   : > { %910 = vmatprep.mubr.f32.mxu1 %v825_v6 }
 0x14d   : > { %911 = vmatmul.mubr.f32.gmra.mrb[24].mxu1 %v824_v7 }
 0x14e   : > { %915 = vmatprep.mubr.f32.mxu1 %v827_v8 }
 0x151   : > { %916 = vmatmul.mubr.f32.gmra.mrb[26].mxu1 %v826_v9 }
 0x152   : > { %920 = vmatprep.mubr.f32.mxu1 %v829_v10 }
 0x155   : > { %921 = vmatmul.mubr.f32.gmra.mrb[28].mxu1 %v828_v11 }
 0x156   : > { %925 = vmatprep.mubr.f32.mxu1 %v831_v12  ;;  %v1224_v12 = vld [vmem:[%s7779_s7] sm:$0xff] }
 0x159   : > { %926 = vmatmul.mubr.f32.gmra.mrb[30].mxu1 %v830_v13  ;;  %v5139_v13 = vld [vmem:[%s7777_s5] ss:$0 sm:$0xff] }
 0x15a   : > { %930 = vmatprep.mubr.f32.mxu1 %v833_v14 }
 0x15d   : > { %931 = vmatmul.mubr.f32.gmra.mrb[32].mxu1 %v832_v15 }
 0x15e   : > { %935 = vmatprep.mubr.f32.mxu1 %v835_v16 }
 0x161   : > { %936 = vmatmul.mubr.f32.gmra.mrb[34].mxu1 %v834_v17 }
 0x162   : > { %5727 = vmatprep.mubr.msk.f32.mxu1 %vm966_vm2, %v958_v18 }
 0x218   : > { %v5495_v20 = vpop.f32.mrb[20].mxu1 }
 0x219   : > { %v5496_v21 = vpop.f32.mrb[21].mxu1 }
 0x21a   : > { %v5497_v22 = vadd.f32 %v5496_v21, %v5495_v20 }
 0x21c   : > { %v6911_v23 = vmax.f32 %v5497_v22, 0.0  ;;  %v5498_v24 = vpop.f32.mrb[22].mxu1  ;;  %v1210_v22 = vld [vmem:[%s7778_s6 + $0x10] sm:$0xff] }
 0x21d   : > { %v5499_v25 = vpop.f32.mrb[23].mxu1 }
 0x21e   : > { %950 = vst.msk [vmem:[%s6913_s24] sm:$0xff] %vm949_vm3, %v6911_v23  ;;  %v5500_v26 = vadd.f32 %v5499_v25, %v5498_v24  ;;  %v1211_v25 = vld [vmem:[%s7778_s6 + $0x18] sm:$0xff] }
 0x220   : > { %v6918_v27 = vmax.f32 %v5500_v26, 0.0  ;;  %v5501_v28 = vpop.f32.mrb[24].mxu1 }
 0x221   : > { %v5502_v29 = vpop.f32.mrb[25].mxu1 }
 0x222   : > { %951 = vst.msk [vmem:[%s6913_s24 + $0x8] sm:$0xff] %vm949_vm3, %v6918_v27  ;;  %v5503_v30 = vadd.f32 %v5502_v29, %v5501_v28  ;;  %v5875_v31 = vpack.c.bf16 %v6918_v27, %v6911_v23  ;;  %v1208_v28 = vld [vmem:[%s7778_s6] sm:$0xff] }
 0x224   : > { %v6925_v32 = vmax.f32 %v5503_v30, 0.0  ;;  %v5504_v33 = vpop.f32.mrb[26].mxu1  ;;  %5876 = vmatprep.subr.bf16.mxu1 %v5875_v31  ;;  %v1209_v30 = vld [vmem:[%s7778_s6 + $0x8] sm:$0xff] }
 0x225   : > { %v5505_v34 = vpop.f32.mrb[27].mxu1  ;;  %5878 = vmatpush3.bf16.msra.mxu1 %v5875_v31 }
 0x226   : > { %952 = vst.msk [vmem:[%s6913_s24 + $0x10] sm:$0xff] %vm949_vm3, %v6925_v32  ;;  %v5506_v35 = vadd.f32 %v5505_v34, %v5504_v33 }
 0x228   : > { %v6930_v36 = vmax.f32 %v5506_v35, 0.0  ;;  %v5507_v37 = vpop.f32.mrb[28].mxu1 }
 0x229   : > { %v5508_v38 = vpop.f32.mrb[29].mxu1 }
 0x22a   : > { %953 = vst.msk [vmem:[%s6913_s24 + $0x18] sm:$0xff] %vm949_vm3, %v6930_v36  ;;  %v5509_v39 = vadd.f32 %v5508_v38, %v5507_v37  ;;  %v5879_v40 = vpack.c.bf16 %v6930_v36, %v6925_v32 }
 0x22c   : > { %v6937_v41 = vmax.f32 %v5509_v39, 0.0  ;;  %v5510_v42 = vpop.f32.mrb[30].mxu1  ;;  %5880 = vmatprep.subr.bf16.mxu1 %v5879_v40 }
 0x22d   : > { %v5511_v43 = vpop.f32.mrb[31].mxu1  ;;  %5882 = vmatpush3.bf16.msra.mxu1 %v5879_v40 }
 0x22e   : > { %954 = vst.msk [vmem:[%s6913_s24 + $0x20] sm:$0xff] %vm949_vm3, %v6937_v41  ;;  %v5512_v44 = vadd.f32 %v5511_v43, %v5510_v42 }
 0x230   : > { %v6942_v45 = vmax.f32 %v5512_v44, 0.0  ;;  %v5513_v46 = vpop.f32.mrb[32].mxu1 }
 0x231   : > { %v5514_v47 = vpop.f32.mrb[33].mxu1 }
 0x232   : > { %955 = vst.msk [vmem:[%s6913_s24 + $0x28] sm:$0xff] %vm949_vm3, %v6942_v45  ;;  %v5515_v48 = vadd.f32 %v5514_v47, %v5513_v46  ;;  %v5883_v49 = vpack.c.bf16 %v6942_v45, %v6937_v41 }
 0x234   : > { %v6949_v50 = vmax.f32 %v5515_v48, 0.0  ;;  %v5516_v51 = vpop.f32.mrb[34].mxu1  ;;  %5884 = vmatprep.subr.bf16.mxu1 %v5883_v49 }
 0x235   : > { %v5517_v52 = vpop.f32.mrb[35].mxu1  ;;  %5886 = vmatpush3.bf16.msra.mxu1 %v5883_v49 }
 0x236   : > { %956 = vst.msk [vmem:[%s6913_s24 + $0x30] sm:$0xff] %vm949_vm3, %v6949_v50  ;;  %v5518_v53 = vadd.f32 %v5517_v52, %v5516_v51  ;;  %v1214_v51 = vld [vmem:[%s7778_s6 + $0x30] sm:$0xff] }
 0x238   : > { %v6954_v54 = vmax.f32 %v5518_v53, 0.0  ;;  %v1215_v53 = vld [vmem:[%s7778_s6 + $0x38] sm:$0xff] }
 0x23a   : > { %957 = vst.msk [vmem:[%s6913_s24 + $0x38] sm:$0xff] %vm949_vm3, %v6954_v54  ;;  %v5887_v55 = vpack.c.bf16 %v6954_v54, %v6949_v50  ;;  %s6545_s24 = scalar_lea.vmem %s6544_s28, 2048 }
 0x23b   : > { %p6547_p3 = scmp.lt.s32.totalorder %s6545_s24, %s6539_s18 }
 0x23c   : > { %5888 = vmatprep.subr.bf16.mxu1 %v5887_v55 }
 0x23d   : > { %5890 = vmatpush3.bf16.msra.mxu1 %v5887_v55  ;;  %p6548_p4 = por %p6547_p3, %p6546_p2 }
 0x23f   : > { %p6549_p7 = pnand %p6548_p4, %p6542_p12 }
 0x240   : > { %5728 = vmatmul.mubr.msk.f32.vlgmr.msra.gmra.mrb[36].mxu1 %vm966_vm2, %v959_v56  ;;  %v1212_v56 = vld [vmem:[%s7778_s6 + $0x20] sm:$0xff] }
 0x241   : > { %5730 = vmatprep.mubr.msk.f32.mxu1 %vm966_vm2, %v960_v57 }
 0x244   : > { %5731 = vmatmul.mubr.msk.f32.gmra.mrb[38].mxu1 %vm966_vm2, %v961_v58  ;;  %v1213_v58 = vld [vmem:[%s7778_s6 + $0x28] sm:$0xff] }
 0x245   : > { %5733 = vmatprep.mubr.msk.f32.mxu1 %vm966_vm2, %v962_v59 }
 0x248   : > { %5734 = vmatmul.mubr.msk.f32.gmra.mrb[40].mxu1 %vm966_vm2, %v963_v60 }
 0x249   : > { %5736 = vmatprep.mubr.msk.f32.mxu1 %vm966_vm2, %v964_v61 }
 0x24c   : > { %5737 = vmatmul.mubr.msk.f32.gmra.mrb[42].mxu1 %vm966_vm2, %v965_v62 }
 0x24d   : > { %5767 = vmatprep.mubr.msk.f32.mxu1 %vm966_vm2, %v1224_v12  ;;  %v6268_v12 = vld [vmem:[#allocation3 + $0x8c] ss:$16 sps:$4 sm:$0xff]  }
 0x313   : > { %v5729_v0 = vpop.f32.mrb[36].mxu1 }
 0x314   : > { %v1057_v1 = vpop.f32.mrb[37].mxu1 }
 0x315   : > { %v1096_v2 = vpack.c.bf16 %v5729_v0, %v1057_v1 }
 0x317   : > { %v5732_v3 = vpop.f32.mrb[38].mxu1  ;;  %5743 = vmatprep.mubr.msk.bf16.mxu0 %vm949_vm3, %v1096_v2  ;;  %v1225_v2 = vld [vmem:[%s7779_s7 + $0x8] sm:$0xff] }
 0x318   : > { %v1067_v4 = vpop.f32.mrb[39].mxu1 }
 0x319   : > { %v1097_v5 = vpack.c.bf16 %v5732_v3, %v1067_v4  ;;  %v1226_v3 = vld [vmem:[%s7779_s7 + $0x10] sm:$0xff]  ;;  %v1227_v4 = vld [vmem:[%s7779_s7 + $0x18] sm:$0xff] }
 0x31b   : > { %5744 = vmatmul.mubr.msk.bf16.vlgmr.msra.gmra.mrb[12].mxu0 %vm949_vm3, %v1097_v5  ;;  %v5735_v6 = vpop.f32.mrb[40].mxu1  ;;  %v1228_v5 = vld [vmem:[%s7779_s7 + $0x20] sm:$0xff] }
 0x31c   : > { %v1077_v7 = vpop.f32.mrb[41].mxu1 }
 0x31d   : > { %v1098_v8 = vpack.c.bf16 %v5735_v6, %v1077_v7  ;;  %v1229_v6 = vld [vmem:[%s7779_s7 + $0x28] sm:$0xff]  ;;  %v1230_v7 = vld [vmem:[%s7779_s7 + $0x30] sm:$0xff] }
 0x31f   : > { %v5738_v9 = vpop.f32.mrb[42].mxu1  ;;  %5747 = vmatprep.mubr.msk.bf16.mxu0 %vm949_vm3, %v1098_v8  ;;  %v1231_v8 = vld [vmem:[%s7779_s7 + $0x38] sm:$0xff] }
 0x320   : > { %v1087_v10 = vpop.f32.mrb[43].mxu1 }
 0x321   : > { %v1099_v11 = vpack.c.bf16 %v5738_v9, %v1087_v10  ;;  %v6263_v9 = vld [vmem:[#allocation3 + $0x80] ss:$16 sps:$4 sm:$0xff]   ;;  %v6265_v10 = vld [vmem:[#allocation3 + $0x84] ss:$16 sps:$4 sm:$0xff]  }
 0x322   : > { %1524 = vmatprep.subr.bf16.mxu0 %v6265_v10  ;;  %v6302_v10 = vld [vmem:[#allocation3 + $0x48] ss:$16 sps:$4 sm:$0xff]  }
 0x323   : > { %5748 = vmatmul.mubr.msk.bf16.gmra.mrb[16].mxu0 %vm949_vm3, %v1099_v11  ;;  %v6266_v11 = vld [vmem:[#allocation3 + $0x88] ss:$16 sps:$4 sm:$0xff]  }
 0x324   : > { %1525 = vmatpush1.bf16.msra.mxu0 %v6263_v9 }
 0x3ee   : > { %v5745_v14 = vpop.f32.mrb[12].mxu0 }
 0x3ef   : > { %v1178_v15 = vadd.f32 %v5745_v14, %v5139_v13  ;;  %v1169_v16 = vpop.f32.mrb[13].mxu0  ;;  %v6274_v14 = vld [vmem:[#allocation3 + $0xac] ss:$16 sps:$4 sm:$0xff]  }
 0x3f0   : > { %v1170_v17 = vadd.f32 %v5139_v13, %v1169_v16  ;;  %v5746_v18 = vpop.f32.mrb[14].mxu0  ;;  %v6642_v16 = vmov 0.0  }
 0x3f1   : > { %v1202_v19 = vmax.f32 %v1178_v15, 0.0  ;;  %v1181_v20 = vadd.f32 %v5746_v18, %v5139_v13  ;;  %v1172_v21 = vpop.f32.mrb[15].mxu0  ;;  %v6269_v15 = vld [vmem:[#allocation3 + $0xa0] ss:$16 sps:$4 sm:$0xff]   ;;  %1404 = vst.msk [vmem:[#allocation2 + $0x10] sm:$0xff] %vm966_vm2, %v6642_v16  ;;  %1401 = vst.msk [vmem:[#allocation2] sm:$0xff] %vm966_vm2, %v6642_v16 }
 0x3f2   : > { %v1200_v24 = vmax.f32 %v1170_v17, 0.0  ;;  %v1173_v26 = vadd.f32 %v5139_v13, %v1172_v21  ;;  %1405 = vst.msk [vmem:[#allocation2 + $0x18] sm:$0x3] %vm1402_vm4, %v6642_v16  ;;  %1403 = vst.msk [vmem:[#allocation2 + $0x8] sm:$0x3] %vm1402_vm4, %v6642_v16 }
 0x3f3   : > { %v1203_v29 = vmax.f32 %v1181_v20, 0.0  ;;  %v1218_v33 = vmul.f32 %v1210_v22, %v1202_v19  ;;  %1406 = vst.msk [vmem:[#allocation2 + $0x20] sm:$0xff] %vm966_vm2, %v6642_v16  ;;  %1408 = vst.msk [vmem:[#allocation2 + $0x30] sm:$0xff] %vm966_vm2, %v6642_v16  ;;  %v6272_v17 = vld [vmem:[#allocation3 + $0xa8] ss:$16 sps:$4 sm:$0xff]  }
 0x3f4   : > { %v1201_v31 = vmax.f32 %v1173_v26, 0.0  ;;  %v1216_v35 = vmul.f32 %v1208_v28, %v1200_v24  ;;  %1407 = vst.msk [vmem:[#allocation2 + $0x28] sm:$0x3] %vm1402_vm4, %v6642_v16  ;;  %1409 = vst.msk [vmem:[#allocation2 + $0x38] sm:$0x3] %vm1402_vm4, %v6642_v16  ;;  %v6643_v28 = vmov 0  }
 0x3f5   : > { %v1219_v34 = vmul.f32 %v1211_v25, %v1203_v29  ;;  %1410 = vst.msk [vmem:[#allocation2 + $0x40] sm:$0xff] %vm966_vm2, %v6642_v16  ;;  %1412 = vst.msk [vmem:[#allocation2 + $0x50] sm:$0xff] %vm966_vm2, %v6642_v16  ;;  %v6275_v18 = vld [vmem:[#allocation3 + $0xc0] ss:$16 sps:$4 sm:$0xff]   ;;  %v6277_v19 = vld [vmem:[#allocation3 + $0xc4] ss:$16 sps:$4 sm:$0xff]   ;;  %1556 = vmatprep.mubr.bf16.mxu0 %v6643_v28 }
 0x3f6   : > { %v1217_v37 = vmul.f32 %v1209_v30, %v1201_v31  ;;  %v5749_v38 = vpop.f32.mrb[16].mxu0  ;;  %1411 = vst.msk [vmem:[#allocation2 + $0x48] sm:$0x3] %vm1402_vm4, %v6642_v16  ;;  %1413 = vst.msk [vmem:[#allocation2 + $0x58] sm:$0x3] %vm1402_vm4, %v6642_v16 }
 0x3f7   : > { %v1194_v39 = vadd.f32 %v5749_v38, %v5139_v13  ;;  %v1185_v40 = vpop.f32.mrb[17].mxu0  ;;  %v5895_v42 = vpack.c.bf16 %v1219_v34, %v1218_v33  ;;  %1414 = vst.msk [vmem:[#allocation2 + $0x60] sm:$0xff] %vm966_vm2, %v6642_v16  ;;  %1416 = vst.msk [vmem:[#allocation2 + $0x70] sm:$0xff] %vm966_vm2, %v6642_v16  ;;  %v6278_v20 = vld [vmem:[#allocation3 + $0xc8] ss:$16 sps:$4 sm:$0xff]  }
 0x3f8   : > { %v1186_v43 = vadd.f32 %v5139_v13, %v1185_v40  ;;  %v5750_v44 = vpop.f32.mrb[18].mxu0  ;;  %v5891_v46 = vpack.c.bf16 %v1217_v37, %v1216_v35  ;;  %1415 = vst.msk [vmem:[#allocation2 + $0x68] sm:$0x3] %vm1402_vm4, %v6642_v16  ;;  %1417 = vst.msk [vmem:[#allocation2 + $0x78] sm:$0x3] %vm1402_vm4, %v6642_v16 }
 0x3f9   : > { %v1206_v47 = vmax.f32 %v1194_v39, 0.0  ;;  %v1197_v48 = vadd.f32 %v5750_v44, %v5139_v13  ;;  %v1188_v49 = vpop.f32.mrb[19].mxu0  ;;  %1418 = vst.msk [vmem:[#allocation2 + $0x80] sm:$0xff] %vm966_vm2, %v6642_v16  ;;  %1420 = vst.msk [vmem:[#allocation2 + $0x90] sm:$0xff] %vm966_vm2, %v6642_v16  ;;  %v6280_v21 = vld [vmem:[#allocation3 + $0xcc] ss:$16 sps:$4 sm:$0xff]  }
 0x3fa   : > { %v1204_v52 = vmax.f32 %v1186_v43, 0.0  ;;  %v1189_v55 = vadd.f32 %v5139_v13, %v1188_v49  ;;  %5892 = vmatprep.subr.bf16.mxu1 %v5891_v46  ;;  %v6271_v13 = vld [vmem:[#allocation3 + $0xa4] ss:$16 sps:$4 sm:$0xff]   ;;  %1419 = vst.msk [vmem:[#allocation2 + $0x88] sm:$0x3] %vm1402_vm4, %v6642_v16 }
 0x3fb   : > { %v1207_v57 = vmax.f32 %v1197_v48, 0.0  ;;  %5894 = vmatpush3.bf16.msra.mxu1 %v5891_v46  ;;  %v1222_v60 = vmul.f32 %v1214_v51, %v1206_v47  ;;  %1421 = vst.msk [vmem:[#allocation2 + $0x98] sm:$0x3] %vm1402_vm4, %v6642_v16  ;;  %1526 = vmatprep.subr.bf16.mxu0 %v6271_v13  ;;  %v6281_v22 = vld [vmem:[#allocation3 + $0xe0] ss:$16 sps:$4 sm:$0xff]  }
 0x3fc   : > { %v1205_v59 = vmax.f32 %v1189_v55, 0.0  ;;  %5896 = vmatprep.subr.bf16.mxu1 %v5895_v42  ;;  %v1220_v62 = vmul.f32 %v1212_v56, %v1204_v52  ;;  %1527 = vmatpush1.bf16.msra.mxu0 %v6269_v15  ;;  %v6283_v24 = vld [vmem:[#allocation3 + $0xe4] ss:$16 sps:$4 sm:$0xff]   ;;  %v6284_v25 = vld [vmem:[#allocation3 + $0xe8] ss:$16 sps:$4 sm:$0xff]  }
 0x3fd   : > { %v1223_v61 = vmul.f32 %v1215_v53, %v1207_v57  ;;  %1528 = vmatprep.subr.bf16.mxu0 %v6277_v19  ;;  %v6286_v26 = vld [vmem:[#allocation3 + $0xec] ss:$16 sps:$4 sm:$0xff]   ;;  %v6289_v35 = vld [vmem:[#allocation3 + $0x4] ss:$16 sps:$4 sm:$0xff]   ;;  %v6290_v56 = vld [vmem:[#allocation3 + $0x8] ss:$16 sps:$4 sm:$0xff]  }
 0x3fe   : > { %v1221_v63 = vmul.f32 %v1213_v58, %v1205_v59  ;;  %v6292_v38 = vld [vmem:[#allocation3 + $0xc] ss:$16 sps:$4 sm:$0xff]   ;;  %v1451_v49 = vld [vmem:[#allocation2 + $0x1] sm:$0xff] }
 0x3ff   : > { %5898 = vmatpush3.bf16.msra.mxu1 %v5895_v42  ;;  %v5903_v0 = vpack.c.bf16 %v1223_v61, %v1222_v60  ;;  %v6295_v57 = vld [vmem:[#allocation3 + $0x24] ss:$16 sps:$4 sm:$0xff]   ;;  %v6298_v58 = vld [vmem:[#allocation3 + $0x2c] ss:$16 sps:$4 sm:$0xff]   ;;  %v6308_v19 = vld [vmem:[#allocation3 + $0x68] ss:$16 sps:$4 sm:$0xff]  }
 0x400   : > { %v5899_v1 = vpack.c.bf16 %v1221_v63, %v1220_v62  ;;  %1529 = vmatpush1.bf16.msra.mxu0 %v6275_v18  ;;  %v6293_v62 = vld [vmem:[#allocation3 + $0x20] ss:$16 sps:$4 sm:$0xff]   ;;  %v6296_v63 = vld [vmem:[#allocation3 + $0x28] ss:$16 sps:$4 sm:$0xff]   ;;  %v6310_v15 = vld [vmem:[#allocation3 + $0x6c] ss:$16 sps:$4 sm:$0xff]  }
 0x401   : > { %1530 = vmatprep.subr.bf16.mxu0 %v6283_v24  ;;  %v6305_v18 = vld [vmem:[#allocation3 + $0x60] ss:$16 sps:$4 sm:$0xff]   ;;  %v6313_v24 = vld [vmem:[#allocation3 + $0x104] ss:$16 sps:$4 sm:$0xff]  }
 0x402   : > { %5900 = vmatprep.subr.bf16.mxu1 %v5899_v1 }
 0x403   : > { %5902 = vmatpush3.bf16.msra.mxu1 %v5899_v1 }
 0x404   : > { %5904 = vmatprep.subr.bf16.mxu1 %v5903_v0  ;;  %1531 = vmatpush1.bf16.msra.mxu0 %v6281_v22 }
 0x405   : > { %1649 = vmatprep.subr.bf16.mxu0 %v6289_v35 }
 0x407   : > { %5906 = vmatpush3.bf16.msra.mxu1 %v5903_v0 }
 0x408   : > { %2997 = vmatprep.subr.bf16.mxu1 %v6268_v12 }
 0x40a   : > { %5768 = vmatmul.mubr.msk.f32.vlgmr.msra.gmra.mrb[44].mxu1 %vm966_vm2, %v1225_v2  ;;  %v6301_v2 = vld [vmem:[#allocation3 + $0x44] ss:$16 sps:$4 sm:$0xff]  }
 0x40b   : > { %5770 = vmatprep.mubr.msk.f32.mxu1 %vm966_vm2, %v1226_v3  ;;  %2998 = vmatpush1.bf16.msra.mxu1 %v6266_v11  ;;  %v6304_v3 = vld [vmem:[#allocation3 + $0x4c] ss:$16 sps:$4 sm:$0xff]  }
 0x40c   : > { %2999 = vmatprep.subr.bf16.mxu1 %v6274_v14  ;;  %v6307_v14 = vld [vmem:[#allocation3 + $0x64] ss:$16 sps:$4 sm:$0xff]  }
 0x40e   : > { %5771 = vmatmul.mubr.msk.f32.gmra.mrb[46].mxu1 %vm966_vm2, %v1227_v4 }
 0x40f   : > { %5773 = vmatprep.mubr.msk.f32.mxu1 %vm966_vm2, %v1228_v5  ;;  %3000 = vmatpush1.bf16.msra.mxu1 %v6272_v17 }
 0x410   : > { %3001 = vmatprep.subr.bf16.mxu1 %v6280_v21 }
 0x412   : > { %5774 = vmatmul.mubr.msk.f32.gmra.mrb[48].mxu1 %vm966_vm2, %v1229_v6 }
 0x413   : > { %5776 = vmatprep.mubr.msk.f32.mxu1 %vm966_vm2, %v1230_v7  ;;  %3002 = vmatpush1.bf16.msra.mxu1 %v6278_v20 }
 0x414   : > { %3003 = vmatprep.subr.bf16.mxu1 %v6286_v26 }
 0x416   : > { %5777 = vmatmul.mubr.msk.f32.gmra.mrb[50].mxu1 %vm966_vm2, %v1231_v8  ;;  %v6299_v8 = vld [vmem:[#allocation3 + $0x40] ss:$16 sps:$4 sm:$0xff]  }
 0x417   : > { %3004 = vmatpush1.bf16.msra.mxu1 %v6284_v25  ;;  %3029 = vmatprep.mubr.bf16.mxu1 %v6643_v28  ;;  %v6316_v25 = vld [vmem:[#allocation3 + $0x10c] ss:$16 sps:$4 sm:$0xff]  }
 0x418   : > { %3110 = vmatprep.subr.bf16.mxu1 %v6292_v38  ;;  %v6314_v38 = vld [vmem:[#allocation3 + $0x108] ss:$16 sps:$4 sm:$0xff]  }
 0x4dd   : > { %v5769_v29 = vpop.f32.mrb[44].mxu1 }
 0x4de   : > { %v1322_v30 = vpop.f32.mrb[45].mxu1 }
 0x4df   : > { %1369 = vrot.lane.b32.xlu0 %v1322_v30, %s6644_s15 }
 0x4e1   : > { %v5772_v31 = vpop.f32.mrb[46].mxu1 }
 0x4e2   : > { %v1332_v33 = vpop.f32.mrb[47].mxu1 }
 0x4e3   : > { %1371 = vrot.lane.b32.xlu0 %v5769_v29, %s6644_s15  ;;  %1373 = vrot.lane.b32.xlu1 %v1332_v33, %s6644_s15  ;;  %v1431_v33 = vld [vmem:[#allocation2] sm:$0xff] }
 0x4e5   : > { %v5775_v34 = vpop.f32.mrb[48].mxu1 }
 0x4e6   : > { %v1342_v37 = vpop.f32.mrb[49].mxu1 }
 0x4e7   : > { %1375 = vrot.lane.b32.xlu1 %v5772_v31, %s6644_s15  ;;  %1377 = vrot.lane.b32.xlu0 %v1342_v37, %s6644_s15  ;;  %v6311_v37 = vld [vmem:[#allocation3 + $0x100] ss:$16 sps:$4 sm:$0xff]  }
 0x4e9   : > { %v5778_v39 = vpop.f32.mrb[50].mxu1 }
 0x4ea   : > { %v1352_v40 = vpop.f32.mrb[51].mxu1 }
 0x4eb   : > { %1379 = vrot.lane.b32.xlu1 %v5775_v34, %s6644_s15  ;;  %1381 = vrot.lane.b32.xlu0 %v1352_v40, %s6644_s15  ;;  %v6322_v40 = vld [vmem:[#allocation3 + $0x12c] ss:$16 sps:$4 sm:$0xff]  }
 0x4ef   : > { %1383 = vrot.lane.b32.xlu1 %v5778_v39, %s6644_s15  ;;  %v6319_v39 = vld [vmem:[#allocation3 + $0x124] ss:$16 sps:$4 sm:$0xff]  }
 0x551   : > { %v1370_v42 = vpop.permute.xlu0 %1369 }
 0x552   : > { %v1393_v43 = vsel %vm949_vm3, %v6911_v23, %v1370_v42  ;;  %v6317_v42 = vld [vmem:[#allocation3 + $0x120] ss:$16 sps:$4 sm:$0xff]  }
 0x553   : > { %1423 = vst.msk [vmem:[#allocation2 + $0x11] sm:$0xff] %vm966_vm2, %v1393_v43  ;;  %v6320_v43 = vld [vmem:[#allocation3 + $0x128] ss:$16 sps:$4 sm:$0xff]  }
 0x555   : > { %v1372_v44 = vpop.permute.xlu0 %1371  ;;  %v1374_v46 = vpop.permute.xlu1 %1373 }
 0x556   : > { %v1394_v47 = vsel %vm949_vm3, %v6918_v27, %v1372_v44  ;;  %v1395_v48 = vsel %vm949_vm3, %v6925_v32, %v1374_v46  ;;  %v6287_v32 = vld [vmem:[#allocation3] ss:$16 sps:$4 sm:$0xff]   ;;  %v6325_v44 = vld [vmem:[#allocation3 + $0x144] ss:$16 sps:$4 sm:$0xff]  }
 0x557   : > { %1424 = vst.msk [vmem:[#allocation2 + $0x21] sm:$0xff] %vm966_vm2, %v1394_v47  ;;  %1425 = vst.msk [vmem:[#allocation2 + $0x31] sm:$0xff] %vm966_vm2, %v1395_v48  ;;  %v6328_v48 = vld [vmem:[#allocation3 + $0x14c] ss:$16 sps:$4 sm:$0xff]  }
 0x559   : > { %v1376_v51 = vpop.permute.xlu1 %1375  ;;  %v1378_v52 = vpop.permute.xlu0 %1377 }
 0x55a   : > { %v1396_v23 = vsel %vm949_vm3, %v6930_v36, %v1376_v51  ;;  %v1397_v53 = vsel %vm949_vm3, %v6937_v41, %v1378_v52  ;;  %v1452_v55 = vld [vmem:[#allocation2 + $0x11] sm:$0xff] }
 0x55b   : > { %1426 = vst.msk [vmem:[#allocation2 + $0x41] sm:$0xff] %vm966_vm2, %v1396_v23  ;;  %1427 = vst.msk [vmem:[#allocation2 + $0x51] sm:$0xff] %vm966_vm2, %v1397_v53  ;;  %v1459_v27 = vpack.c.bf16 %v1452_v55, %v1451_v49  ;;  %v7102_v0 = vld [vmem:[#allocation2 + $0x12] sm:$0xff]  ;;  %v6334_v53 = vld [vmem:[#allocation3 + $0x16c] ss:$16 sps:$4 sm:$0xff]  }
 0x55c   : > { %v7150_v34 = vld [vmem:[#allocation2 + $0x10] sm:$0xff]  ;;  %v6326_v52 = vld [vmem:[#allocation3 + $0x148] ss:$16 sps:$4 sm:$0xff]  }
 0x55d   : > { %5162 = vmatmul.mubr.msk.bf16.vlgmr.msra.gmra.mrb[20].mxu0 %vm966_vm2, %v1459_v27  ;;  %5270 = vmatmul.mubr.msk.bf16.vlgmr.msra.gmra.mrb[52].mxu1 %vm966_vm2, %v1459_v27  ;;  %v1380_v59 = vpop.permute.xlu1 %1379  ;;  %v1382_v60 = vpop.permute.xlu0 %1381  ;;  %v1439_v35 = vpack.c.bf16 %v7150_v34, %v1431_v33  ;;  %v6323_v51 = vld [vmem:[#allocation3 + $0x140] ss:$16 sps:$4 sm:$0xff]   ;;  %v6331_v23 = vld [vmem:[#allocation3 + $0x164] ss:$16 sps:$4 sm:$0xff]   ;;  %v6332_v27 = vld [vmem:[#allocation3 + $0x168] ss:$16 sps:$4 sm:$0xff]  }
 0x55e   : > { %v1398_v36 = vsel %vm949_vm3, %v6942_v45, %v1380_v59  ;;  %v1399_v41 = vsel %vm949_vm3, %v6949_v50, %v1382_v60  ;;  %1566 = vmatprep.mubr.bf16.mxu0 %v6643_v28  ;;  %3039 = vmatprep.mubr.bf16.mxu1 %v6643_v28  ;;  %v1453_v61 = vld [vmem:[#allocation2 + $0x21] sm:$0xff]  ;;  %v1454_v50 = vld [vmem:[#allocation2 + $0x31] sm:$0xff] }
 0x55f   : > { %1428 = vst.msk [vmem:[#allocation2 + $0x61] sm:$0xff] %vm966_vm2, %v1398_v36  ;;  %1429 = vst.msk [vmem:[#allocation2 + $0x71] sm:$0xff] %vm966_vm2, %v1399_v41  ;;  %1650 = vmatpush1.bf16.msra.mxu0 %v6287_v32  ;;  %3111 = vmatpush1.bf16.msra.mxu1 %v6290_v56  ;;  %v7104_v1 = vld [vmem:[#allocation2 + $0x22] sm:$0xff]  ;;  %v7106_v45 = vpack.c.bf16 %v1453_v61, %v1452_v55  ;;  %v1460_v9 = vpack.c.bf16 %v1454_v50, %v1453_v61  ;;  %v7115_v11 = vld [vmem:[#allocation2 + $0x32] sm:$0xff] }
 0x560   : > { %1651 = vmatprep.subr.bf16.mxu0 %v6295_v57  ;;  %3112 = vmatprep.subr.bf16.mxu1 %v6298_v58  ;;  %v7110_v4 = vpack.c.bf16 %v7104_v1, %v7102_v0  ;;  %v7157_v46 = vld [vmem:[#allocation2 + $0x20] sm:$0xff]  ;;  %v7159_v47 = vld [vmem:[#allocation2 + $0x30] sm:$0xff]  ;;  %v6340_v58 = vld [vmem:[#allocation3 + $0x18c] ss:$16 sps:$4 sm:$0xff]  }
 0x561   : > { %v1384_v5 = vpop.permute.xlu1 %1383  ;;  %v7163_v49 = vpack.c.bf16 %v7159_v47, %v7157_v46  ;;  %v6329_v55 = vld [vmem:[#allocation3 + $0x160] ss:$16 sps:$4 sm:$0xff]   ;;  %v6337_v32 = vld [vmem:[#allocation3 + $0x184] ss:$16 sps:$4 sm:$0xff]   ;;  %v6368_v33 = vld [vmem:[#allocation3 + $0x228] ss:$16 sps:$4 sm:$0xff]  }
 0x562   : > { %v1400_v6 = vsel %vm949_vm3, %v6954_v54, %v1384_v5  ;;  %v1455_v7 = vld [vmem:[#allocation2 + $0x41] sm:$0xff]  ;;  %v1456_v16 = vld [vmem:[#allocation2 + $0x51] sm:$0xff] }
 0x563   : > { %1430 = vst.msk [vmem:[#allocation2 + $0x81] sm:$0xff] %vm966_vm2, %v1400_v6  ;;  %1652 = vmatpush1.bf16.msra.mxu0 %v6293_v62  ;;  %3113 = vmatpush1.bf16.msra.mxu1 %v6296_v63  ;;  %v7117_v12 = vld [vmem:[#allocation2 + $0x42] sm:$0xff]  ;;  %v7119_v13 = vpack.c.bf16 %v1455_v7, %v1454_v50  ;;  %v7129_v20 = vld [vmem:[#allocation2 + $0x52] sm:$0xff]  ;;  %v1461_v29 = vpack.c.bf16 %v1456_v16, %v1455_v7 }
 0x564   : > { %1653 = vmatprep.subr.bf16.mxu0 %v6301_v2  ;;  %3114 = vmatprep.subr.bf16.mxu1 %v6304_v3  ;;  %v7123_v54 = vpack.c.bf16 %v7117_v12, %v7115_v11  ;;  %v7171_v56 = vld [vmem:[#allocation2 + $0x40] sm:$0xff]  ;;  %v7173_v57 = vld [vmem:[#allocation2 + $0x50] sm:$0xff]  ;;  %v6338_v50 = vld [vmem:[#allocation3 + $0x188] ss:$16 sps:$4 sm:$0xff]  }
 0x565   : > { %5163 = vmatmul.mubr.msk.bf16.gmra.mrb[24].mxu0 %vm966_vm2, %v1460_v9  ;;  %5271 = vmatmul.mubr.msk.bf16.gmra.mrb[56].mxu1 %vm966_vm2, %v1460_v9  ;;  %v7177_v59 = vpack.c.bf16 %v7173_v57, %v7171_v56  ;;  %v1722_v61 = vld [vmem:[#allocation2 + $0x2] sm:$0xff]  ;;  %v6346_v3 = vld [vmem:[#allocation3 + $0x1ac] ss:$16 sps:$4 sm:$0xff]  }
 0x566   : > { %1576 = vmatprep.mubr.bf16.mxu0 %v6643_v28  ;;  %3049 = vmatprep.mubr.bf16.mxu1 %v6643_v28  ;;  %v1457_v17 = vld [vmem:[#allocation2 + $0x61] sm:$0xff]  ;;  %v7143_v30 = vld [vmem:[#allocation2 + $0x71] sm:$0xff]  ;;  %v1730_v62 = vpack.c.bf16 %v7102_v0, %v1722_v61  ;;  %v6352_v0 = vld [vmem:[#allocation3 + $0x1cc] ss:$16 sps:$4 sm:$0xff]  }
 0x567   : > { %1654 = vmatpush1.bf16.msra.mxu0 %v6299_v8  ;;  %3115 = vmatpush1.bf16.msra.mxu1 %v6302_v10  ;;  %v7131_v21 = vld [vmem:[#allocation2 + $0x62] sm:$0xff]  ;;  %v7133_v22 = vpack.c.bf16 %v1457_v17, %v1456_v16  ;;  %v1462_v31 = vpack.c.bf16 %v7143_v30, %v1457_v17  ;;  %v7187_v36 = vld [vmem:[#allocation2 + $0x70] sm:$0xff]  ;;  %v7206_v8 = vpack.c.bf16 %v7115_v11, %v7104_v1  ;;  %v6364_v17 = vld [vmem:[#allocation3 + $0x20c] ss:$16 sps:$4 sm:$0xff]  }
 0x568   : > { %1655 = vmatprep.subr.bf16.mxu0 %v6307_v14  ;;  %3116 = vmatprep.subr.bf16.mxu1 %v6310_v15  ;;  %v7137_v26 = vpack.c.bf16 %v7131_v21, %v7129_v20  ;;  %v7185_v60 = vld [vmem:[#allocation2 + $0x60] sm:$0xff]  ;;  %v6344_v6 = vld [vmem:[#allocation3 + $0x1a8] ss:$16 sps:$4 sm:$0xff]   ;;  %v6358_v15 = vld [vmem:[#allocation3 + $0x1ec] ss:$16 sps:$4 sm:$0xff]  }
 0x569   : > { %v7191_v41 = vpack.c.bf16 %v7187_v36, %v7185_v60  ;;  %v6335_v63 = vld [vmem:[#allocation3 + $0x180] ss:$16 sps:$4 sm:$0xff]   ;;  %v6343_v2 = vld [vmem:[#allocation3 + $0x1a4] ss:$16 sps:$4 sm:$0xff]   ;;  %v6350_v10 = vld [vmem:[#allocation3 + $0x1c8] ss:$16 sps:$4 sm:$0xff]  }
 0x56a   : > { %v6341_v5 = vld [vmem:[#allocation3 + $0x1a0] ss:$16 sps:$4 sm:$0xff]   ;;  %v6349_v7 = vld [vmem:[#allocation3 + $0x1c4] ss:$16 sps:$4 sm:$0xff]   ;;  %v6356_v11 = vld [vmem:[#allocation3 + $0x1e8] ss:$16 sps:$4 sm:$0xff]  }
 0x56b   : > { %1656 = vmatpush1.bf16.msra.mxu0 %v6305_v18  ;;  %3117 = vmatpush1.bf16.msra.mxu1 %v6308_v19  ;;  %v6347_v9 = vld [vmem:[#allocation3 + $0x1c0] ss:$16 sps:$4 sm:$0xff]   ;;  %v6355_v14 = vld [vmem:[#allocation3 + $0x1e4] ss:$16 sps:$4 sm:$0xff]   ;;  %v7216_v18 = vpack.c.bf16 %v7129_v20, %v7117_v12  ;;  %v1892_v20 = vpack.c.bf16 %v7157_v46, %v7150_v34  ;;  %v6376_v34 = vld [vmem:[#allocation3 + $0x24c] ss:$16 sps:$4 sm:$0xff]  }
 0x56c   : > { %1795 = vmatprep.subr.bf16.mxu0 %v6313_v24  ;;  %3231 = vmatprep.subr.bf16.mxu1 %v6316_v25  ;;  %v6353_v1 = vld [vmem:[#allocation3 + $0x1e0] ss:$16 sps:$4 sm:$0xff]   ;;  %v6361_v16 = vld [vmem:[#allocation3 + $0x204] ss:$16 sps:$4 sm:$0xff]   ;;  %v6362_v25 = vld [vmem:[#allocation3 + $0x208] ss:$16 sps:$4 sm:$0xff]  }
 0x56d   : > { %5164 = vmatmul.mubr.msk.bf16.gmra.mrb[28].mxu0 %vm966_vm2, %v1461_v29  ;;  %5272 = vmatmul.mubr.msk.bf16.gmra.mrb[60].mxu1 %vm966_vm2, %v1461_v29  ;;  %v7224_v19 = vld [vmem:[#allocation2 + $0x72] sm:$0xff] }
 0x56e   : > { %1586 = vmatprep.mubr.bf16.mxu0 %v6643_v28  ;;  %3059 = vmatprep.mubr.bf16.mxu1 %v6643_v28  ;;  %v7228_v12 = vpack.c.bf16 %v7224_v19, %v7131_v21  ;;  %v6359_v24 = vld [vmem:[#allocation3 + $0x200] ss:$16 sps:$4 sm:$0xff]   ;;  %v6367_v29 = vld [vmem:[#allocation3 + $0x224] ss:$16 sps:$4 sm:$0xff]  }
 0x56f   : > { %v6365_v21 = vld [vmem:[#allocation3 + $0x220] ss:$16 sps:$4 sm:$0xff]   ;;  %v6385_v46 = vld [vmem:[#allocation3 + $0x284] ss:$16 sps:$4 sm:$0xff]  }
 0x570   : > { %v6403_v61 = vld [vmem:[#allocation3 + $0x2e4] ss:$16 sps:$4 sm:$0xff]  }
 0x575   : > { %5165 = vmatmul.mubr.msk.bf16.gmra.mrb[32].mxu0 %vm966_vm2, %v1462_v31  ;;  %5273 = vmatmul.mubr.msk.bf16.gmra.mrb[64].mxu1 %vm966_vm2, %v1462_v31  ;;  %v6370_v31 = vld [vmem:[#allocation3 + $0x22c] ss:$16 sps:$4 sm:$0xff]  }
 0x576   : > { %1681 = vmatprep.mubr.bf16.mxu0 %v6643_v28  ;;  %3142 = vmatprep.mubr.bf16.mxu1 %v6643_v28 }
 0x57d   : > { %5174 = vmatmul.mubr.msk.bf16.vlgmr.msra.gmra.mrb[20].mxu0 %vm966_vm2, %v1439_v35  ;;  %5282 = vmatmul.mubr.msk.bf16.vlgmr.msra.gmra.mrb[52].mxu1 %vm966_vm2, %v1439_v35  ;;  %v6373_v35 = vld [vmem:[#allocation3 + $0x244] ss:$16 sps:$4 sm:$0xff]  }
 0x57e   : > { %1691 = vmatprep.mubr.bf16.mxu0 %v6643_v28  ;;  %3152 = vmatprep.mubr.bf16.mxu1 %v6643_v28 }
 0x57f   : > { %1796 = vmatpush1.bf16.msra.mxu0 %v6311_v37  ;;  %3232 = vmatpush1.bf16.msra.mxu1 %v6314_v38  ;;  %v1893_v37 = vpack.c.bf16 %v7171_v56, %v7159_v47  ;;  %v6371_v38 = vld [vmem:[#allocation3 + $0x240] ss:$16 sps:$4 sm:$0xff]   ;;  %v6388_v47 = vld [vmem:[#allocation3 + $0x28c] ss:$16 sps:$4 sm:$0xff]   ;;  %v6392_v56 = vld [vmem:[#allocation3 + $0x2a8] ss:$16 sps:$4 sm:$0xff]  }
 0x580   : > { %1797 = vmatprep.subr.bf16.mxu0 %v6319_v39  ;;  %3233 = vmatprep.subr.bf16.mxu1 %v6322_v40  ;;  %v6374_v39 = vld [vmem:[#allocation3 + $0x248] ss:$16 sps:$4 sm:$0xff]   ;;  %v6379_v40 = vld [vmem:[#allocation3 + $0x264] ss:$16 sps:$4 sm:$0xff]  }
 0x583   : > { %1798 = vmatpush1.bf16.msra.mxu0 %v6317_v42  ;;  %3234 = vmatpush1.bf16.msra.mxu1 %v6320_v43  ;;  %v6382_v42 = vld [vmem:[#allocation3 + $0x26c] ss:$16 sps:$4 sm:$0xff]   ;;  %v6377_v43 = vld [vmem:[#allocation3 + $0x260] ss:$16 sps:$4 sm:$0xff]  }
 0x584   : > { %1799 = vmatprep.subr.bf16.mxu0 %v6325_v44  ;;  %3235 = vmatprep.subr.bf16.mxu1 %v6328_v48  ;;  %v6380_v44 = vld [vmem:[#allocation3 + $0x268] ss:$16 sps:$4 sm:$0xff]   ;;  %v1894_v48 = vpack.c.bf16 %v7185_v60, %v7173_v57  ;;  %v6397_v57 = vld [vmem:[#allocation3 + $0x2c4] ss:$16 sps:$4 sm:$0xff]   ;;  %v6395_v60 = vld [vmem:[#allocation3 + $0x2c0] ss:$16 sps:$4 sm:$0xff]  }
 0x585   : > { %5175 = vmatmul.mubr.msk.bf16.gmra.mrb[24].mxu0 %vm966_vm2, %v7163_v49  ;;  %5283 = vmatmul.mubr.msk.bf16.gmra.mrb[56].mxu1 %vm966_vm2, %v7163_v49 }
 0x586   : > { %1701 = vmatprep.mubr.bf16.mxu0 %v6643_v28  ;;  %3162 = vmatprep.mubr.bf16.mxu1 %v6643_v28 }
 0x587   : > { %1800 = vmatpush1.bf16.msra.mxu0 %v6323_v51  ;;  %3236 = vmatpush1.bf16.msra.mxu1 %v6326_v52  ;;  %v7254_v51 = vld [vmem:[#allocation2 + $0x80] sm:$0xff] }
 0x588   : > { %1801 = vmatprep.subr.bf16.mxu0 %v6331_v23  ;;  %3237 = vmatprep.subr.bf16.mxu1 %v6334_v53  ;;  %v1895_v52 = vpack.c.bf16 %v7254_v51, %v7187_v36  ;;  %v6383_v23 = vld [vmem:[#allocation3 + $0x280] ss:$16 sps:$4 sm:$0xff]   ;;  %v6386_v53 = vld [vmem:[#allocation3 + $0x288] ss:$16 sps:$4 sm:$0xff]  }
 0x589   : > { %v6398_v36 = vld [vmem:[#allocation3 + $0x2c8] ss:$16 sps:$4 sm:$0xff]  }
 0x58b   : > { %1802 = vmatpush1.bf16.msra.mxu0 %v6329_v55  ;;  %3238 = vmatpush1.bf16.msra.mxu1 %v6332_v27  ;;  %v6391_v55 = vld [vmem:[#allocation3 + $0x2a4] ss:$16 sps:$4 sm:$0xff]   ;;  %v6394_v27 = vld [vmem:[#allocation3 + $0x2ac] ss:$16 sps:$4 sm:$0xff]  }
 0x58c   : > { %1957 = vmatprep.subr.bf16.mxu0 %v6337_v32  ;;  %3368 = vmatprep.subr.bf16.mxu1 %v6340_v58  ;;  %v6389_v32 = vld [vmem:[#allocation3 + $0x2a0] ss:$16 sps:$4 sm:$0xff]   ;;  %v6400_v58 = vld [vmem:[#allocation3 + $0x2cc] ss:$16 sps:$4 sm:$0xff]  }
 0x58d   : > { %5176 = vmatmul.mubr.msk.bf16.gmra.mrb[28].mxu0 %vm966_vm2, %v7177_v59  ;;  %5284 = vmatmul.mubr.msk.bf16.gmra.mrb[60].mxu1 %vm966_vm2, %v7177_v59 }
 0x58e   : > { %1711 = vmatprep.mubr.bf16.mxu0 %v6643_v28  ;;  %3172 = vmatprep.mubr.bf16.mxu1 %v6643_v28 }
 0x595   : > { %5177 = vmatmul.mubr.msk.bf16.gmra.mrb[32].mxu0 %vm966_vm2, %v7191_v41  ;;  %5285 = vmatmul.mubr.msk.bf16.gmra.mrb[64].mxu1 %vm966_vm2, %v7191_v41 }
 0x596   : > { %1827 = vmatprep.mubr.bf16.mxu0 %v6643_v28  ;;  %3263 = vmatprep.mubr.bf16.mxu1 %v6643_v28 }
 0x59d   : > { %5186 = vmatmul.mubr.msk.bf16.vlgmr.msra.gmra.mrb[20].mxu0 %vm966_vm2, %v1730_v62  ;;  %5294 = vmatmul.mubr.msk.bf16.vlgmr.msra.gmra.mrb[52].mxu1 %vm966_vm2, %v1730_v62  ;;  %v6401_v62 = vld [vmem:[#allocation3 + $0x2e0] ss:$16 sps:$4 sm:$0xff]  }
 0x59e   : > { %1837 = vmatprep.mubr.bf16.mxu0 %v6643_v28  ;;  %3273 = vmatprep.mubr.bf16.mxu1 %v6643_v28 }
 0x59f   : > { %1958 = vmatpush1.bf16.msra.mxu0 %v6335_v63  ;;  %3369 = vmatpush1.bf16.msra.mxu1 %v6338_v50  ;;  %v6404_v63 = vld [vmem:[#allocation3 + $0x2e8] ss:$16 sps:$4 sm:$0xff]   ;;  %v6409_v50 = vld [vmem:[#allocation3 + $0x304] ss:$16 sps:$4 sm:$0xff]  }
 0x5a0   : > { %1959 = vmatprep.subr.bf16.mxu0 %v6343_v2  ;;  %3370 = vmatprep.subr.bf16.mxu1 %v6346_v3  ;;  %v6412_v2 = vld [vmem:[#allocation3 + $0x30c] ss:$16 sps:$4 sm:$0xff]  }
 0x5a3   : > { %1960 = vmatpush1.bf16.msra.mxu0 %v6341_v5  ;;  %3371 = vmatpush1.bf16.msra.mxu1 %v6344_v6  ;;  %v6407_v5 = vld [vmem:[#allocation3 + $0x300] ss:$16 sps:$4 sm:$0xff]   ;;  %v6410_v6 = vld [vmem:[#allocation3 + $0x308] ss:$16 sps:$4 sm:$0xff]  }
 0x5a4   : > { %1961 = vmatprep.subr.bf16.mxu0 %v6349_v7  ;;  %3372 = vmatprep.subr.bf16.mxu1 %v6352_v0  ;;  %v6418_v7 = vld [vmem:[#allocation3 + $0x32c] ss:$16 sps:$4 sm:$0xff]   ;;  %v6416_v0 = vld [vmem:[#allocation3 + $0x328] ss:$16 sps:$4 sm:$0xff]  }
 0x5a5   : > { %5187 = vmatmul.mubr.msk.bf16.gmra.mrb[24].mxu0 %vm966_vm2, %v7206_v8  ;;  %5295 = vmatmul.mubr.msk.bf16.gmra.mrb[56].mxu1 %vm966_vm2, %v7206_v8 }
 0x5a6   : > { %1847 = vmatprep.mubr.bf16.mxu0 %v6643_v28  ;;  %3283 = vmatprep.mubr.bf16.mxu1 %v6643_v28 }
 0x5a7   : > { %1962 = vmatpush1.bf16.msra.mxu0 %v6347_v9  ;;  %3373 = vmatpush1.bf16.msra.mxu1 %v6350_v10  ;;  %v6421_v9 = vld [vmem:[#allocation3 + $0x344] ss:$16 sps:$4 sm:$0xff]   ;;  %v6424_v10 = vld [vmem:[#allocation3 + $0x34c] ss:$16 sps:$4 sm:$0xff]  }
 0x5a8   : > { %1963 = vmatprep.subr.bf16.mxu0 %v6355_v14  ;;  %3374 = vmatprep.subr.bf16.mxu1 %v6358_v15  ;;  %v6419_v14 = vld [vmem:[#allocation3 + $0x340] ss:$16 sps:$4 sm:$0xff]   ;;  %v6422_v15 = vld [vmem:[#allocation3 + $0x348] ss:$16 sps:$4 sm:$0xff]  }
 0x5ab   : > { %1964 = vmatpush1.bf16.msra.mxu0 %v6353_v1  ;;  %3375 = vmatpush1.bf16.msra.mxu1 %v6356_v11  ;;  %v6427_v1 = vld [vmem:[#allocation3 + $0x364] ss:$16 sps:$4 sm:$0xff]   ;;  %v6425_v11 = vld [vmem:[#allocation3 + $0x360] ss:$16 sps:$4 sm:$0xff]  }
 0x5ac   : > { %2119 = vmatprep.subr.bf16.mxu0 %v6361_v16  ;;  %3505 = vmatprep.subr.bf16.mxu1 %v6364_v17  ;;  %v6428_v16 = vld [vmem:[#allocation3 + $0x368] ss:$16 sps:$4 sm:$0xff]   ;;  %v6433_v17 = vld [vmem:[#allocation3 + $0x384] ss:$16 sps:$4 sm:$0xff]  }
 0x5ad   : > { %5188 = vmatmul.mubr.msk.bf16.gmra.mrb[28].mxu0 %vm966_vm2, %v7216_v18  ;;  %5296 = vmatmul.mubr.msk.bf16.gmra.mrb[60].mxu1 %vm966_vm2, %v7216_v18 }
 0x5ae   : > { %1857 = vmatprep.mubr.bf16.mxu0 %v6643_v28  ;;  %3293 = vmatprep.mubr.bf16.mxu1 %v6643_v28 }
 0x5b5   : > { %5189 = vmatmul.mubr.msk.bf16.gmra.mrb[32].mxu0 %vm966_vm2, %v7228_v12  ;;  %5297 = vmatmul.mubr.msk.bf16.gmra.mrb[64].mxu1 %vm966_vm2, %v7228_v12 }
 0x5b6   : > { %1989 = vmatprep.mubr.bf16.mxu0 %v6643_v28  ;;  %3400 = vmatprep.mubr.bf16.mxu1 %v6643_v28 }
 0x5bd   : > { %5198 = vmatmul.mubr.msk.bf16.vlgmr.msra.gmra.mrb[20].mxu0 %vm966_vm2, %v1892_v20  ;;  %5306 = vmatmul.mubr.msk.bf16.vlgmr.msra.gmra.mrb[52].mxu1 %vm966_vm2, %v1892_v20  ;;  %v6436_v20 = vld [vmem:[#allocation3 + $0x38c] ss:$16 sps:$4 sm:$0xff]  }
 0x5be   : > { %1999 = vmatprep.mubr.bf16.mxu0 %v6643_v28  ;;  %3410 = vmatprep.mubr.bf16.mxu1 %v6643_v28 }
 0x5bf   : > { %2120 = vmatpush1.bf16.msra.mxu0 %v6359_v24  ;;  %3506 = vmatpush1.bf16.msra.mxu1 %v6362_v25  ;;  %v6431_v25 = vld [vmem:[#allocation3 + $0x380] ss:$16 sps:$4 sm:$0xff]  }
 0x5c0   : > { %2121 = vmatprep.subr.bf16.mxu0 %v6367_v29  ;;  %3507 = vmatprep.subr.bf16.mxu1 %v6370_v31  ;;  %v6434_v29 = vld [vmem:[#allocation3 + $0x388] ss:$16 sps:$4 sm:$0xff]   ;;  %v6442_v31 = vld [vmem:[#allocation3 + $0x3ac] ss:$16 sps:$4 sm:$0xff]  }
 0x5c3   : > { %2122 = vmatpush1.bf16.msra.mxu0 %v6365_v21  ;;  %3508 = vmatpush1.bf16.msra.mxu1 %v6368_v33  ;;  %v6440_v21 = vld [vmem:[#allocation3 + $0x3a8] ss:$16 sps:$4 sm:$0xff]   ;;  %v6445_v33 = vld [vmem:[#allocation3 + $0x3c4] ss:$16 sps:$4 sm:$0xff]  }
 0x5c4   : > { %2123 = vmatprep.subr.bf16.mxu0 %v6373_v35  ;;  %3509 = vmatprep.subr.bf16.mxu1 %v6376_v34  ;;  %v6448_v35 = vld [vmem:[#allocation3 + $0x3cc] ss:$16 sps:$4 sm:$0xff]   ;;  %v6443_v34 = vld [vmem:[#allocation3 + $0x3c0] ss:$16 sps:$4 sm:$0xff]  }
 0x5c5   : > { %5199 = vmatmul.mubr.msk.bf16.gmra.mrb[24].mxu0 %vm966_vm2, %v1893_v37  ;;  %5307 = vmatmul.mubr.msk.bf16.gmra.mrb[56].mxu1 %vm966_vm2, %v1893_v37  ;;  %v6446_v37 = vld [vmem:[#allocation3 + $0x3c8] ss:$16 sps:$4 sm:$0xff]  }
 0x5c6   : > { %2009 = vmatprep.mubr.bf16.mxu0 %v6643_v28  ;;  %3420 = vmatprep.mubr.bf16.mxu1 %v6643_v28 }
 0x5c7   : > { %2124 = vmatpush1.bf16.msra.mxu0 %v6371_v38  ;;  %3510 = vmatpush1.bf16.msra.mxu1 %v6374_v39  ;;  %v6451_v38 = vld [vmem:[#allocation3 + $0x3e4] ss:$16 sps:$4 sm:$0xff]   ;;  %v6449_v39 = vld [vmem:[#allocation3 + $0x3e0] ss:$16 sps:$4 sm:$0xff]  }
 0x5c8   : > { %2125 = vmatprep.subr.bf16.mxu0 %v6379_v40  ;;  %3511 = vmatprep.subr.bf16.mxu1 %v6382_v42  ;;  %v6452_v40 = vld [vmem:[#allocation3 + $0x3e8] ss:$16 sps:$4 sm:$0xff]   ;;  %v6457_v42 = vld [vmem:[#allocation3 + $0x404] ss:$16 sps:$4 sm:$0xff]  }
 0x5cb   : > { %2126 = vmatpush1.bf16.msra.mxu0 %v6377_v43  ;;  %3512 = vmatpush1.bf16.msra.mxu1 %v6380_v44  ;;  %v6460_v43 = vld [vmem:[#allocation3 + $0x40c] ss:$16 sps:$4 sm:$0xff]  }
 0x5cc   : > { %2281 = vmatprep.subr.bf16.mxu0 %v6385_v46  ;;  %3642 = vmatprep.subr.bf16.mxu1 %v6388_v47  ;;  %v2533_v46 = vld [vmem:[#allocation2 + $0x21] sm:$0xff]  ;;  %v2534_v47 = vld [vmem:[#allocation2 + $0x31] sm:$0xff] }
 0x5cd   : > { %5200 = vmatmul.mubr.msk.bf16.gmra.mrb[28].mxu0 %vm966_vm2, %v1894_v48  ;;  %5308 = vmatmul.mubr.msk.bf16.gmra.mrb[60].mxu1 %vm966_vm2, %v1894_v48  ;;  %v2541_v48 = vpack.c.bf16 %v2534_v47, %v2533_v46 }
 0x5ce   : > { %2019 = vmatprep.mubr.bf16.mxu0 %v6643_v28  ;;  %3430 = vmatprep.mubr.bf16.mxu1 %v6643_v28 }
 0x5d5   : > { %5201 = vmatmul.mubr.msk.bf16.gmra.mrb[32].mxu0 %vm966_vm2, %v1895_v52  ;;  %5309 = vmatmul.mubr.msk.bf16.gmra.mrb[64].mxu1 %vm966_vm2, %v1895_v52  ;;  %v6455_v52 = vld [vmem:[#allocation3 + $0x400] ss:$16 sps:$4 sm:$0xff]  }
 0x5d6   : > { %2151 = vmatprep.mubr.bf16.mxu0 %v6643_v28  ;;  %3537 = vmatprep.mubr.bf16.mxu1 %v6643_v28 }
 0x5dd   : > { %5210 = vmatmul.mubr.msk.bf16.vlgmr.msra.gmra.mrb[20].mxu0 %vm966_vm2, %v7106_v45  ;;  %5318 = vmatmul.mubr.msk.bf16.vlgmr.msra.gmra.mrb[52].mxu1 %vm966_vm2, %v7106_v45  ;;  %v6406_v45 = vld [vmem:[#allocation3 + $0x2ec] ss:$16 sps:$4 sm:$0xff]  }
 0x5de   : > { %2161 = vmatprep.mubr.bf16.mxu0 %v6643_v28  ;;  %3547 = vmatprep.mubr.bf16.mxu1 %v6643_v28 }
 0x5df   : > { %2282 = vmatpush1.bf16.msra.mxu0 %v6383_v23  ;;  %3643 = vmatpush1.bf16.msra.mxu1 %v6386_v53  ;;  %v6463_v23 = vld [vmem:[#allocation3 + $0x424] ss:$16 sps:$4 sm:$0xff]   ;;  %v6466_v53 = vld [vmem:[#allocation3 + $0x42c] ss:$16 sps:$4 sm:$0xff]  }
 0x5e0   : > { %2283 = vmatprep.subr.bf16.mxu0 %v6391_v55  ;;  %3644 = vmatprep.subr.bf16.mxu1 %v6394_v27  ;;  %v6461_v55 = vld [vmem:[#allocation3 + $0x420] ss:$16 sps:$4 sm:$0xff]   ;;  %v6464_v27 = vld [vmem:[#allocation3 + $0x428] ss:$16 sps:$4 sm:$0xff]  }
 0x5e3   : > { %2284 = vmatpush1.bf16.msra.mxu0 %v6389_v32  ;;  %3645 = vmatpush1.bf16.msra.mxu1 %v6392_v56  ;;  %v2536_v32 = vld [vmem:[#allocation2 + $0x51] sm:$0xff] }
 0x5e4   : > { %2285 = vmatprep.subr.bf16.mxu0 %v6397_v57  ;;  %3646 = vmatprep.subr.bf16.mxu1 %v6400_v58  ;;  %v6469_v56 = vld [vmem:[#allocation3 + $0x444] ss:$16 sps:$4 sm:$0xff]   ;;  %v6472_v57 = vld [vmem:[#allocation3 + $0x44c] ss:$16 sps:$4 sm:$0xff]  }
 0x5e5   : > { %5211 = vmatmul.mubr.msk.bf16.gmra.mrb[24].mxu0 %vm966_vm2, %v7119_v13  ;;  %5319 = vmatmul.mubr.msk.bf16.gmra.mrb[56].mxu1 %vm966_vm2, %v7119_v13  ;;  %v7280_v13 = vld [vmem:[#allocation2 + $0x81] sm:$0xff] }
 0x5e6   : > { %2171 = vmatprep.mubr.bf16.mxu0 %v6643_v28  ;;  %3557 = vmatprep.mubr.bf16.mxu1 %v6643_v28  ;;  %v2057_v3 = vpack.c.bf16 %v7280_v13, %v7143_v30  ;;  %v6413_v30 = vld [vmem:[#allocation3 + $0x320] ss:$16 sps:$4 sm:$0xff]  }
 0x5e7   : > { %2286 = vmatpush1.bf16.msra.mxu0 %v6395_v60  ;;  %3647 = vmatpush1.bf16.msra.mxu1 %v6398_v36  ;;  %v6467_v60 = vld [vmem:[#allocation3 + $0x440] ss:$16 sps:$4 sm:$0xff]   ;;  %v6470_v36 = vld [vmem:[#allocation3 + $0x448] ss:$16 sps:$4 sm:$0xff]  }
 0x5e8   : > { %2287 = vmatprep.subr.bf16.mxu0 %v6403_v61  ;;  %3648 = vmatprep.subr.bf16.mxu1 %v6406_v45  ;;  %v6475_v61 = vld [vmem:[#allocation3 + $0x464] ss:$16 sps:$4 sm:$0xff]   ;;  %v6478_v45 = vld [vmem:[#allocation3 + $0x46c] ss:$16 sps:$4 sm:$0xff]  }
 0x5eb   : > { %2288 = vmatpush1.bf16.msra.mxu0 %v6401_v62  ;;  %3649 = vmatpush1.bf16.msra.mxu1 %v6404_v63  ;;  %v2537_v62 = vld [vmem:[#allocation2 + $0x61] sm:$0xff] }
 0x5ec   : > { %2444 = vmatprep.subr.bf16.mxu0 %v6409_v50  ;;  %3779 = vmatprep.subr.bf16.mxu1 %v6412_v2  ;;  %v6473_v63 = vld [vmem:[#allocation3 + $0x460] ss:$16 sps:$4 sm:$0xff]   ;;  %v6476_v50 = vld [vmem:[#allocation3 + $0x468] ss:$16 sps:$4 sm:$0xff]  }
 0x5ed   : > { %5212 = vmatmul.mubr.msk.bf16.gmra.mrb[28].mxu0 %vm966_vm2, %v7133_v22  ;;  %5320 = vmatmul.mubr.msk.bf16.gmra.mrb[60].mxu1 %vm966_vm2, %v7133_v22  ;;  %v6415_v22 = vld [vmem:[#allocation3 + $0x324] ss:$16 sps:$4 sm:$0xff]  }
 0x5ee   : > { %2181 = vmatprep.mubr.bf16.mxu0 %v6643_v28  ;;  %3567 = vmatprep.mubr.bf16.mxu1 %v6643_v28  ;;  %v2538_v2 = vld [vmem:[#allocation2 + $0x71] sm:$0xff] }
 0x5f5   : > { %5213 = vmatmul.mubr.msk.bf16.gmra.mrb[32].mxu0 %vm966_vm2, %v2057_v3  ;;  %5321 = vmatmul.mubr.msk.bf16.gmra.mrb[64].mxu1 %vm966_vm2, %v2057_v3  ;;  %v6479_v3 = vld [vmem:[%s7782_s10 + $0xc0] sm:$0xff]  }
 0x5f6   : > { %2313 = vmatprep.mubr.bf16.mxu0 %v6643_v28  ;;  %3674 = vmatprep.mubr.bf16.mxu1 %v6643_v28 }
 0x5fd   : > { %5222 = vmatmul.mubr.msk.bf16.vlgmr.msra.gmra.mrb[20].mxu0 %vm966_vm2, %v7110_v4  ;;  %5330 = vmatmul.mubr.msk.bf16.vlgmr.msra.gmra.mrb[52].mxu1 %vm966_vm2, %v7110_v4  ;;  %v6430_v4 = vld [vmem:[#allocation3 + $0x36c] ss:$16 sps:$4 sm:$0xff]  }
 0x5fe   : > { %2323 = vmatprep.mubr.bf16.mxu0 %v6643_v28  ;;  %3684 = vmatprep.mubr.bf16.mxu1 %v6643_v28 }
 0x5ff   : > { %2445 = vmatpush1.bf16.msra.mxu0 %v6407_v5  ;;  %3780 = vmatpush1.bf16.msra.mxu1 %v6410_v6  ;;  %v6480_v5 = vld [vmem:[%s7782_s10 + $0x40] sm:$0xff]   ;;  %v2543_v6 = vpack.c.bf16 %v2538_v2, %v2537_v62 }
 0x600   : > { %2446 = vmatprep.subr.bf16.mxu0 %v6415_v22  ;;  %3781 = vmatprep.subr.bf16.mxu1 %v6418_v7  ;;  %v2540_v22 = vld [vmem:[#allocation2 + $0x91] sm:$0xff] }
 0x601   : > { %v2544_v7 = vpack.c.bf16 %v2540_v22, %v7280_v13  ;;  %v6483_v13 = vld [vmem:[%s7782_s10 + $0xc8] sm:$0xff]  }
 0x603   : > { %2447 = vmatpush1.bf16.msra.mxu0 %v6413_v30  ;;  %3782 = vmatpush1.bf16.msra.mxu1 %v6416_v0  ;;  %v6481_v30 = vld [vmem:[%s7782_s10 + $0x80] sm:$0xff]  }
 0x604   : > { %2448 = vmatprep.subr.bf16.mxu0 %v6421_v9  ;;  %3783 = vmatprep.subr.bf16.mxu1 %v6424_v10  ;;  %v6482_v0 = vld [vmem:[%s7782_s10] sm:$0xff]   ;;  %v6484_v9 = vld [vmem:[%s7782_s10 + $0x48] sm:$0xff]  }
 0x605   : > { %5223 = vmatmul.mubr.msk.bf16.gmra.mrb[24].mxu0 %vm966_vm2, %v7123_v54  ;;  %5331 = vmatmul.mubr.msk.bf16.gmra.mrb[56].mxu1 %vm966_vm2, %v7123_v54  ;;  %v7306_v54 = vld [vmem:[#allocation2 + $0x82] sm:$0xff] }
 0x606   : > { %2333 = vmatprep.mubr.bf16.mxu0 %v6643_v28  ;;  %3694 = vmatprep.mubr.bf16.mxu1 %v6643_v28  ;;  %v2219_v24 = vpack.c.bf16 %v7306_v54, %v7224_v19  ;;  %v6437_v19 = vld [vmem:[#allocation3 + $0x3a0] ss:$16 sps:$4 sm:$0xff]   ;;  %v6485_v10 = vld [vmem:[%s7782_s10 + $0x88] sm:$0xff]  }
 0x607   : > { %2449 = vmatpush1.bf16.msra.mxu0 %v6419_v14  ;;  %3784 = vmatpush1.bf16.msra.mxu1 %v6422_v15  ;;  %v6486_v14 = vld [vmem:[%s7782_s10 + $0x8] sm:$0xff]   ;;  %v6488_v15 = vld [vmem:[%s7782_s10 + $0x50] sm:$0xff]  }
 0x608   : > { %2450 = vmatprep.subr.bf16.mxu0 %v6427_v1  ;;  %3785 = vmatprep.subr.bf16.mxu1 %v6430_v4  ;;  %v6489_v1 = vld [vmem:[%s7782_s10 + $0x90] sm:$0xff]  }
 0x609   : > { %v6490_v4 = vld [vmem:[%s7782_s10 + $0x10] sm:$0xff]  }
 0x60b   : > { %2451 = vmatpush1.bf16.msra.mxu0 %v6425_v11  ;;  %3786 = vmatpush1.bf16.msra.mxu1 %v6428_v16  ;;  %v6491_v11 = vld [vmem:[%s7782_s10 + $0xd8] sm:$0xff]  }
 0x60c   : > { %2606 = vmatprep.subr.bf16.mxu0 %v6433_v17  ;;  %3916 = vmatprep.subr.bf16.mxu1 %v6436_v20  ;;  %v6492_v16 = vld [vmem:[%s7782_s10 + $0x58] sm:$0xff]  }
 0x60d   : > { %5224 = vmatmul.mubr.msk.bf16.gmra.mrb[28].mxu0 %vm966_vm2, %v7137_v26  ;;  %5332 = vmatmul.mubr.msk.bf16.gmra.mrb[60].mxu1 %vm966_vm2, %v7137_v26  ;;  %v6439_v26 = vld [vmem:[#allocation3 + $0x3a4] ss:$16 sps:$4 sm:$0xff]   ;;  %v6493_v17 = vld [vmem:[%s7782_s10 + $0x98] sm:$0xff]  }
 0x60e   : > { %2343 = vmatprep.mubr.bf16.mxu0 %v6643_v28  ;;  %3704 = vmatprep.mubr.bf16.mxu1 %v6643_v28  ;;  %v6494_v20 = vld [vmem:[%s7782_s10 + $0x18] sm:$0xff]  }
 0x615   : > { %5225 = vmatmul.mubr.msk.bf16.gmra.mrb[32].mxu0 %vm966_vm2, %v2219_v24  ;;  %5333 = vmatmul.mubr.msk.bf16.gmra.mrb[64].mxu1 %vm966_vm2, %v2219_v24  ;;  %v6496_v24 = vld [vmem:[%s7782_s10 + $0x60] sm:$0xff]  }
 0x616   : > { %2476 = vmatprep.mubr.bf16.mxu0 %v6643_v28  ;;  %3811 = vmatprep.mubr.bf16.mxu1 %v6643_v28 }
 0x61d   : > { %5234 = vmatmul.mubr.msk.bf16.vlgmr.msra.gmra.mrb[20].mxu0 %vm966_vm2, %v7163_v49  ;;  %5342 = vmatmul.mubr.msk.bf16.vlgmr.msra.gmra.mrb[52].mxu1 %vm966_vm2, %v7163_v49  ;;  %v6454_v49 = vld [vmem:[#allocation3 + $0x3ec] ss:$16 sps:$4 sm:$0xff]  }
 0x61e   : > { %2486 = vmatprep.mubr.bf16.mxu0 %v6643_v28  ;;  %3821 = vmatprep.mubr.bf16.mxu1 %v6643_v28 }
 0x61f   : > { %2607 = vmatpush1.bf16.msra.mxu0 %v6431_v25  ;;  %3917 = vmatpush1.bf16.msra.mxu1 %v6434_v29  ;;  %v6497_v25 = vld [vmem:[%s7782_s10 + $0xa0] sm:$0xff]  }
 0x620   : > { %2608 = vmatprep.subr.bf16.mxu0 %v6439_v26  ;;  %3918 = vmatprep.subr.bf16.mxu1 %v6442_v31  ;;  %v6498_v29 = vld [vmem:[%s7782_s10 + $0x20] sm:$0xff]   ;;  %v6499_v26 = vld [vmem:[%s7782_s10 + $0xe8] sm:$0xff]  }
 0x621   : > { %v6500_v31 = vld [vmem:[%s7782_s10 + $0x68] sm:$0xff]  }
 0x623   : > { %2609 = vmatpush1.bf16.msra.mxu0 %v6437_v19  ;;  %3919 = vmatpush1.bf16.msra.mxu1 %v6440_v21  ;;  %v2702_v19 = vld [vmem:[#allocation2 + $0x92] sm:$0xff] }
 0x624   : > { %2610 = vmatprep.subr.bf16.mxu0 %v6445_v33  ;;  %3920 = vmatprep.subr.bf16.mxu1 %v6448_v35  ;;  %v2706_v21 = vpack.c.bf16 %v2702_v19, %v7306_v54  ;;  %v6501_v33 = vld [vmem:[%s7782_s10 + $0xa8] sm:$0xff]   ;;  %v6504_v54 = vld [vmem:[%s7782_s10 + $0x70] sm:$0xff]  }
 0x625   : > { %5235 = vmatmul.mubr.msk.bf16.gmra.mrb[24].mxu0 %vm966_vm2, %v7177_v59  ;;  %5343 = vmatmul.mubr.msk.bf16.gmra.mrb[56].mxu1 %vm966_vm2, %v7177_v59  ;;  %v2378_v59 = vld [vmem:[#allocation2 + $0x90] sm:$0xff] }
 0x626   : > { %2496 = vmatprep.mubr.bf16.mxu0 %v6643_v28  ;;  %3831 = vmatprep.mubr.bf16.mxu1 %v6643_v28  ;;  %v2382_v44 = vpack.c.bf16 %v2378_v59, %v7254_v51  ;;  %v2535_v51 = vld [vmem:[#allocation2 + $0x41] sm:$0xff]  ;;  %v6505_v35 = vld [vmem:[%s7782_s10 + $0xb0] sm:$0xff]  }
 0x627   : > { %2611 = vmatpush1.bf16.msra.mxu0 %v6443_v34  ;;  %3921 = vmatpush1.bf16.msra.mxu1 %v6446_v37  ;;  %v2542_v58 = vpack.c.bf16 %v2536_v32, %v2535_v51  ;;  %v6506_v34 = vld [vmem:[%s7782_s10 + $0x30] sm:$0xff]   ;;  %v6507_v37 = vld [vmem:[%s7782_s10 + $0xf8] sm:$0xff]   ;;  %v2857_v59 = vld [vmem:[%s7781_s9] sm:$0x3] }
 0x628   : > { %2612 = vmatprep.subr.bf16.mxu0 %v6451_v38  ;;  %3922 = vmatprep.subr.bf16.mxu1 %v6454_v49  ;;  %v6508_v38 = vld [vmem:[%s7782_s10 + $0x78] sm:$0xff]  }
 0x629   : > { %v6509_v49 = vld [vmem:[%s7782_s10 + $0xb8] sm:$0xff]  }
 0x62b   : > { %2613 = vmatpush1.bf16.msra.mxu0 %v6449_v39  ;;  %3923 = vmatpush1.bf16.msra.mxu1 %v6452_v40  ;;  %v6510_v39 = vld [vmem:[%s7782_s10 + $0x38] sm:$0xff]   ;;  %v2859_v40 = vlaneseq }
 0x62c   : > { %2768 = vmatprep.subr.bf16.mxu0 %v6457_v42  ;;  %4053 = vmatprep.subr.bf16.mxu1 %v6460_v43 }
 0x62d   : > { %5236 = vmatmul.mubr.msk.bf16.gmra.mrb[28].mxu0 %vm966_vm2, %v7191_v41  ;;  %5344 = vmatmul.mubr.msk.bf16.gmra.mrb[60].mxu1 %vm966_vm2, %v7191_v41  ;;  %v6458_v41 = vld [vmem:[#allocation3 + $0x408] ss:$16 sps:$4 sm:$0xff]   ;;  %v2860_v42 = vshrl.u32 %v2859_v40, 7 }
 0x62e   : > { %2506 = vmatprep.mubr.bf16.mxu0 %v6643_v28  ;;  %3841 = vmatprep.mubr.bf16.mxu1 %v6643_v28 }
 0x62f   : > { %v2861_v43 = vsub.s32 0, %v2860_v42  ;;  %v2865_v46 = vsub.s32 1, %v2860_v42 }
 0x631   : > { %v7477_v47 = vrot.slane %v2857_v59, %v2861_v43 }
 0x635   : > { %5237 = vmatmul.mubr.msk.bf16.gmra.mrb[32].mxu0 %vm966_vm2, %v2382_v44  ;;  %5345 = vmatmul.mubr.msk.bf16.gmra.mrb[64].mxu1 %vm966_vm2, %v2382_v44  ;;  %v4142_v44 = vld [vmem:[%s7781_s9 + $0x2] sm:$0x3] }
 0x636   : > { %2638 = vmatprep.mubr.bf16.mxu0 %v6643_v28  ;;  %3948 = vmatprep.mubr.bf16.mxu1 %v6643_v28 }
 0x63d   : > { %5246 = vmatmul.mubr.msk.bf16.vlgmr.msra.gmra.mrb[20].mxu0 %vm966_vm2, %v2541_v48  ;;  %5354 = vmatmul.mubr.msk.bf16.vlgmr.msra.gmra.mrb[52].mxu1 %vm966_vm2, %v2541_v48  ;;  %v7479_v48 = vrot.slane %v4142_v44, %v2861_v43 }
 0x63e   : > { %2648 = vmatprep.mubr.bf16.mxu0 %v6643_v28  ;;  %3958 = vmatprep.mubr.bf16.mxu1 %v6643_v28 }
 0x63f   : > { %2769 = vmatpush1.bf16.msra.mxu0 %v6455_v52  ;;  %4054 = vmatpush1.bf16.msra.mxu1 %v6458_v41  ;;  %v7481_v52 = vrot.slane %v2857_v59, %v2865_v46  ;;  %v7483_v41 = vrot.slane %v4142_v44, %v2865_v46 }
 0x640   : > { %2770 = vmatprep.subr.bf16.mxu0 %v6463_v23  ;;  %4055 = vmatprep.subr.bf16.mxu1 %v6466_v53 }
 0x643   : > { %2771 = vmatpush1.bf16.msra.mxu0 %v6461_v55  ;;  %4056 = vmatpush1.bf16.msra.mxu1 %v6464_v27 }
 0x644   : > { %2772 = vmatprep.subr.bf16.mxu0 %v6469_v56  ;;  %4057 = vmatprep.subr.bf16.mxu1 %v6472_v57 }
 0x645   : > { %5247 = vmatmul.mubr.msk.bf16.gmra.mrb[24].mxu0 %vm966_vm2, %v2542_v58  ;;  %5355 = vmatmul.mubr.msk.bf16.gmra.mrb[56].mxu1 %vm966_vm2, %v2542_v58 }
 0x646   : > { %2658 = vmatprep.mubr.bf16.mxu0 %v6643_v28  ;;  %3968 = vmatprep.mubr.bf16.mxu1 %v6643_v28 }
 0x647   : > { %2773 = vmatpush1.bf16.msra.mxu0 %v6467_v60  ;;  %4058 = vmatpush1.bf16.msra.mxu1 %v6470_v36 }
 0x648   : > { %2774 = vmatprep.subr.bf16.mxu0 %v6475_v61  ;;  %4059 = vmatprep.subr.bf16.mxu1 %v6478_v45 }
 0x64b   : > { %2775 = vmatpush1.bf16.msra.mxu0 %v6473_v63  ;;  %4060 = vmatpush1.bf16.msra.mxu1 %v6476_v50 }
 0x64c   : > { %5557 = vmatprep.subr.bf16.mxu0 %v6479_v3  ;;  %5597 = vmatprep.subr.bf16.mxu1 %v6480_v5 }
 0x64d   : > { %5248 = vmatmul.mubr.msk.bf16.gmra.mrb[28].mxu0 %vm966_vm2, %v2543_v6  ;;  %5356 = vmatmul.mubr.msk.bf16.gmra.mrb[60].mxu1 %vm966_vm2, %v2543_v6 }
 0x64e   : > { %2668 = vmatprep.mubr.bf16.mxu0 %v6643_v28  ;;  %3978 = vmatprep.mubr.bf16.mxu1 %v6643_v28 }
 0x655   : > { %5249 = vmatmul.mubr.msk.bf16.gmra.mrb[32].mxu0 %vm966_vm2, %v2544_v7  ;;  %5357 = vmatmul.mubr.msk.bf16.gmra.mrb[64].mxu1 %vm966_vm2, %v2544_v7 }
 0x656   : > { %2800 = vmatprep.mubr.bf16.mxu0 %v6643_v28  ;;  %4085 = vmatprep.mubr.bf16.mxu1 %v6643_v28 }
 0x65d   : > { %5258 = vmatmul.mubr.msk.bf16.vlgmr.msra.gmra.mrb[20].mxu0 %vm966_vm2, %v7206_v8  ;;  %5366 = vmatmul.mubr.msk.bf16.vlgmr.msra.gmra.mrb[52].mxu1 %vm966_vm2, %v7206_v8  ;;  %v6487_v8 = vld [vmem:[%s7782_s10 + $0xd0] sm:$0xff]  }
 0x65e   : > { %2810 = vmatprep.mubr.bf16.mxu0 %v6643_v28  ;;  %4095 = vmatprep.mubr.bf16.mxu1 %v6643_v28 }
 0x65f   : > { %5558 = vmatpush3.bf16.msra.mxu0 %v6481_v30  ;;  %5598 = vmatpush3.bf16.msra.mxu1 %v6482_v0 }
 0x660   : > { %5559 = vmatprep.subr.bf16.mxu0 %v6483_v13  ;;  %5599 = vmatprep.subr.bf16.mxu1 %v6484_v9 }
 0x663   : > { %5560 = vmatpush3.bf16.msra.mxu0 %v6485_v10  ;;  %5600 = vmatpush3.bf16.msra.mxu1 %v6486_v14 }
 0x664   : > { %5561 = vmatprep.subr.bf16.mxu0 %v6487_v8  ;;  %5601 = vmatprep.subr.bf16.mxu1 %v6488_v15 }
 0x665   : > { %5259 = vmatmul.mubr.msk.bf16.gmra.mrb[24].mxu0 %vm966_vm2, %v7216_v18  ;;  %5367 = vmatmul.mubr.msk.bf16.gmra.mrb[56].mxu1 %vm966_vm2, %v7216_v18  ;;  %v6495_v18 = vld [vmem:[%s7782_s10 + $0xe0] sm:$0xff]  }
 0x666   : > { %2820 = vmatprep.mubr.bf16.mxu0 %v6643_v28  ;;  %4105 = vmatprep.mubr.bf16.mxu1 %v6643_v28 }
 0x667   : > { %5562 = vmatpush3.bf16.msra.mxu0 %v6489_v1  ;;  %5602 = vmatpush3.bf16.msra.mxu1 %v6490_v4 }
 0x668   : > { %5563 = vmatprep.subr.bf16.mxu0 %v6491_v11  ;;  %5603 = vmatprep.subr.bf16.mxu1 %v6492_v16 }
 0x66b   : > { %5564 = vmatpush3.bf16.msra.mxu0 %v6493_v17  ;;  %5604 = vmatpush3.bf16.msra.mxu1 %v6494_v20 }
 0x66c   : > { %5565 = vmatprep.subr.bf16.mxu0 %v6495_v18  ;;  %5605 = vmatprep.subr.bf16.mxu1 %v6496_v24 }
 0x66d   : > { %5260 = vmatmul.mubr.msk.bf16.gmra.mrb[28].mxu0 %vm966_vm2, %v7228_v12  ;;  %5368 = vmatmul.mubr.msk.bf16.gmra.mrb[60].mxu1 %vm966_vm2, %v7228_v12  ;;  %v6502_v12 = vld [vmem:[%s7782_s10 + $0x28] sm:$0xff]  }
 0x66e   : > { %2830 = vmatprep.mubr.bf16.mxu0 %v6643_v28  ;;  %4115 = vmatprep.mubr.bf16.mxu1 %v6643_v28  ;;  %v6503_v28 = vld [vmem:[%s7782_s10 + $0xf0] sm:$0xff]  }
 0x66f   : > { %5566 = vmatpush3.bf16.msra.mxu0 %v6497_v25  ;;  %5606 = vmatpush3.bf16.msra.mxu1 %v6498_v29 }
 0x670   : > { %5567 = vmatprep.subr.bf16.mxu0 %v6499_v26  ;;  %5607 = vmatprep.subr.bf16.mxu1 %v6500_v31 }
 0x673   : > { %5568 = vmatpush3.bf16.msra.mxu0 %v6501_v33  ;;  %5608 = vmatpush3.bf16.msra.mxu1 %v6502_v12 }
 0x674   : > { %5569 = vmatprep.subr.bf16.mxu0 %v6503_v28  ;;  %5609 = vmatprep.subr.bf16.mxu1 %v6504_v54 }
 0x675   : > { %5261 = vmatmul.mubr.msk.bf16.gmra.mrb[32].mxu0 %vm966_vm2, %v2706_v21  ;;  %5369 = vmatmul.mubr.msk.bf16.gmra.mrb[64].mxu1 %vm966_vm2, %v2706_v21 }
 0x677   : > { %5570 = vmatpush3.bf16.msra.mxu0 %v6505_v35  ;;  %5610 = vmatpush3.bf16.msra.mxu1 %v6506_v34 }
 0x678   : > { %5571 = vmatprep.subr.bf16.mxu0 %v6507_v37  ;;  %5611 = vmatprep.subr.bf16.mxu1 %v6508_v38 }
 0x67b   : > { %5572 = vmatpush3.bf16.msra.mxu0 %v6509_v49  ;;  %5612 = vmatpush3.bf16.msra.mxu1 %v6510_v39 }
 0x730   : > { %v2802_v23 = vpop.f32.mrb[20].mxu0  ;;  %v4087_v53 = vpop.f32.mrb[52].mxu1 }
 0x731   : > { %v2869_v51 = vadd.f32 %v7477_v47, %v2802_v23  ;;  %v4154_v55 = vadd.f32 %v7479_v48, %v4087_v53  ;;  %v2804_v27 = vpop.f32.mrb[21].mxu0  ;;  %v4089_v32 = vpop.f32.mrb[53].mxu1 }
 0x732   : > { %v2870_v56 = vadd.f32 %v7481_v52, %v2804_v27  ;;  %v4155_v57 = vadd.f32 %v7483_v41, %v4089_v32  ;;  %v2806_v58 = vpop.f32.mrb[22].mxu0  ;;  %v4091_v60 = vpop.f32.mrb[54].mxu1 }
 0x733   : > { %v2871_v36 = vadd.f32 %v7477_v47, %v2806_v58  ;;  %v4156_v61 = vadd.f32 %v7479_v48, %v4091_v60  ;;  %v2808_v45 = vpop.f32.mrb[23].mxu0  ;;  %v4093_v62 = vpop.f32.mrb[55].mxu1  ;;  %v2885_v2 = vmax.f32 %v2869_v51, 0.0  ;;  %v4170_v3 = vmax.f32 %v4154_v55, 0.0 }
 0x734   : > { %v2872_v63 = vadd.f32 %v7481_v52, %v2808_v45  ;;  %v4157_v50 = vadd.f32 %v7483_v41, %v4093_v62  ;;  %v2886_v22 = vmax.f32 %v2870_v56, 0.0  ;;  %v4171_v7 = vmax.f32 %v4155_v57, 0.0 }
 0x735   : > { %v2887_v5 = vmax.f32 %v2871_v36, 0.0  ;;  %v4172_v6 = vmax.f32 %v4156_v61, 0.0 }
 0x736   : > { %v2888_v30 = vmax.f32 %v2872_v63, 0.0  ;;  %v4173_v0 = vmax.f32 %v4157_v50, 0.0 }
 0x737   : > { %v2901_v13 = vpack.c.bf16 %v2887_v5, %v2885_v2  ;;  %v4186_v9 = vpack.c.bf16 %v4172_v6, %v4170_v3 }
 0x738   : > { %v2902_v10 = vpack.c.bf16 %v2888_v30, %v2886_v22  ;;  %v4187_v14 = vpack.c.bf16 %v4173_v0, %v4171_v7  ;;  %v2812_v8 = vpop.f32.mrb[24].mxu0  ;;  %v4097_v15 = vpop.f32.mrb[56].mxu1 }
 0x739   : > { %v2873_v1 = vadd.f32 %v7477_v47, %v2812_v8  ;;  %v4158_v4 = vadd.f32 %v7479_v48, %v4097_v15  ;;  %v2814_v11 = vpop.f32.mrb[25].mxu0  ;;  %v4099_v16 = vpop.f32.mrb[57].mxu1 }
 0x73a   : > { %v2874_v17 = vadd.f32 %v7481_v52, %v2814_v11  ;;  %v4159_v20 = vadd.f32 %v7483_v41, %v4099_v16  ;;  %v2816_v18 = vpop.f32.mrb[26].mxu0  ;;  %v4101_v24 = vpop.f32.mrb[58].mxu1  ;;  %4354 = vmatprep.mubr.bf16.mxu0 %v4187_v14  ;;  %4515 = vmatprep.mubr.bf16.mxu1 %v2902_v10 }
 0x73b   : > { %v2875_v25 = vadd.f32 %v7477_v47, %v2816_v18  ;;  %v4160_v29 = vadd.f32 %v7479_v48, %v4101_v24  ;;  %v2818_v26 = vpop.f32.mrb[27].mxu0  ;;  %v4103_v31 = vpop.f32.mrb[59].mxu1  ;;  %4355 = vmatmul.mubr.bf16.vlgmr.msra.gmra.mrb[36].mxu0 %v4186_v9  ;;  %4516 = vmatmul.mubr.bf16.vlgmr.msra.gmra.mrb[68].mxu1 %v2901_v13  ;;  %v2889_v33 = vmax.f32 %v2873_v1, 0.0  ;;  %v4174_v12 = vmax.f32 %v4158_v4, 0.0 }
 0x73c   : > { %v2876_v19 = vadd.f32 %v7481_v52, %v2818_v26  ;;  %v4161_v21 = vadd.f32 %v7483_v41, %v4103_v31  ;;  %v2890_v35 = vmax.f32 %v2874_v17, 0.0  ;;  %v4175_v34 = vmax.f32 %v4159_v20, 0.0 }
 0x73d   : > { %v2891_v28 = vmax.f32 %v2875_v25, 0.0  ;;  %v4176_v54 = vmax.f32 %v4160_v29, 0.0 }
 0x73e   : > { %v2892_v37 = vmax.f32 %v2876_v19, 0.0  ;;  %v4177_v38 = vmax.f32 %v4161_v21, 0.0 }
 0x73f   : > { %v2903_v49 = vpack.c.bf16 %v2891_v28, %v2889_v33  ;;  %v4188_v39 = vpack.c.bf16 %v4176_v54, %v4174_v12 }
 0x740   : > { %v2904_v40 = vpack.c.bf16 %v2892_v37, %v2890_v35  ;;  %v4189_v42 = vpack.c.bf16 %v4177_v38, %v4175_v34  ;;  %v2822_v43 = vpop.f32.mrb[28].mxu0  ;;  %v4107_v59 = vpop.f32.mrb[60].mxu1 }
 0x741   : > { %v2877_v44 = vadd.f32 %v7477_v47, %v2822_v43  ;;  %v4162_v46 = vadd.f32 %v7479_v48, %v4107_v59  ;;  %v2824_v23 = vpop.f32.mrb[29].mxu0  ;;  %v4109_v53 = vpop.f32.mrb[61].mxu1 }
 0x742   : > { %v2878_v51 = vadd.f32 %v7481_v52, %v2824_v23  ;;  %v4163_v55 = vadd.f32 %v7483_v41, %v4109_v53  ;;  %v2826_v27 = vpop.f32.mrb[30].mxu0  ;;  %v4111_v32 = vpop.f32.mrb[62].mxu1  ;;  %4362 = vmatprep.mubr.bf16.mxu0 %v4189_v42  ;;  %4523 = vmatprep.mubr.bf16.mxu1 %v2904_v40 }
 0x743   : > { %v2879_v56 = vadd.f32 %v7477_v47, %v2826_v27  ;;  %v4164_v57 = vadd.f32 %v7479_v48, %v4111_v32  ;;  %v2828_v58 = vpop.f32.mrb[31].mxu0  ;;  %v4113_v60 = vpop.f32.mrb[63].mxu1  ;;  %4363 = vmatmul.mubr.bf16.gmra.mrb[40].mxu0 %v4188_v39  ;;  %4524 = vmatmul.mubr.bf16.gmra.mrb[72].mxu1 %v2903_v49  ;;  %v2893_v45 = vmax.f32 %v2877_v44, 0.0  ;;  %v4178_v62 = vmax.f32 %v4162_v46, 0.0 }
 0x744   : > { %v2880_v36 = vadd.f32 %v7481_v52, %v2828_v58  ;;  %v4165_v61 = vadd.f32 %v7483_v41, %v4113_v60  ;;  %v2894_v2 = vmax.f32 %v2878_v51, 0.0  ;;  %v4179_v3 = vmax.f32 %v4163_v55, 0.0  ;;  %v5402_v51 = vld [vmem:[%s7783_s11] ss:$0 sm:$0xff] }
 0x745   : > { %v2895_v63 = vmax.f32 %v2879_v56, 0.0  ;;  %v4180_v50 = vmax.f32 %v4164_v57, 0.0 }
 0x746   : > { %v2896_v5 = vmax.f32 %v2880_v36, 0.0  ;;  %v4181_v6 = vmax.f32 %v4165_v61, 0.0 }
 0x747   : > { %v2905_v22 = vpack.c.bf16 %v2895_v63, %v2893_v45  ;;  %v4190_v7 = vpack.c.bf16 %v4180_v50, %v4178_v62 }
 0x748   : > { %v2906_v30 = vpack.c.bf16 %v2896_v5, %v2894_v2  ;;  %v4191_v0 = vpack.c.bf16 %v4181_v6, %v4179_v3  ;;  %v2832_v13 = vpop.f32.mrb[32].mxu0  ;;  %v4117_v9 = vpop.f32.mrb[64].mxu1 }
 0x749   : > { %v2881_v10 = vadd.f32 %v7477_v47, %v2832_v13  ;;  %v4166_v14 = vadd.f32 %v7479_v48, %v4117_v9  ;;  %v2834_v8 = vpop.f32.mrb[33].mxu0  ;;  %v4119_v15 = vpop.f32.mrb[65].mxu1 }
 0x74a   : > { %v2882_v1 = vadd.f32 %v7481_v52, %v2834_v8  ;;  %v4167_v4 = vadd.f32 %v7483_v41, %v4119_v15  ;;  %v2836_v11 = vpop.f32.mrb[34].mxu0  ;;  %v4121_v16 = vpop.f32.mrb[66].mxu1  ;;  %4370 = vmatprep.mubr.bf16.mxu0 %v4191_v0  ;;  %4531 = vmatprep.mubr.bf16.mxu1 %v2906_v30 }
 0x74b   : > { %v2883_v17 = vadd.f32 %v7477_v47, %v2836_v11  ;;  %v4168_v20 = vadd.f32 %v7479_v48, %v4121_v16  ;;  %v2838_v18 = vpop.f32.mrb[35].mxu0  ;;  %v4123_v24 = vpop.f32.mrb[67].mxu1  ;;  %4371 = vmatmul.mubr.bf16.gmra.mrb[44].mxu0 %v4190_v7  ;;  %4532 = vmatmul.mubr.bf16.gmra.mrb[76].mxu1 %v2905_v22  ;;  %v2897_v26 = vmax.f32 %v2881_v10, 0.0  ;;  %v4182_v31 = vmax.f32 %v4166_v14, 0.0 }
 0x74c   : > { %v2884_v25 = vadd.f32 %v7481_v52, %v2838_v18  ;;  %v4169_v29 = vadd.f32 %v7483_v41, %v4123_v24  ;;  %v2898_v33 = vmax.f32 %v2882_v1, 0.0  ;;  %v4183_v12 = vmax.f32 %v4167_v4, 0.0  ;;  %v4563_v52 = vld [vmem:[%s7784_s12] sm:$0xff] }
 0x74d   : > { %v2899_v19 = vmax.f32 %v2883_v17, 0.0  ;;  %v4184_v21 = vmax.f32 %v4168_v20, 0.0 }
 0x74e   : > { %v2900_v28 = vmax.f32 %v2884_v25, 0.0  ;;  %v4185_v54 = vmax.f32 %v4169_v29, 0.0 }
 0x74f   : > { %v2907_v35 = vpack.c.bf16 %v2899_v19, %v2897_v26  ;;  %v4192_v47 = vpack.c.bf16 %v4184_v21, %v4182_v31 }
 0x750   : > { %v2908_v34 = vpack.c.bf16 %v2900_v28, %v2898_v33  ;;  %v4193_v48 = vpack.c.bf16 %v4185_v54, %v4183_v12 }
 0x752   : > { %4378 = vmatprep.mubr.bf16.mxu0 %v4193_v48  ;;  %4539 = vmatprep.mubr.bf16.mxu1 %v2908_v34 }
 0x753   : > { %4379 = vmatmul.mubr.bf16.gmra.mrb[48].mxu0 %v4192_v47  ;;  %4540 = vmatmul.mubr.bf16.gmra.mrb[80].mxu1 %v2907_v35 }
 0x754   : > { %5795 = vmatprep.mubr.msk.f32.mxu0 %vm966_vm2, %v4563_v52 }
 0x80e   : > { %v5573_v41 = vpop.f32.mrb[36].mxu0  ;;  %v5613_v37 = vpop.f32.mrb[68].mxu1 }
 0x80f   : > { %v5574_v38 = vpop.f32.mrb[37].mxu0  ;;  %v5614_v49 = vpop.f32.mrb[69].mxu1 }
 0x810   : > { %v5575_v39 = vadd.f32 %v5574_v38, %v5573_v41  ;;  %v5615_v40 = vadd.f32 %v5614_v49, %v5613_v37  ;;  %v5576_v42 = vpop.f32.mrb[38].mxu0  ;;  %v5616_v43 = vpop.f32.mrb[70].mxu1 }
 0x811   : > { %v5577_v59 = vpop.f32.mrb[39].mxu0  ;;  %v5617_v44 = vpop.f32.mrb[71].mxu1 }
 0x812   : > { %v4518_v46 = vadd.f32 %v5615_v40, %v5575_v39  ;;  %v5578_v23 = vadd.f32 %v5577_v59, %v5576_v42  ;;  %v5618_v53 = vadd.f32 %v5617_v44, %v5616_v43  ;;  %v4564_v40 = vld [vmem:[%s7784_s12 + $0x8] sm:$0xff]  ;;  %v4565_v42 = vld [vmem:[%s7784_s12 + $0x10] sm:$0xff]  ;;  %v4566_v43 = vld [vmem:[%s7784_s12 + $0x18] sm:$0xff] }
 0x813   : > { %v4567_v59 = vld [vmem:[%s7784_s12 + $0x20] sm:$0xff]  ;;  %v4568_v44 = vld [vmem:[%s7784_s12 + $0x28] sm:$0xff] }
 0x814   : > { %v4521_v55 = vadd.f32 %v5618_v53, %v5578_v23  ;;  %v4555_v27 = vadd.f32 %v5402_v51, %v4518_v46  ;;  %v4569_v46 = vld [vmem:[%s7784_s12 + $0x30] sm:$0xff]  ;;  %v4570_v23 = vld [vmem:[%s7784_s12 + $0x38] sm:$0xff]  ;;  %v4571_v53 = vld [vmem:[%s7784_s12 + $0x40] sm:$0xff] }
 0x816   : > { %v4556_v32 = vadd.f32 %v5402_v51, %v4521_v55  ;;  %v5579_v56 = vpop.f32.mrb[40].mxu0  ;;  %v5619_v57 = vpop.f32.mrb[72].mxu1  ;;  %v4573_v55 = vld [vmem:[%s7784_s12 + $0x50] sm:$0xff] }
 0x817   : > { %v5580_v58 = vpop.f32.mrb[41].mxu0  ;;  %v5620_v60 = vpop.f32.mrb[73].mxu1 }
 0x818   : > { %v5581_v36 = vadd.f32 %v5580_v58, %v5579_v56  ;;  %v5621_v61 = vadd.f32 %v5620_v60, %v5619_v57  ;;  %v5582_v45 = vpop.f32.mrb[42].mxu0  ;;  %v5622_v62 = vpop.f32.mrb[74].mxu1  ;;  %v5907_v63 = vpack.c.bf16 %v4556_v32, %v4555_v27  ;;  %v4574_v27 = vld [vmem:[%s7784_s12 + $0x58] sm:$0xff]  ;;  %v4575_v32 = vld [vmem:[%s7784_s12 + $0x60] sm:$0xff]  ;;  %v4576_v56 = vld [vmem:[%s7784_s12 + $0x68] sm:$0xff] }
 0x819   : > { %v5583_v50 = vpop.f32.mrb[43].mxu0  ;;  %v5623_v2 = vpop.f32.mrb[75].mxu1  ;;  %v4577_v57 = vld [vmem:[%s7784_s12 + $0x70] sm:$0xff]  ;;  %v4578_v58 = vld [vmem:[%s7784_s12 + $0x78] sm:$0xff]  ;;  %v4579_v60 = vld [vmem:[%s7784_s12 + $0x80] sm:$0xff] }
 0x81a   : > { %v4526_v3 = vadd.f32 %v5621_v61, %v5581_v36  ;;  %v5584_v5 = vadd.f32 %v5583_v50, %v5582_v45  ;;  %v5624_v6 = vadd.f32 %v5623_v2, %v5622_v62  ;;  %5908 = vmatprep.subr.bf16.mxu0 %v5907_v63  ;;  %v4580_v36 = vld [vmem:[%s7784_s12 + $0x88] sm:$0xff]  ;;  %v4581_v61 = vld [vmem:[%s7784_s12 + $0x90] sm:$0xff]  ;;  %v4582_v45 = vld [vmem:[%s7784_s12 + $0x98] sm:$0xff] }
 0x81b   : > { %5910 = vmatpush3.bf16.msra.mxu0 %v5907_v63  ;;  %v4583_v62 = vld [vmem:[%s7784_s12 + $0xa0] sm:$0xff]  ;;  %v4584_v63 = vld [vmem:[%s7784_s12 + $0xa8] sm:$0xff]  ;;  %v4585_v50 = vld [vmem:[%s7784_s12 + $0xb0] sm:$0xff] }
 0x81c   : > { %v4529_v22 = vadd.f32 %v5624_v6, %v5584_v5  ;;  %v4557_v7 = vadd.f32 %v5402_v51, %v4526_v3  ;;  %v4586_v2 = vld [vmem:[%s7784_s12 + $0xb8] sm:$0xff]  ;;  %v4587_v3 = vld [vmem:[%s7784_s12 + $0xc0] sm:$0xff]  ;;  %v4588_v5 = vld [vmem:[%s7784_s12 + $0xc8] sm:$0xff] }
 0x81d   : > { %v4589_v6 = vld [vmem:[%s7784_s12 + $0xd0] sm:$0xff] }
 0x81e   : > { %v4558_v30 = vadd.f32 %v5402_v51, %v4529_v22  ;;  %v5585_v0 = vpop.f32.mrb[44].mxu0  ;;  %v5625_v13 = vpop.f32.mrb[76].mxu1  ;;  %v4590_v22 = vld [vmem:[%s7784_s12 + $0xd8] sm:$0xff] }
 0x81f   : > { %v5586_v9 = vpop.f32.mrb[45].mxu0  ;;  %v5626_v10 = vpop.f32.mrb[77].mxu1 }
 0x820   : > { %v5587_v14 = vadd.f32 %v5586_v9, %v5585_v0  ;;  %v5627_v8 = vadd.f32 %v5626_v10, %v5625_v13  ;;  %v5588_v15 = vpop.f32.mrb[46].mxu0  ;;  %v5628_v1 = vpop.f32.mrb[78].mxu1  ;;  %v5911_v4 = vpack.c.bf16 %v4558_v30, %v4557_v7  ;;  %v4591_v7 = vld [vmem:[%s7784_s12 + $0xe0] sm:$0xff]  ;;  %v4592_v30 = vld [vmem:[%s7784_s12 + $0xe8] sm:$0xff]  ;;  %v4593_v0 = vld [vmem:[%s7784_s12 + $0xf0] sm:$0xff] }
 0x821   : > { %v5589_v11 = vpop.f32.mrb[47].mxu0  ;;  %v5629_v16 = vpop.f32.mrb[79].mxu1  ;;  %v4594_v13 = vld [vmem:[%s7784_s12 + $0xf8] sm:$0xff] }
 0x822   : > { %v4534_v17 = vadd.f32 %v5627_v8, %v5587_v14  ;;  %v5590_v20 = vadd.f32 %v5589_v11, %v5588_v15  ;;  %v5630_v18 = vadd.f32 %v5629_v16, %v5628_v1  ;;  %5912 = vmatprep.subr.bf16.mxu0 %v5911_v4 }
 0x823   : > { %5914 = vmatpush3.bf16.msra.mxu0 %v5911_v4 }
 0x824   : > { %v4537_v24 = vadd.f32 %v5630_v18, %v5590_v20  ;;  %v4559_v25 = vadd.f32 %v5402_v51, %v4534_v17 }
 0x826   : > { %v4560_v29 = vadd.f32 %v5402_v51, %v4537_v24  ;;  %v5591_v26 = vpop.f32.mrb[48].mxu0  ;;  %v5631_v31 = vpop.f32.mrb[80].mxu1 }
 0x827   : > { %v5592_v19 = vpop.f32.mrb[49].mxu0  ;;  %v5632_v21 = vpop.f32.mrb[81].mxu1 }
 0x828   : > { %v5593_v33 = vadd.f32 %v5592_v19, %v5591_v26  ;;  %v5633_v12 = vadd.f32 %v5632_v21, %v5631_v31  ;;  %v5594_v28 = vpop.f32.mrb[50].mxu0  ;;  %v5634_v54 = vpop.f32.mrb[82].mxu1  ;;  %v5915_v35 = vpack.c.bf16 %v4560_v29, %v4559_v25 }
 0x829   : > { %v5595_v47 = vpop.f32.mrb[51].mxu0  ;;  %v5635_v34 = vpop.f32.mrb[83].mxu1 }
 0x82a   : > { %v4542_v48 = vadd.f32 %v5633_v12, %v5593_v33  ;;  %v5596_v52 = vadd.f32 %v5595_v47, %v5594_v28  ;;  %v5636_v41 = vadd.f32 %v5635_v34, %v5634_v54  ;;  %5916 = vmatprep.subr.bf16.mxu0 %v5915_v35 }
 0x82b   : > { %5918 = vmatpush3.bf16.msra.mxu0 %v5915_v35 }
 0x82c   : > { %v4545_v37 = vadd.f32 %v5636_v41, %v5596_v52  ;;  %v4561_v38 = vadd.f32 %v5402_v51, %v4542_v48 }
 0x82e   : > { %v4562_v49 = vadd.f32 %v5402_v51, %v4545_v37  ;;  %v4572_v51 = vld [vmem:[%s7784_s12 + $0x48] sm:$0xff] }
 0x830   : > { %v5919_v39 = vpack.c.bf16 %v4562_v49, %v4561_v38 }
 0x832   : > { %5920 = vmatprep.subr.bf16.mxu0 %v5919_v39 }
 0x833   : > { %5922 = vmatpush3.bf16.msra.mxu0 %v5919_v39 }
 0x836   : > { %5796 = vmatmul.mubr.msk.f32.vlgmr.msra.gmra.mrb[52].mxu0 %vm966_vm2, %v4564_v40 }
 0x837   : > { %5798 = vmatprep.mubr.msk.f32.mxu0 %vm966_vm2, %v4565_v42 }
 0x83a   : > { %5799 = vmatmul.mubr.msk.f32.gmra.mrb[54].mxu0 %vm966_vm2, %v4566_v43 }
 0x83b   : > { %5801 = vmatprep.mubr.msk.f32.mxu0 %vm966_vm2, %v4567_v59 }
 0x83e   : > { %5802 = vmatmul.mubr.msk.f32.gmra.mrb[56].mxu0 %vm966_vm2, %v4568_v44 }
 0x83f   : > { %5804 = vmatprep.mubr.msk.f32.mxu0 %vm966_vm2, %v4569_v46 }
 0x842   : > { %5805 = vmatmul.mubr.msk.f32.gmra.mrb[58].mxu0 %vm966_vm2, %v4570_v23 }
 0x843   : > { %5807 = vmatprep.mubr.msk.f32.mxu0 %vm966_vm2, %v4571_v53 }
 0x846   : > { %5808 = vmatmul.mubr.msk.f32.gmra.mrb[60].mxu0 %vm966_vm2, %v4572_v51 }
 0x847   : > { %5810 = vmatprep.mubr.msk.f32.mxu0 %vm966_vm2, %v4573_v55 }
 0x84a   : > { %5811 = vmatmul.mubr.msk.f32.gmra.mrb[62].mxu0 %vm966_vm2, %v4574_v27 }
 0x84b   : > { %5813 = vmatprep.mubr.msk.f32.mxu0 %vm966_vm2, %v4575_v32 }
 0x84e   : > { %5814 = vmatmul.mubr.msk.f32.gmra.mrb[64].mxu0 %vm966_vm2, %v4576_v56 }
 0x84f   : > { %5816 = vmatprep.mubr.msk.f32.mxu0 %vm966_vm2, %v4577_v57 }
 0x852   : > { %5817 = vmatmul.mubr.msk.f32.gmra.mrb[66].mxu0 %vm966_vm2, %v4578_v58 }
 0x853   : > { %5819 = vmatprep.mubr.msk.f32.mxu0 %vm966_vm2, %v4579_v60 }
 0x856   : > { %5820 = vmatmul.mubr.msk.f32.gmra.mrb[68].mxu0 %vm966_vm2, %v4580_v36 }
 0x857   : > { %5822 = vmatprep.mubr.msk.f32.mxu0 %vm966_vm2, %v4581_v61 }
 0x85a   : > { %5823 = vmatmul.mubr.msk.f32.gmra.mrb[70].mxu0 %vm966_vm2, %v4582_v45 }
 0x85b   : > { %5825 = vmatprep.mubr.msk.f32.mxu0 %vm966_vm2, %v4583_v62 }
 0x85e   : > { %5826 = vmatmul.mubr.msk.f32.gmra.mrb[72].mxu0 %vm966_vm2, %v4584_v63 }
 0x85f   : > { %5828 = vmatprep.mubr.msk.f32.mxu0 %vm966_vm2, %v4585_v50 }
 0x862   : > { %5829 = vmatmul.mubr.msk.f32.gmra.mrb[74].mxu0 %vm966_vm2, %v4586_v2 }
 0x863   : > { %5831 = vmatprep.mubr.msk.f32.mxu0 %vm966_vm2, %v4587_v3 }
 0x866   : > { %5832 = vmatmul.mubr.msk.f32.gmra.mrb[76].mxu0 %vm966_vm2, %v4588_v5 }
 0x867   : > { %5834 = vmatprep.mubr.msk.f32.mxu0 %vm966_vm2, %v4589_v6 }
 0x86a   : > { %5835 = vmatmul.mubr.msk.f32.gmra.mrb[78].mxu0 %vm966_vm2, %v4590_v22 }
 0x86b   : > { %5837 = vmatprep.mubr.msk.f32.mxu0 %vm966_vm2, %v4591_v7 }
 0x86e   : > { %5838 = vmatmul.mubr.msk.f32.gmra.mrb[80].mxu0 %vm966_vm2, %v4592_v30 }
 0x86f   : > { %5840 = vmatprep.mubr.msk.f32.mxu0 %vm966_vm2, %v4593_v0 }
 0x872   : > { %5841 = vmatmul.mubr.msk.f32.gmra.mrb[82].mxu0 %vm966_vm2, %v4594_v13 }
 0x873   : > { %6552 = shalt.err (!%p6549_p7)
}
 0x874   : > { %s6553_s21 = scalar_lea.hbm %s7653_s0, 1024  ;;  %s6557_s15 = scalar_lea.hbm %s7785_s13, 2048 }
 0x875   : > { %p6554_p8 = scmp.ne.s32.totalorder %s7653_s0, %s6553_s21  ;;  %p6558_p1 = scmp.lt.u32.totalorder %s7653_s0, %s7785_s13 }
 0x876   : > { %p6559_p0 = scmp.lt.u32.totalorder %s6557_s15, %s6553_s21  ;;  %p6561_p6 = scmp.lt.u32.totalorder %s6553_s21, %s7653_s0 }
 0x877   : > { %p6555_p11 = pnand %p6554_p8, %p7807_p9 }
 0x878   : > { %p6560_p5 = por %p6559_p0, %p6558_p1 }
 0x879   : > { %p6556_p13 = pneg %p6555_p11 }
 0x87a   : > { %p6562_p10 = por %p6561_p6, %p6560_p5 }
 0x87c   : > { %p6563_p12 = pnand %p6562_p10, %p6556_p13 }
 0x87e   : > { %6566 = shalt.err (!%p6563_p12)
}
 0x87f   : > { %s6646_s18 = smov 128   ;;  %s6647_s24 = smov 8  }
 0x880   : > { %6187 = dma.vmem_to_hbm [thread:$0]  (%p7807_p9), %s7655_s25, 1024, %s7653_s0, %s4949_s22, %s6646_s18, %s6646_s18, %s6647_s24  }
 0x881   : > { %s5096_s26 = sshll.u32 %s6908_s20, 8  ;;  %s5445_s25 = sshll.u32 %s6745_s17, 12 }
 0x882   : > { %s7685_s27 = scalar_lea.vmem [#allocation7], %s5096_s26  ;;  %s7722_s15 = scalar_lea.hbm %s7786_s14, %s5445_s25 }
 0x883   : > { %s4983_s0 = sshll.u32 %s7685_s27, 4  ;;  %s6648_s17 = smov [#allocation7]   ;;  %s7724_s0 = int_to_ptr.vmem [resolvable:$true] %s4983_s0 }
 0x884   : > { %s6567_s28 = scalar_lea.vmem %s7724_s0, 4096  ;;  %s6571_s26 = sshll.u32 %s6648_s17, 4  ;;  %s6572_s26 = int_to_ptr.vmem [resolvable:$false] %s6571_s26 }
 0x885   : > { %p6568_p2 = scmp.ne.s32.totalorder %s7724_s0, %s6567_s28  ;;  %s6573_s22 = scalar_lea.vmem %s6572_s26, 8192 }
 0x886   : > { %p6574_p7 = scmp.lt.s32.totalorder %s7724_s0, %s6572_s26  ;;  %p6575_p8 = scmp.lt.s32.totalorder %s6573_s22, %s6567_s28 }
 0x887   : > { %p6569_p3 = pnand %p6568_p2, %p7807_p9 }
 0x888   : > { %p6576_p11 = por %p6575_p8, %p6574_p7 }
 0x889   : > { %p6570_p4 = pneg %p6569_p3 }
 0x88b   : > { %p6577_p13 = pnand %p6576_p11, %p6570_p4 }
 0x909   : > { %v5797_v9 = vpop.f32.mrb[52].mxu0 }
 0x90a   : > { %4917 = vst [vmem:[%s7685_s27 + $0x8] sm:$0xff] %v5797_v9  ;;  %v4757_v10 = vpop.f32.mrb[53].mxu0 }
 0x90b   : > { %4916 = vst [vmem:[%s7685_s27] sm:$0xff] %v4757_v10 }
 0x90d   : > { %v5800_v14 = vpop.f32.mrb[54].mxu0 }
 0x90e   : > { %4919 = vst [vmem:[%s7685_s27 + $0x18] sm:$0xff] %v5800_v14  ;;  %v4767_v8 = vpop.f32.mrb[55].mxu0 }
 0x90f   : > { %4918 = vst [vmem:[%s7685_s27 + $0x10] sm:$0xff] %v4767_v8 }
 0x911   : > { %v5803_v15 = vpop.f32.mrb[56].mxu0 }
 0x912   : > { %4921 = vst [vmem:[%s7685_s27 + $0x28] sm:$0xff] %v5803_v15  ;;  %v4777_v1 = vpop.f32.mrb[57].mxu0 }
 0x913   : > { %4920 = vst [vmem:[%s7685_s27 + $0x20] sm:$0xff] %v4777_v1 }
 0x915   : > { %v5806_v4 = vpop.f32.mrb[58].mxu0 }
 0x916   : > { %4923 = vst [vmem:[%s7685_s27 + $0x38] sm:$0xff] %v5806_v4  ;;  %v4787_v11 = vpop.f32.mrb[59].mxu0 }
 0x917   : > { %4922 = vst [vmem:[%s7685_s27 + $0x30] sm:$0xff] %v4787_v11 }
 0x919   : > { %v5809_v16 = vpop.f32.mrb[60].mxu0 }
 0x91a   : > { %4925 = vst [vmem:[%s7685_s27 + $0x48] sm:$0xff] %v5809_v16  ;;  %v4797_v17 = vpop.f32.mrb[61].mxu0 }
 0x91b   : > { %4924 = vst [vmem:[%s7685_s27 + $0x40] sm:$0xff] %v4797_v17 }
 0x91d   : > { %v5812_v20 = vpop.f32.mrb[62].mxu0 }
 0x91e   : > { %4927 = vst [vmem:[%s7685_s27 + $0x58] sm:$0xff] %v5812_v20  ;;  %v4807_v18 = vpop.f32.mrb[63].mxu0 }
 0x91f   : > { %4926 = vst [vmem:[%s7685_s27 + $0x50] sm:$0xff] %v4807_v18 }
 0x921   : > { %v5815_v24 = vpop.f32.mrb[64].mxu0 }
 0x922   : > { %4929 = vst [vmem:[%s7685_s27 + $0x68] sm:$0xff] %v5815_v24  ;;  %v4817_v25 = vpop.f32.mrb[65].mxu0 }
 0x923   : > { %4928 = vst [vmem:[%s7685_s27 + $0x60] sm:$0xff] %v4817_v25 }
 0x925   : > { %v5818_v29 = vpop.f32.mrb[66].mxu0 }
 0x926   : > { %4931 = vst [vmem:[%s7685_s27 + $0x78] sm:$0xff] %v5818_v29  ;;  %v4827_v26 = vpop.f32.mrb[67].mxu0 }
 0x927   : > { %4930 = vst [vmem:[%s7685_s27 + $0x70] sm:$0xff] %v4827_v26 }
 0x929   : > { %v5821_v31 = vpop.f32.mrb[68].mxu0 }
 0x92a   : > { %4933 = vst [vmem:[%s7685_s27 + $0x88] sm:$0xff] %v5821_v31  ;;  %v4837_v19 = vpop.f32.mrb[69].mxu0 }
 0x92b   : > { %4932 = vst [vmem:[%s7685_s27 + $0x80] sm:$0xff] %v4837_v19 }
 0x92d   : > { %v5824_v21 = vpop.f32.mrb[70].mxu0 }
 0x92e   : > { %4935 = vst [vmem:[%s7685_s27 + $0x98] sm:$0xff] %v5824_v21  ;;  %v4847_v33 = vpop.f32.mrb[71].mxu0 }
 0x92f   : > { %4934 = vst [vmem:[%s7685_s27 + $0x90] sm:$0xff] %v4847_v33 }
 0x931   : > { %v5827_v12 = vpop.f32.mrb[72].mxu0 }
 0x932   : > { %4937 = vst [vmem:[%s7685_s27 + $0xa8] sm:$0xff] %v5827_v12  ;;  %v4857_v28 = vpop.f32.mrb[73].mxu0 }
 0x933   : > { %4936 = vst [vmem:[%s7685_s27 + $0xa0] sm:$0xff] %v4857_v28 }
 0x935   : > { %v5830_v54 = vpop.f32.mrb[74].mxu0 }
 0x936   : > { %4939 = vst [vmem:[%s7685_s27 + $0xb8] sm:$0xff] %v5830_v54  ;;  %v4867_v35 = vpop.f32.mrb[75].mxu0 }
 0x937   : > { %4938 = vst [vmem:[%s7685_s27 + $0xb0] sm:$0xff] %v4867_v35 }
 0x939   : > { %v5833_v47 = vpop.f32.mrb[76].mxu0 }
 0x93a   : > { %4941 = vst [vmem:[%s7685_s27 + $0xc8] sm:$0xff] %v5833_v47  ;;  %v4877_v34 = vpop.f32.mrb[77].mxu0 }
 0x93b   : > { %4940 = vst [vmem:[%s7685_s27 + $0xc0] sm:$0xff] %v4877_v34 }
 0x93d   : > { %v5836_v48 = vpop.f32.mrb[78].mxu0 }
 0x93e   : > { %4943 = vst [vmem:[%s7685_s27 + $0xd8] sm:$0xff] %v5836_v48  ;;  %v4887_v52 = vpop.f32.mrb[79].mxu0 }
 0x93f   : > { %4942 = vst [vmem:[%s7685_s27 + $0xd0] sm:$0xff] %v4887_v52 }
 0x941   : > { %v5839_v41 = vpop.f32.mrb[80].mxu0 }
 0x942   : > { %4945 = vst [vmem:[%s7685_s27 + $0xe8] sm:$0xff] %v5839_v41  ;;  %v4897_v37 = vpop.f32.mrb[81].mxu0 }
 0x943   : > { %4944 = vst [vmem:[%s7685_s27 + $0xe0] sm:$0xff] %v4897_v37 }
 0x945   : > { %v5842_v38 = vpop.f32.mrb[82].mxu0 }
 0x946   : > { %4947 = vst [vmem:[%s7685_s27 + $0xf8] sm:$0xff] %v5842_v38  ;;  %v4907_v49 = vpop.f32.mrb[83].mxu0 }
 0x947   : > { %4946 = vst [vmem:[%s7685_s27 + $0xf0] sm:$0xff] %v4907_v49 }
 0x948   : > { %6580 = shalt.err (!%p6577_p13)
}
 0x949   : > { %s6581_s27 = scalar_lea.hbm %s7722_s15, 4096  ;;  %s6585_s17 = scalar_lea.hbm %s7786_s14, 8192 }
 0x94a   : > { %p6582_p1 = scmp.ne.s32.totalorder %s7722_s15, %s6581_s27  ;;  %p6586_p6 = scmp.lt.u32.totalorder %s7722_s15, %s7786_s14 }
 0x94b   : > { %p6587_p10 = scmp.lt.u32.totalorder %s6585_s17, %s6581_s27  ;;  %p6589_p2 = scmp.lt.u32.totalorder %s6581_s27, %s7722_s15 }
 0x94c   : > { %p6583_p0 = pnand %p6582_p1, %p7807_p9 }
 0x94d   : > { %p6588_p12 = por %p6587_p10, %p6586_p6 }
 0x94e   : > { %p6584_p5 = pneg %p6583_p0 }
 0x94f   : > { %p6590_p3 = por %p6589_p2, %p6588_p12 }
 0x951   : > { %p6591_p4 = pnand %p6590_p3, %p6584_p5 }
 0x953   : > { %6594 = shalt.err (!%p6591_p4)
}
 0x954   : > { %s7808_s28 = scalar_lea.sflag [#allocation8], %s6908_s20 }
 0x955   : > { %6188 = dma.vmem_to_hbm [thread:$0]  (%p7807_p9), %s7724_s0, 4096, %s7722_s15, %s7808_s28, %s6646_s18, %s6646_s18, %s6647_s24  }
 0x956 PF: > { %s7809_s19 = sld [smem:[#allocation15_spill]]  ;;  %p6204_p7 = scmp.ge.s32.totalorder %s6637_s16, 2 }
 0x957   : > { %s4998_s22 = sand.u32 1, %s6625_s29  }
 0x958   : > { %s4999_s27 = scalar_lea.sflag [#allocation5], %s4998_s22 }
 0x95c   : > { %p7810_p8 = scmp.ne.s32.totalorder %s7809_s19, 0 }
 0x95e   : > { %p6196_p11 = pnand %p6204_p7, %p7810_p8 }
 0x960   : > { %6616 = dma.done.wait (!%p6196_p11), %s4999_s27, 1024  }
 0x961   : > { %6618 = vsyncadd (!%p6196_p11), %s4999_s27, 4294966272  ;;  %s5008_s23 = scalar_lea.sflag [#allocation8], %s4998_s22 }
 0x962   : > { %6620 = dma.done.wait (!%p6196_p11), %s5008_s23, 4096  }
 0x963   : > { %6622 = vsyncadd (!%p6196_p11), %s5008_s23, 4294963200  ;;  %s7811_s16 = sld [smem:[#allocation13_spill]]  ;;  %s7812_s20 = sld [smem:[#allocation12_spill]] }
 0x964   : > { %s7813_s15 = sld [smem:[#allocation14_spill]]  ;;  %s7814_s29 = smov %s6629_s30 }
 0x969   : > { %p29_p9 = scmp.ge.s32.totalorder %s7811_s16, 4   ;;  %s7815_s30 = smov %s7812_s20 }
 0x96b   :  { %31 = sbr.rel (!%p29_p9) target bundleno = 8 (0x8), region = 139 }
 0x972   :  { %5013 = vsyncpa [#allocation4], 1 }
 0x973   :  { %5015 = vsyncpa [#allocation4 + $0x1], 1 }
 0x974   :  { %5016 = vsyncpa [#allocation5], 1 }
 0x975   :  { %5018 = vsyncpa [#allocation5 + $0x1], 1 }
 0x976   :  { %5019 = vsyncpa [#allocation8], 1 }
 0x977   :  { %5021 = vsyncpa [#allocation8 + $0x1], 1 }

</bundles_post_ra>
